<compile_context>
chip_gen: v6e
topology: v6e:2x2x1
jax: 0.10.0
libtpu: 0.0.40
codegen_flags: <defaults>
</compile_context>

<pallas_src>
import functools

import jax
import jax.numpy as jnp
from jax.experimental import pallas as pl
from jax.experimental.pallas import tpu as pltpu

EPS = 1e-16


def _round_up(x, m):
    return (x + m - 1) // m * m


def _cd_update(fac_ref, a, b, rank):
    """CoordinateDescent.update_u, batched over the G leading axis.

    fac_ref: VMEM ref (G, R, D) -- factor being updated (rank-major rows, lane-dense D).
    a:       (G, R, D) == batched (x @ other)^T
    b:       (G, R, R) == batched other^T @ other (symmetric Gram matrix)
    Rows are updated Gauss-Seidel style and stored in place (no concatenate).
    """
    if rank == 1:
        fac_ref[...] = (a + EPS) * pl.reciprocal(b + EPS, approx=True)
        return

    fac = fac_ref[...]
    rows = [fac[:, j:j + 1, :] for j in range(rank)]            # (G, 1, D) each
    for r in range(rank):
        # term2 = sum_{j != r} b[:, j, r] * rows[j] -- per-batch scalar-broadcast FMAs (VPU).
        term2 = None
        for j in range(rank):
            if j == r:
                continue
            contrib = b[:, j:j + 1, r:r + 1] * rows[j]          # (G,1,1) * (G,1,D)
            term2 = contrib if term2 is None else term2 + contrib
        numer = a[:, r:r + 1, :] - term2 + EPS                  # (G, 1, D)
        inv_den = pl.reciprocal(b[:, r:r + 1, r:r + 1] + EPS, approx=True)   # EUP, ~free
        new_row = numer * inv_den                               # (G, 1, D)
        rows[r] = new_row                                       # Gauss-Seidel carry
        fac_ref[:, r:r + 1, :] = new_row                        # in-place row store
    # TODO(synk): for R >= ~16 switch to a fori_loop + masked-b formulation; the static
    # O(R^2) unroll grows code size and live ranges quadratically.


def _mf_kernel(x_ref, u0_ref, v0_ref, out_ref, ut_ref, vt_ref, xt_ref, *,
               rank, num_iters, group):
    f32 = jnp.float32
    x = x_ref[...].astype(f32)                                  # (G, M, N) f32 compute copy

    # One explicit (M,N)->(N,M) transpose per batch element per GRID STEP (amortized over
    # num_iters) so both a-dots below are standard MXU contractions; x itself is never
    # relayouted inside the iteration loop.
    for g in range(group):
        xt_ref[g] = x[g].T                                      # (N, M)
    xt = xt_ref[...]                                            # (G, N, M)

    # Shared random init, broadcast across the G batch elements of this block.
    ut_ref[...] = jnp.broadcast_to(u0_ref[...], ut_ref.shape)   # (G, R, M)
    vt_ref[...] = jnp.broadcast_to(v0_ref[...], vt_ref.shape)   # (G, R, N)

    for _ in range(num_iters):                                  # static unroll (num_iters = 5)
        # ---- factor 0 (u):  a_u^T = (x @ v)^T = v^T @ x^T,  b = v^T v
        vt = vt_ref[...]
        a_u = jnp.einsum('grn,gnm->grm', vt, xt, preferred_element_type=f32)   # (G, R, M)
        b_v = jnp.einsum('grn,gsn->grs', vt, vt, preferred_element_type=f32)   # (G, R, R)
        _cd_update(ut_ref, a_u, b_v, rank)

        # ---- factor 1 (v):  update_v(x, u, v) == update_u(x^T, v, u)
        ut = ut_ref[...]
        a_v = jnp.einsum('grm,gmn->grn', ut, x, preferred_element_type=f32)    # (G, R, N)
        b_u = jnp.einsum('grm,gsm->grs', ut, ut, preferred_element_type=f32)   # (G, R, R)
        _cd_update(vt_ref, a_v, b_u, rank)

    # recon = u @ v^T per batch element: only a small (R,M)->(M,R) transpose feeds the MXU,
    # and the (M, Np) store is full-width (lane-dense, padded Np).
    # TODO(synk): cast MXU operands to bf16 (keeping preferred_element_type=f32) once profiling
    # shows the kernel is no longer HBM-bound; re-validate against the f32 reference first.
    for g in range(group):
        rec = jnp.dot(ut_ref[g].T, vt_ref[g], preferred_element_type=f32)      # (M, N)
        out_ref[g] = rec.astype(out_ref.dtype)


def _vmem_budget_bytes():
    cap = None
    try:
        cap = getattr(pltpu.get_tpu_info(), "vmem_capacity_bytes", None)
    except Exception:
        cap = None
    if not cap:
        cap = 64 << 20          # conservative fallback: v7x physical VMEM per TensorCore
    # Leave headroom for Mosaic internal scratch / DMA staging (never request the full physical
    # VMEM); on 128 MiB parts (v5e/v6e) this lets the limit grow well past 64 MiB.
    return int(min(cap - (12 << 20), cap * 0.82))


def _vmem_need_bytes(g, mp, np_, rank, in_bytes, out_bytes):
    blk = mp * np_
    need = g * blk * (2 * in_bytes + 2 * out_bytes + 4 + 4)     # dbl-buffered I/O + x, x^T f32
    need += 2 * blk * 4                                         # recon epilogue temporaries
    need += 4 * g * rank * (mp + np_) * 4                       # factor scratch + a/b temps
    need += 4 << 20                                             # slack for Mosaic internals
    return need


def matrix_factorization_forward(x, u0, v0, *, rank, num_iters=5, group_size=None,
                                 out_dtype=None):
    B, M, N = x.shape
    R = rank
    out_dtype = x.dtype if out_dtype is None else out_dtype     # dtype passthrough (no upcast)
    in_bytes = jnp.dtype(x.dtype).itemsize
    out_bytes = jnp.dtype(out_dtype).itemsize

    # Lane/sublane alignment so recon stores are full-width (no masked vst) and the in-kernel
    # transpose sees (8,128)-tiled operands. Zero padding is exact for CD: padded rows/cols only
    # ever pick up +EPS-scale values and are sliced off below.
    Mp, Np = _round_up(M, 8), _round_up(N, 128)

    budget = _vmem_budget_bytes()
    g = min(8, B) if group_size is None else max(1, min(group_size, B))
    while g > 1 and _vmem_need_bytes(g, Mp, Np, R, in_bytes, out_bytes) > budget:
        g -= 1
    Bp = _round_up(B, g)

    xp = x
    if (Bp, Mp, Np) != (B, M, N):
        xp = jnp.pad(x, ((0, Bp - B), (0, Mp - M), (0, Np - N)))
    u0t = jnp.asarray(u0, jnp.float32).T        # (R, M) rank-major (lane-dense rows)
    v0t = jnp.asarray(v0, jnp.float32).T        # (R, N)
    if Mp != M:
        u0t = jnp.pad(u0t, ((0, 0), (0, Mp - M)))
    if Np != N:
        v0t = jnp.pad(v0t, ((0, 0), (0, Np - N)))

    vmem_limit = int(min(budget,
                         max(_vmem_need_bytes(g, Mp, Np, R, in_bytes, out_bytes), 16 << 20)))

    cost = pl.CostEstimate(
        flops=int(Bp * (num_iters * 4 * R * Mp * Np + 2 * R * Mp * Np
                        + num_iters * 4 * R * R * (Mp + Np))),
        transcendentals=int(Bp * num_iters * 2 * R),
        bytes_accessed=int(Bp * Mp * Np * (in_bytes + out_bytes) + 4 * R * (Mp + Np)),
    )

    kernel = functools.partial(_mf_kernel, rank=R, num_iters=num_iters, group=g)
    # TODO(synk): for very large M*N (esp. v7x, 64 MiB VMEM/TC) stream N-tiles of the a-dots and
    # the recon writeback instead of full-matrix blocks.
    # TODO(synk): for B == 1 on v7x add a second 'parallel' grid axis over recon N-tiles so both
    # TensorCores stay busy.
    out = pl.pallas_call(
        kernel,
        out_shape=jax.ShapeDtypeStruct((Bp, Mp, Np), out_dtype),
        grid_spec=pltpu.PrefetchScalarGridSpec(
            num_scalar_prefetch=0,
            grid=(Bp // g,),
            in_specs=[
                pl.BlockSpec((g, Mp, Np), lambda b: (b, 0, 0)),
                pl.BlockSpec((R, Mp), lambda b: (0, 0)),
                pl.BlockSpec((R, Np), lambda b: (0, 0)),
            ],
            out_specs=pl.BlockSpec((g, Mp, Np), lambda b: (b, 0, 0)),
            scratch_shapes=[
                pltpu.VMEM((g, R, Mp), jnp.float32),    # u^T carry (rank-major)
                pltpu.VMEM((g, R, Np), jnp.float32),    # v^T carry (rank-major)
                pltpu.VMEM((g, Np, Mp), jnp.float32),   # x^T (one transpose per grid step)
            ],
        ),
        compiler_params=pltpu.CompilerParams(
            dimension_semantics=("parallel",),          # batch axis shards across TCs
            vmem_limit_bytes=vmem_limit,
        ),
        cost_estimate=cost,
    )(xp, u0t, v0t)

    if (Bp, Mp, Np) != (B, M, N):
        out = out[:B, :M, :N]
    return out


def _mf_reference(x, u0, v0, rank, num_iters=5):
    """Pure-JAX reference mirroring the PyTorch module (for validation)."""
    def cd(xm, u, v):
        a = xm @ v
        b = v.T @ v
        if rank > 1:
            u_new = u
            for r in range(rank):
                idx = [j for j in range(rank) if j != r]
                num = a[:, r:r + 1] - u_new[:, idx] @ b[idx, r:r + 1] + EPS
                den = b[r, r] + EPS
                u_new = u_new.at[:, r].set((num / den)[:, 0])
            return u_new
        return (a + EPS) / (b + EPS)

    outs = []
    for bidx in range(x.shape[0]):
        xm = x[bidx]
        u, v = u0, v0
        for _ in range(num_iters):
            u = cd(xm, u, v)
            v = cd(xm.T, v, u)
        outs.append(u @ v.T)
    return jnp.stack(outs)


if __name__ == "__main__":
    # Small deterministic example: (M, N) = (64, 128), rank 4, batch 2 (N already lane-dense).
    B, M, N, R = 2, 64, 128, 4
    key = jax.random.PRNGKey(0)
    kx, ku, kv = jax.random.split(key, 3)

    x = jax.random.normal(kx, (B, M, N), dtype=jnp.float32)
    # RandomInit('normal'): buffers u0 (M, R), v0 (N, R) ~ N(0, 1), shared across the batch.
    u0 = jax.random.normal(ku, (M, R), dtype=jnp.float32)
    v0 = jax.random.normal(kv, (N, R), dtype=jnp.float32)

    out = matrix_factorization_forward(x, u0, v0, rank=R, num_iters=5)
    out = jax.block_until_ready(out)

    ref = _mf_reference(x, u0, v0, rank=R, num_iters=5)
    assert out.shape == (B, M, N)
    err = float(jnp.max(jnp.abs(out - ref)))
    # 1e-2 tolerance: the kernel uses the EUP approximate reciprocal for CD denominators.
    assert jnp.allclose(out, ref, rtol=1e-2, atol=1e-2), f"mismatch vs reference (max err {err})"

    # bf16 HBM I/O path (review #1): x and the output stay bf16 at the pallas_call boundary.
    out_bf16 = matrix_factorization_forward(x.astype(jnp.bfloat16), u0, v0, rank=R, num_iters=5)
    out_bf16 = jax.block_until_ready(out_bf16)
    assert out_bf16.shape == (B, M, N) and out_bf16.dtype == jnp.bfloat16
    assert bool(jnp.all(jnp.isfinite(out_bf16.astype(jnp.float32))))

    print("KERNEL_OK")
</pallas_src>

<mosaic_0001>
module attributes {stable_mosaic.version = 11 : i64} {
  func.func @_mf_kernel(%arg0: i32, %arg1: memref<2x64x128xf32, #tpu.memory_space<vmem>>, %arg2: memref<4x64xf32, #tpu.memory_space<vmem>>, %arg3: memref<4x128xf32, #tpu.memory_space<vmem>>, %arg4: memref<2x64x128xf32, #tpu.memory_space<vmem>>, %arg5: memref<2x4x64xf32, #tpu.memory_space<vmem>>, %arg6: memref<2x4x128xf32, #tpu.memory_space<vmem>>, %arg7: memref<2x128x64xf32, #tpu.memory_space<vmem>>) attributes {dimension_semantics = [#tpu.dimension_semantics<parallel>], iteration_bounds = array<i64: 1>, scalar_prefetch = 0 : i64, scratch_operands = 3 : i64, tpu.core_type = #tpu.core_type<tc>, window_params = [{transform_indices = @transform_0, window_bounds = array<i64: 2, 64, 128>}, {pipeline_mode = #tpu.pipeline_mode<synchronous>, transform_indices = @transform_1, window_bounds = array<i64: 4, 64>}, {pipeline_mode = #tpu.pipeline_mode<synchronous>, transform_indices = @transform_2, window_bounds = array<i64: 4, 128>}, {transform_indices = @transform_3, window_bounds = array<i64: 2, 64, 128>}]} {
    %c0 = arith.constant 0 : index
    %c0_0 = arith.constant 0 : index
    %c0_1 = arith.constant 0 : index
    %0 = vector.load %arg1[%c0, %c0_0, %c0_1] : memref<2x64x128xf32, #tpu.memory_space<vmem>>, vector<2x64x128xf32>
    %1 = vector.extract_strided_slice %0 {offsets = [0, 0, 0], sizes = [1, 64, 128], strides = [1, 1, 1]} : vector<2x64x128xf32> to vector<1x64x128xf32>
    %2 = vector.shape_cast %1 : vector<1x64x128xf32> to vector<64x128xf32>
    %3 = tpu.transpose %2, [1, 0] : vector<64x128xf32> -> vector<128x64xf32>
    %c0_2 = arith.constant 0 : index
    %c0_3 = arith.constant 0 : index
    %c0_4 = arith.constant 0 : index
    %4 = vector.load %arg7[%c0_2, %c0_3, %c0_4] : memref<2x128x64xf32, #tpu.memory_space<vmem>>, vector<1x128x64xf32>
    %5 = vector.shape_cast %4 : vector<1x128x64xf32> to vector<128x64xf32>
    %6 = vector.shape_cast %3 : vector<128x64xf32> to vector<1x128x64xf32>
    tpu.vector_store %arg7[%c0_2, %c0_3, %c0_4], %6 {strides = array<i32>} : memref<2x128x64xf32, #tpu.memory_space<vmem>>, vector<1x128x64xf32>,
    %7 = vector.extract_strided_slice %0 {offsets = [1, 0, 0], sizes = [1, 64, 128], strides = [1, 1, 1]} : vector<2x64x128xf32> to vector<1x64x128xf32>
    %8 = vector.shape_cast %7 : vector<1x64x128xf32> to vector<64x128xf32>
    %9 = tpu.transpose %8, [1, 0] : vector<64x128xf32> -> vector<128x64xf32>
    %c1 = arith.constant 1 : index
    %c0_5 = arith.constant 0 : index
    %c0_6 = arith.constant 0 : index
    %10 = vector.load %arg7[%c1, %c0_5, %c0_6] : memref<2x128x64xf32, #tpu.memory_space<vmem>>, vector<1x128x64xf32>
    %11 = vector.shape_cast %10 : vector<1x128x64xf32> to vector<128x64xf32>
    %12 = vector.shape_cast %9 : vector<128x64xf32> to vector<1x128x64xf32>
    tpu.vector_store %arg7[%c1, %c0_5, %c0_6], %12 {strides = array<i32>} : memref<2x128x64xf32, #tpu.memory_space<vmem>>, vector<1x128x64xf32>,
    %c0_7 = arith.constant 0 : index
    %c0_8 = arith.constant 0 : index
    %c0_9 = arith.constant 0 : index
    %13 = vector.load %arg7[%c0_7, %c0_8, %c0_9] : memref<2x128x64xf32, #tpu.memory_space<vmem>>, vector<2x128x64xf32>
    %c0_10 = arith.constant 0 : index
    %c0_11 = arith.constant 0 : index
    %14 = vector.load %arg2[%c0_10, %c0_11] : memref<4x64xf32, #tpu.memory_space<vmem>>, vector<4x64xf32>
    %15 = vector.shape_cast %14 : vector<4x64xf32> to vector<1x4x64xf32>
    %16 = vector.broadcast %15 : vector<1x4x64xf32> to vector<2x4x64xf32>
    %c0_12 = arith.constant 0 : index
    %c0_13 = arith.constant 0 : index
    %c0_14 = arith.constant 0 : index
    %17 = vector.load %arg5[%c0_12, %c0_13, %c0_14] : memref<2x4x64xf32, #tpu.memory_space<vmem>>, vector<2x4x64xf32>
    tpu.vector_store %arg5[%c0_12, %c0_13, %c0_14], %16 {strides = array<i32>} : memref<2x4x64xf32, #tpu.memory_space<vmem>>, vector<2x4x64xf32>,
    %c0_15 = arith.constant 0 : index
    %c0_16 = arith.constant 0 : index
    %18 = vector.load %arg3[%c0_15, %c0_16] : memref<4x128xf32, #tpu.memory_space<vmem>>, vector<4x128xf32>
    %19 = vector.shape_cast %18 : vector<4x128xf32> to vector<1x4x128xf32>
    %20 = vector.broadcast %19 : vector<1x4x128xf32> to vector<2x4x128xf32>
    %c0_17 = arith.constant 0 : index
    %c0_18 = arith.constant 0 : index
    %c0_19 = arith.constant 0 : index
    %21 = vector.load %arg6[%c0_17, %c0_18, %c0_19] : memref<2x4x128xf32, #tpu.memory_space<vmem>>, vector<2x4x128xf32>
    tpu.vector_store %arg6[%c0_17, %c0_18, %c0_19], %20 {strides = array<i32>} : memref<2x4x128xf32, #tpu.memory_space<vmem>>, vector<2x4x128xf32>,
    %c0_20 = arith.constant 0 : index
    %c0_21 = arith.constant 0 : index
    %c0_22 = arith.constant 0 : index
    %22 = vector.load %arg6[%c0_20, %c0_21, %c0_22] : memref<2x4x128xf32, #tpu.memory_space<vmem>>, vector<2x4x128xf32>
    "tpu.trace_start"() <{level = 10 : i32, message = "grn,gnm->grm"}> : () -> ()
    %cst = arith.constant dense<0.000000e+00> : vector<2x4x64xf32>
    %23 = tpu.matmul %22, %13, %cst {dimension_numbers = #tpu.dot_dimension_numbers<[2], [1], [1], [2], [0, 0, 0, 1, 1, 2], [0], [0]>} : vector<2x4x128xf32>, vector<2x128x64xf32>, vector<2x4x64xf32> -> vector<2x4x64xf32>
    "tpu.trace_stop"() : () -> ()
    "tpu.trace_start"() <{level = 10 : i32, message = "grn,gsn->grs"}> : () -> ()
    %cst_23 = arith.constant dense<0.000000e+00> : vector<2x4x4xf32>
    %24 = tpu.matmul %22, %22, %cst_23 {dimension_numbers = #tpu.dot_dimension_numbers<[2], [2], [1], [1], [0, 0, 0, 1, 1, 1], [0], [0]>} : vector<2x4x128xf32>, vector<2x4x128xf32>, vector<2x4x4xf32> -> vector<2x4x4xf32>
    "tpu.trace_stop"() : () -> ()
    %c0_24 = arith.constant 0 : index
    %c0_25 = arith.constant 0 : index
    %c0_26 = arith.constant 0 : index
    %25 = vector.load %arg5[%c0_24, %c0_25, %c0_26] : memref<2x4x64xf32, #tpu.memory_space<vmem>>, vector<2x4x64xf32>
    %26 = vector.extract_strided_slice %25 {offsets = [0, 1, 0], sizes = [2, 1, 64], strides = [1, 1, 1]} : vector<2x4x64xf32> to vector<2x1x64xf32>
    %27 = vector.extract_strided_slice %25 {offsets = [0, 2, 0], sizes = [2, 1, 64], strides = [1, 1, 1]} : vector<2x4x64xf32> to vector<2x1x64xf32>
    %28 = vector.extract_strided_slice %25 {offsets = [0, 3, 0], sizes = [2, 1, 64], strides = [1, 1, 1]} : vector<2x4x64xf32> to vector<2x1x64xf32>
    %29 = vector.extract_strided_slice %24 {offsets = [0, 1, 0], sizes = [2, 1, 1], strides = [1, 1, 1]} : vector<2x4x4xf32> to vector<2x1x1xf32>
    %30 = vector.broadcast %29 : vector<2x1x1xf32> to vector<2x1x64xf32>
    %31 = arith.mulf %30, %26 : vector<2x1x64xf32>
    %32 = vector.extract_strided_slice %24 {offsets = [0, 2, 0], sizes = [2, 1, 1], strides = [1, 1, 1]} : vector<2x4x4xf32> to vector<2x1x1xf32>
    %33 = vector.broadcast %32 : vector<2x1x1xf32> to vector<2x1x64xf32>
    %34 = arith.mulf %33, %27 : vector<2x1x64xf32>
    %35 = arith.addf %31, %34 : vector<2x1x64xf32>
    %36 = vector.extract_strided_slice %24 {offsets = [0, 3, 0], sizes = [2, 1, 1], strides = [1, 1, 1]} : vector<2x4x4xf32> to vector<2x1x1xf32>
    %37 = vector.broadcast %36 : vector<2x1x1xf32> to vector<2x1x64xf32>
    %38 = arith.mulf %37, %28 : vector<2x1x64xf32>
    %39 = arith.addf %35, %38 : vector<2x1x64xf32>
    %40 = vector.extract_strided_slice %23 {offsets = [0, 0, 0], sizes = [2, 1, 64], strides = [1, 1, 1]} : vector<2x4x64xf32> to vector<2x1x64xf32>
    %41 = arith.subf %40, %39 : vector<2x1x64xf32>
    %cst_27 = arith.constant 1.000000e-16 : f32
    %42 = vector.broadcast %cst_27 : f32 to vector<2x1x64xf32>
    %43 = arith.addf %41, %42 : vector<2x1x64xf32>
    %44 = vector.extract_strided_slice %24 {offsets = [0, 0, 0], sizes = [2, 1, 1], strides = [1, 1, 1]} : vector<2x4x4xf32> to vector<2x1x1xf32>
    %cst_28 = arith.constant 1.000000e-16 : f32
    %45 = vector.broadcast %cst_28 : f32 to vector<2x1x1xf32>
    %46 = arith.addf %44, %45 : vector<2x1x1xf32>
    %47 = tpu.reciprocal %46 {approx = true} : vector<2x1x1xf32> -> vector<2x1x1xf32>
    %48 = vector.broadcast %47 : vector<2x1x1xf32> to vector<2x1x64xf32>
    %49 = arith.mulf %43, %48 : vector<2x1x64xf32>
    %c0_29 = arith.constant 0 : index
    %c0_30 = arith.constant 0 : index
    %c0_31 = arith.constant 0 : index
    %50 = vector.load %arg5[%c0_29, %c0_30, %c0_31] : memref<2x4x64xf32, #tpu.memory_space<vmem>>, vector<2x1x64xf32>
    tpu.vector_store %arg5[%c0_29, %c0_30, %c0_31], %49 {strides = array<i32>} : memref<2x4x64xf32, #tpu.memory_space<vmem>>, vector<2x1x64xf32>,
    %51 = vector.extract_strided_slice %24 {offsets = [0, 0, 1], sizes = [2, 1, 1], strides = [1, 1, 1]} : vector<2x4x4xf32> to vector<2x1x1xf32>
    %52 = vector.broadcast %51 : vector<2x1x1xf32> to vector<2x1x64xf32>
    %53 = arith.mulf %52, %49 : vector<2x1x64xf32>
    %54 = vector.extract_strided_slice %24 {offsets = [0, 2, 1], sizes = [2, 1, 1], strides = [1, 1, 1]} : vector<2x4x4xf32> to vector<2x1x1xf32>
    %55 = vector.broadcast %54 : vector<2x1x1xf32> to vector<2x1x64xf32>
    %56 = arith.mulf %55, %27 : vector<2x1x64xf32>
    %57 = arith.addf %53, %56 : vector<2x1x64xf32>
    %58 = vector.extract_strided_slice %24 {offsets = [0, 3, 1], sizes = [2, 1, 1], strides = [1, 1, 1]} : vector<2x4x4xf32> to vector<2x1x1xf32>
    %59 = vector.broadcast %58 : vector<2x1x1xf32> to vector<2x1x64xf32>
    %60 = arith.mulf %59, %28 : vector<2x1x64xf32>
    %61 = arith.addf %57, %60 : vector<2x1x64xf32>
    %62 = vector.extract_strided_slice %23 {offsets = [0, 1, 0], sizes = [2, 1, 64], strides = [1, 1, 1]} : vector<2x4x64xf32> to vector<2x1x64xf32>
    %63 = arith.subf %62, %61 : vector<2x1x64xf32>
    %cst_32 = arith.constant 1.000000e-16 : f32
    %64 = vector.broadcast %cst_32 : f32 to vector<2x1x64xf32>
    %65 = arith.addf %63, %64 : vector<2x1x64xf32>
    %66 = vector.extract_strided_slice %24 {offsets = [0, 1, 1], sizes = [2, 1, 1], strides = [1, 1, 1]} : vector<2x4x4xf32> to vector<2x1x1xf32>
    %cst_33 = arith.constant 1.000000e-16 : f32
    %67 = vector.broadcast %cst_33 : f32 to vector<2x1x1xf32>
    %68 = arith.addf %66, %67 : vector<2x1x1xf32>
    %69 = tpu.reciprocal %68 {approx = true} : vector<2x1x1xf32> -> vector<2x1x1xf32>
    %70 = vector.broadcast %69 : vector<2x1x1xf32> to vector<2x1x64xf32>
    %71 = arith.mulf %65, %70 : vector<2x1x64xf32>
    %c0_34 = arith.constant 0 : index
    %c1_35 = arith.constant 1 : index
    %c0_36 = arith.constant 0 : index
    %72 = vector.load %arg5[%c0_34, %c1_35, %c0_36] : memref<2x4x64xf32, #tpu.memory_space<vmem>>, vector<2x1x64xf32>
    tpu.vector_store %arg5[%c0_34, %c1_35, %c0_36], %71 {strides = array<i32>} : memref<2x4x64xf32, #tpu.memory_space<vmem>>, vector<2x1x64xf32>,
    %73 = vector.extract_strided_slice %24 {offsets = [0, 0, 2], sizes = [2, 1, 1], strides = [1, 1, 1]} : vector<2x4x4xf32> to vector<2x1x1xf32>
    %74 = vector.broadcast %73 : vector<2x1x1xf32> to vector<2x1x64xf32>
    %75 = arith.mulf %74, %49 : vector<2x1x64xf32>
    %76 = vector.extract_strided_slice %24 {offsets = [0, 1, 2], sizes = [2, 1, 1], strides = [1, 1, 1]} : vector<2x4x4xf32> to vector<2x1x1xf32>
    %77 = vector.broadcast %76 : vector<2x1x1xf32> to vector<2x1x64xf32>
    %78 = arith.mulf %77, %71 : vector<2x1x64xf32>
    %79 = arith.addf %75, %78 : vector<2x1x64xf32>
    %80 = vector.extract_strided_slice %24 {offsets = [0, 3, 2], sizes = [2, 1, 1], strides = [1, 1, 1]} : vector<2x4x4xf32> to vector<2x1x1xf32>
    %81 = vector.broadcast %80 : vector<2x1x1xf32> to vector<2x1x64xf32>
    %82 = arith.mulf %81, %28 : vector<2x1x64xf32>
    %83 = arith.addf %79, %82 : vector<2x1x64xf32>
    %84 = vector.extract_strided_slice %23 {offsets = [0, 2, 0], sizes = [2, 1, 64], strides = [1, 1, 1]} : vector<2x4x64xf32> to vector<2x1x64xf32>
    %85 = arith.subf %84, %83 : vector<2x1x64xf32>
    %cst_37 = arith.constant 1.000000e-16 : f32
    %86 = vector.broadcast %cst_37 : f32 to vector<2x1x64xf32>
    %87 = arith.addf %85, %86 : vector<2x1x64xf32>
    %88 = vector.extract_strided_slice %24 {offsets = [0, 2, 2], sizes = [2, 1, 1], strides = [1, 1, 1]} : vector<2x4x4xf32> to vector<2x1x1xf32>
    %cst_38 = arith.constant 1.000000e-16 : f32
    %89 = vector.broadcast %cst_38 : f32 to vector<2x1x1xf32>
    %90 = arith.addf %88, %89 : vector<2x1x1xf32>
    %91 = tpu.reciprocal %90 {approx = true} : vector<2x1x1xf32> -> vector<2x1x1xf32>
    %92 = vector.broadcast %91 : vector<2x1x1xf32> to vector<2x1x64xf32>
    %93 = arith.mulf %87, %92 : vector<2x1x64xf32>
    %c0_39 = arith.constant 0 : index
    %c2 = arith.constant 2 : index
    %c0_40 = arith.constant 0 : index
    %94 = vector.load %arg5[%c0_39, %c2, %c0_40] : memref<2x4x64xf32, #tpu.memory_space<vmem>>, vector<2x1x64xf32>
    tpu.vector_store %arg5[%c0_39, %c2, %c0_40], %93 {strides = array<i32>} : memref<2x4x64xf32, #tpu.memory_space<vmem>>, vector<2x1x64xf32>,
    %95 = vector.extract_strided_slice %24 {offsets = [0, 0, 3], sizes = [2, 1, 1], strides = [1, 1, 1]} : vector<2x4x4xf32> to vector<2x1x1xf32>
    %96 = vector.broadcast %95 : vector<2x1x1xf32> to vector<2x1x64xf32>
    %97 = arith.mulf %96, %49 : vector<2x1x64xf32>
    %98 = vector.extract_strided_slice %24 {offsets = [0, 1, 3], sizes = [2, 1, 1], strides = [1, 1, 1]} : vector<2x4x4xf32> to vector<2x1x1xf32>
    %99 = vector.broadcast %98 : vector<2x1x1xf32> to vector<2x1x64xf32>
    %100 = arith.mulf %99, %71 : vector<2x1x64xf32>
    %101 = arith.addf %97, %100 : vector<2x1x64xf32>
    %102 = vector.extract_strided_slice %24 {offsets = [0, 2, 3], sizes = [2, 1, 1], strides = [1, 1, 1]} : vector<2x4x4xf32> to vector<2x1x1xf32>
    %103 = vector.broadcast %102 : vector<2x1x1xf32> to vector<2x1x64xf32>
    %104 = arith.mulf %103, %93 : vector<2x1x64xf32>
    %105 = arith.addf %101, %104 : vector<2x1x64xf32>
    %106 = vector.extract_strided_slice %23 {offsets = [0, 3, 0], sizes = [2, 1, 64], strides = [1, 1, 1]} : vector<2x4x64xf32> to vector<2x1x64xf32>
    %107 = arith.subf %106, %105 : vector<2x1x64xf32>
    %cst_41 = arith.constant 1.000000e-16 : f32
    %108 = vector.broadcast %cst_41 : f32 to vector<2x1x64xf32>
    %109 = arith.addf %107, %108 : vector<2x1x64xf32>
    %110 = vector.extract_strided_slice %24 {offsets = [0, 3, 3], sizes = [2, 1, 1], strides = [1, 1, 1]} : vector<2x4x4xf32> to vector<2x1x1xf32>
    %cst_42 = arith.constant 1.000000e-16 : f32
    %111 = vector.broadcast %cst_42 : f32 to vector<2x1x1xf32>
    %112 = arith.addf %110, %111 : vector<2x1x1xf32>
    %113 = tpu.reciprocal %112 {approx = true} : vector<2x1x1xf32> -> vector<2x1x1xf32>
    %114 = vector.broadcast %113 : vector<2x1x1xf32> to vector<2x1x64xf32>
    %115 = arith.mulf %109, %114 : vector<2x1x64xf32>
    %c0_43 = arith.constant 0 : index
    %c3 = arith.constant 3 : index
    %c0_44 = arith.constant 0 : index
    %116 = vector.load %arg5[%c0_43, %c3, %c0_44] : memref<2x4x64xf32, #tpu.memory_space<vmem>>, vector<2x1x64xf32>
    tpu.vector_store %arg5[%c0_43, %c3, %c0_44], %115 {strides = array<i32>} : memref<2x4x64xf32, #tpu.memory_space<vmem>>, vector<2x1x64xf32>,
    %c0_45 = arith.constant 0 : index
    %c0_46 = arith.constant 0 : index
    %c0_47 = arith.constant 0 : index
    %117 = vector.load %arg5[%c0_45, %c0_46, %c0_47] : memref<2x4x64xf32, #tpu.memory_space<vmem>>, vector<2x4x64xf32>
    "tpu.trace_start"() <{level = 10 : i32, message = "grm,gmn->grn"}> : () -> ()
    %cst_48 = arith.constant dense<0.000000e+00> : vector<2x4x128xf32>
    %118 = tpu.matmul %117, %0, %cst_48 {dimension_numbers = #tpu.dot_dimension_numbers<[2], [1], [1], [2], [0, 0, 0, 1, 1, 2], [0], [0]>} : vector<2x4x64xf32>, vector<2x64x128xf32>, vector<2x4x128xf32> -> vector<2x4x128xf32>
    "tpu.trace_stop"() : () -> ()
    "tpu.trace_start"() <{level = 10 : i32, message = "grm,gsm->grs"}> : () -> ()
    %cst_49 = arith.constant dense<0.000000e+00> : vector<2x4x4xf32>
    %119 = tpu.matmul %117, %117, %cst_49 {dimension_numbers = #tpu.dot_dimension_numbers<[2], [2], [1], [1], [0, 0, 0, 1, 1, 1], [0], [0]>} : vector<2x4x64xf32>, vector<2x4x64xf32>, vector<2x4x4xf32> -> vector<2x4x4xf32>
    "tpu.trace_stop"() : () -> ()
    %c0_50 = arith.constant 0 : index
    %c0_51 = arith.constant 0 : index
    %c0_52 = arith.constant 0 : index
    %120 = vector.load %arg6[%c0_50, %c0_51, %c0_52] : memref<2x4x128xf32, #tpu.memory_space<vmem>>, vector<2x4x128xf32>
    %121 = vector.extract_strided_slice %120 {offsets = [0, 1, 0], sizes = [2, 1, 128], strides = [1, 1, 1]} : vector<2x4x128xf32> to vector<2x1x128xf32>
    %122 = vector.extract_strided_slice %120 {offsets = [0, 2, 0], sizes = [2, 1, 128], strides = [1, 1, 1]} : vector<2x4x128xf32> to vector<2x1x128xf32>
    %123 = vector.extract_strided_slice %120 {offsets = [0, 3, 0], sizes = [2, 1, 128], strides = [1, 1, 1]} : vector<2x4x128xf32> to vector<2x1x128xf32>
    %124 = vector.extract_strided_slice %119 {offsets = [0, 1, 0], sizes = [2, 1, 1], strides = [1, 1, 1]} : vector<2x4x4xf32> to vector<2x1x1xf32>
    %125 = vector.broadcast %124 : vector<2x1x1xf32> to vector<2x1x128xf32>
    %126 = arith.mulf %125, %121 : vector<2x1x128xf32>
    %127 = vector.extract_strided_slice %119 {offsets = [0, 2, 0], sizes = [2, 1, 1], strides = [1, 1, 1]} : vector<2x4x4xf32> to vector<2x1x1xf32>
    %128 = vector.broadcast %127 : vector<2x1x1xf32> to vector<2x1x128xf32>
    %129 = arith.mulf %128, %122 : vector<2x1x128xf32>
    %130 = arith.addf %126, %129 : vector<2x1x128xf32>
    %131 = vector.extract_strided_slice %119 {offsets = [0, 3, 0], sizes = [2, 1, 1], strides = [1, 1, 1]} : vector<2x4x4xf32> to vector<2x1x1xf32>
    %132 = vector.broadcast %131 : vector<2x1x1xf32> to vector<2x1x128xf32>
    %133 = arith.mulf %132, %123 : vector<2x1x128xf32>
    %134 = arith.addf %130, %133 : vector<2x1x128xf32>
    %135 = vector.extract_strided_slice %118 {offsets = [0, 0, 0], sizes = [2, 1, 128], strides = [1, 1, 1]} : vector<2x4x128xf32> to vector<2x1x128xf32>
    %136 = arith.subf %135, %134 : vector<2x1x128xf32>
    %cst_53 = arith.constant 1.000000e-16 : f32
    %137 = vector.broadcast %cst_53 : f32 to vector<2x1x128xf32>
    %138 = arith.addf %136, %137 : vector<2x1x128xf32>
    %139 = vector.extract_strided_slice %119 {offsets = [0, 0, 0], sizes = [2, 1, 1], strides = [1, 1, 1]} : vector<2x4x4xf32> to vector<2x1x1xf32>
    %cst_54 = arith.constant 1.000000e-16 : f32
    %140 = vector.broadcast %cst_54 : f32 to vector<2x1x1xf32>
    %141 = arith.addf %139, %140 : vector<2x1x1xf32>
    %142 = tpu.reciprocal %141 {approx = true} : vector<2x1x1xf32> -> vector<2x1x1xf32>
    %143 = vector.broadcast %142 : vector<2x1x1xf32> to vector<2x1x128xf32>
    %144 = arith.mulf %138, %143 : vector<2x1x128xf32>
    %c0_55 = arith.constant 0 : index
    %c0_56 = arith.constant 0 : index
    %c0_57 = arith.constant 0 : index
    %145 = vector.load %arg6[%c0_55, %c0_56, %c0_57] : memref<2x4x128xf32, #tpu.memory_space<vmem>>, vector<2x1x128xf32>
    tpu.vector_store %arg6[%c0_55, %c0_56, %c0_57], %144 {strides = array<i32>} : memref<2x4x128xf32, #tpu.memory_space<vmem>>, vector<2x1x128xf32>,
    %146 = vector.extract_strided_slice %119 {offsets = [0, 0, 1], sizes = [2, 1, 1], strides = [1, 1, 1]} : vector<2x4x4xf32> to vector<2x1x1xf32>
    %147 = vector.broadcast %146 : vector<2x1x1xf32> to vector<2x1x128xf32>
    %148 = arith.mulf %147, %144 : vector<2x1x128xf32>
    %149 = vector.extract_strided_slice %119 {offsets = [0, 2, 1], sizes = [2, 1, 1], strides = [1, 1, 1]} : vector<2x4x4xf32> to vector<2x1x1xf32>
    %150 = vector.broadcast %149 : vector<2x1x1xf32> to vector<2x1x128xf32>
    %151 = arith.mulf %150, %122 : vector<2x1x128xf32>
    %152 = arith.addf %148, %151 : vector<2x1x128xf32>
    %153 = vector.extract_strided_slice %119 {offsets = [0, 3, 1], sizes = [2, 1, 1], strides = [1, 1, 1]} : vector<2x4x4xf32> to vector<2x1x1xf32>
    %154 = vector.broadcast %153 : vector<2x1x1xf32> to vector<2x1x128xf32>
    %155 = arith.mulf %154, %123 : vector<2x1x128xf32>
    %156 = arith.addf %152, %155 : vector<2x1x128xf32>
    %157 = vector.extract_strided_slice %118 {offsets = [0, 1, 0], sizes = [2, 1, 128], strides = [1, 1, 1]} : vector<2x4x128xf32> to vector<2x1x128xf32>
    %158 = arith.subf %157, %156 : vector<2x1x128xf32>
    %cst_58 = arith.constant 1.000000e-16 : f32
    %159 = vector.broadcast %cst_58 : f32 to vector<2x1x128xf32>
    %160 = arith.addf %158, %159 : vector<2x1x128xf32>
    %161 = vector.extract_strided_slice %119 {offsets = [0, 1, 1], sizes = [2, 1, 1], strides = [1, 1, 1]} : vector<2x4x4xf32> to vector<2x1x1xf32>
    %cst_59 = arith.constant 1.000000e-16 : f32
    %162 = vector.broadcast %cst_59 : f32 to vector<2x1x1xf32>
    %163 = arith.addf %161, %162 : vector<2x1x1xf32>
    %164 = tpu.reciprocal %163 {approx = true} : vector<2x1x1xf32> -> vector<2x1x1xf32>
    %165 = vector.broadcast %164 : vector<2x1x1xf32> to vector<2x1x128xf32>
    %166 = arith.mulf %160, %165 : vector<2x1x128xf32>
    %c0_60 = arith.constant 0 : index
    %c1_61 = arith.constant 1 : index
    %c0_62 = arith.constant 0 : index
    %167 = vector.load %arg6[%c0_60, %c1_61, %c0_62] : memref<2x4x128xf32, #tpu.memory_space<vmem>>, vector<2x1x128xf32>
    tpu.vector_store %arg6[%c0_60, %c1_61, %c0_62], %166 {strides = array<i32>} : memref<2x4x128xf32, #tpu.memory_space<vmem>>, vector<2x1x128xf32>,
    %168 = vector.extract_strided_slice %119 {offsets = [0, 0, 2], sizes = [2, 1, 1], strides = [1, 1, 1]} : vector<2x4x4xf32> to vector<2x1x1xf32>
    %169 = vector.broadcast %168 : vector<2x1x1xf32> to vector<2x1x128xf32>
    %170 = arith.mulf %169, %144 : vector<2x1x128xf32>
    %171 = vector.extract_strided_slice %119 {offsets = [0, 1, 2], sizes = [2, 1, 1], strides = [1, 1, 1]} : vector<2x4x4xf32> to vector<2x1x1xf32>
    %172 = vector.broadcast %171 : vector<2x1x1xf32> to vector<2x1x128xf32>
    %173 = arith.mulf %172, %166 : vector<2x1x128xf32>
    %174 = arith.addf %170, %173 : vector<2x1x128xf32>
    %175 = vector.extract_strided_slice %119 {offsets = [0, 3, 2], sizes = [2, 1, 1], strides = [1, 1, 1]} : vector<2x4x4xf32> to vector<2x1x1xf32>
    %176 = vector.broadcast %175 : vector<2x1x1xf32> to vector<2x1x128xf32>
    %177 = arith.mulf %176, %123 : vector<2x1x128xf32>
    %178 = arith.addf %174, %177 : vector<2x1x128xf32>
    %179 = vector.extract_strided_slice %118 {offsets = [0, 2, 0], sizes = [2, 1, 128], strides = [1, 1, 1]} : vector<2x4x128xf32> to vector<2x1x128xf32>
    %180 = arith.subf %179, %178 : vector<2x1x128xf32>
    %cst_63 = arith.constant 1.000000e-16 : f32
    %181 = vector.broadcast %cst_63 : f32 to vector<2x1x128xf32>
    %182 = arith.addf %180, %181 : vector<2x1x128xf32>
    %183 = vector.extract_strided_slice %119 {offsets = [0, 2, 2], sizes = [2, 1, 1], strides = [1, 1, 1]} : vector<2x4x4xf32> to vector<2x1x1xf32>
    %cst_64 = arith.constant 1.000000e-16 : f32
    %184 = vector.broadcast %cst_64 : f32 to vector<2x1x1xf32>
    %185 = arith.addf %183, %184 : vector<2x1x1xf32>
    %186 = tpu.reciprocal %185 {approx = true} : vector<2x1x1xf32> -> vector<2x1x1xf32>
    %187 = vector.broadcast %186 : vector<2x1x1xf32> to vector<2x1x128xf32>
    %188 = arith.mulf %182, %187 : vector<2x1x128xf32>
    %c0_65 = arith.constant 0 : index
    %c2_66 = arith.constant 2 : index
    %c0_67 = arith.constant 0 : index
    %189 = vector.load %arg6[%c0_65, %c2_66, %c0_67] : memref<2x4x128xf32, #tpu.memory_space<vmem>>, vector<2x1x128xf32>
    tpu.vector_store %arg6[%c0_65, %c2_66, %c0_67], %188 {strides = array<i32>} : memref<2x4x128xf32, #tpu.memory_space<vmem>>, vector<2x1x128xf32>,
    %190 = vector.extract_strided_slice %119 {offsets = [0, 0, 3], sizes = [2, 1, 1], strides = [1, 1, 1]} : vector<2x4x4xf32> to vector<2x1x1xf32>
    %191 = vector.broadcast %190 : vector<2x1x1xf32> to vector<2x1x128xf32>
    %192 = arith.mulf %191, %144 : vector<2x1x128xf32>
    %193 = vector.extract_strided_slice %119 {offsets = [0, 1, 3], sizes = [2, 1, 1], strides = [1, 1, 1]} : vector<2x4x4xf32> to vector<2x1x1xf32>
    %194 = vector.broadcast %193 : vector<2x1x1xf32> to vector<2x1x128xf32>
    %195 = arith.mulf %194, %166 : vector<2x1x128xf32>
    %196 = arith.addf %192, %195 : vector<2x1x128xf32>
    %197 = vector.extract_strided_slice %119 {offsets = [0, 2, 3], sizes = [2, 1, 1], strides = [1, 1, 1]} : vector<2x4x4xf32> to vector<2x1x1xf32>
    %198 = vector.broadcast %197 : vector<2x1x1xf32> to vector<2x1x128xf32>
    %199 = arith.mulf %198, %188 : vector<2x1x128xf32>
    %200 = arith.addf %196, %199 : vector<2x1x128xf32>
    %201 = vector.extract_strided_slice %118 {offsets = [0, 3, 0], sizes = [2, 1, 128], strides = [1, 1, 1]} : vector<2x4x128xf32> to vector<2x1x128xf32>
    %202 = arith.subf %201, %200 : vector<2x1x128xf32>
    %cst_68 = arith.constant 1.000000e-16 : f32
    %203 = vector.broadcast %cst_68 : f32 to vector<2x1x128xf32>
    %204 = arith.addf %202, %203 : vector<2x1x128xf32>
    %205 = vector.extract_strided_slice %119 {offsets = [0, 3, 3], sizes = [2, 1, 1], strides = [1, 1, 1]} : vector<2x4x4xf32> to vector<2x1x1xf32>
    %cst_69 = arith.constant 1.000000e-16 : f32
    %206 = vector.broadcast %cst_69 : f32 to vector<2x1x1xf32>
    %207 = arith.addf %205, %206 : vector<2x1x1xf32>
    %208 = tpu.reciprocal %207 {approx = true} : vector<2x1x1xf32> -> vector<2x1x1xf32>
    %209 = vector.broadcast %208 : vector<2x1x1xf32> to vector<2x1x128xf32>
    %210 = arith.mulf %204, %209 : vector<2x1x128xf32>
    %c0_70 = arith.constant 0 : index
    %c3_71 = arith.constant 3 : index
    %c0_72 = arith.constant 0 : index
    %211 = vector.load %arg6[%c0_70, %c3_71, %c0_72] : memref<2x4x128xf32, #tpu.memory_space<vmem>>, vector<2x1x128xf32>
    tpu.vector_store %arg6[%c0_70, %c3_71, %c0_72], %210 {strides = array<i32>} : memref<2x4x128xf32, #tpu.memory_space<vmem>>, vector<2x1x128xf32>,
    %c0_73 = arith.constant 0 : index
    %c0_74 = arith.constant 0 : index
    %c0_75 = arith.constant 0 : index
    %212 = vector.load %arg6[%c0_73, %c0_74, %c0_75] : memref<2x4x128xf32, #tpu.memory_space<vmem>>, vector<2x4x128xf32>
    "tpu.trace_start"() <{level = 10 : i32, message = "grn,gnm->grm"}> : () -> ()
    %cst_76 = arith.constant dense<0.000000e+00> : vector<2x4x64xf32>
    %213 = tpu.matmul %212, %13, %cst_76 {dimension_numbers = #tpu.dot_dimension_numbers<[2], [1], [1], [2], [0, 0, 0, 1, 1, 2], [0], [0]>} : vector<2x4x128xf32>, vector<2x128x64xf32>, vector<2x4x64xf32> -> vector<2x4x64xf32>
    "tpu.trace_stop"() : () -> ()
    "tpu.trace_start"() <{level = 10 : i32, message = "grn,gsn->grs"}> : () -> ()
    %cst_77 = arith.constant dense<0.000000e+00> : vector<2x4x4xf32>
    %214 = tpu.matmul %212, %212, %cst_77 {dimension_numbers = #tpu.dot_dimension_numbers<[2], [2], [1], [1], [0, 0, 0, 1, 1, 1], [0], [0]>} : vector<2x4x128xf32>, vector<2x4x128xf32>, vector<2x4x4xf32> -> vector<2x4x4xf32>
    "tpu.trace_stop"() : () -> ()
    %c0_78 = arith.constant 0 : index
    %c0_79 = arith.constant 0 : index
    %c0_80 = arith.constant 0 : index
    %215 = vector.load %arg5[%c0_78, %c0_79, %c0_80] : memref<2x4x64xf32, #tpu.memory_space<vmem>>, vector<2x4x64xf32>
    %216 = vector.extract_strided_slice %215 {offsets = [0, 1, 0], sizes = [2, 1, 64], strides = [1, 1, 1]} : vector<2x4x64xf32> to vector<2x1x64xf32>
    %217 = vector.extract_strided_slice %215 {offsets = [0, 2, 0], sizes = [2, 1, 64], strides = [1, 1, 1]} : vector<2x4x64xf32> to vector<2x1x64xf32>
    %218 = vector.extract_strided_slice %215 {offsets = [0, 3, 0], sizes = [2, 1, 64], strides = [1, 1, 1]} : vector<2x4x64xf32> to vector<2x1x64xf32>
    %219 = vector.extract_strided_slice %214 {offsets = [0, 1, 0], sizes = [2, 1, 1], strides = [1, 1, 1]} : vector<2x4x4xf32> to vector<2x1x1xf32>
    %220 = vector.broadcast %219 : vector<2x1x1xf32> to vector<2x1x64xf32>
    %221 = arith.mulf %220, %216 : vector<2x1x64xf32>
    %222 = vector.extract_strided_slice %214 {offsets = [0, 2, 0], sizes = [2, 1, 1], strides = [1, 1, 1]} : vector<2x4x4xf32> to vector<2x1x1xf32>
    %223 = vector.broadcast %222 : vector<2x1x1xf32> to vector<2x1x64xf32>
    %224 = arith.mulf %223, %217 : vector<2x1x64xf32>
    %225 = arith.addf %221, %224 : vector<2x1x64xf32>
    %226 = vector.extract_strided_slice %214 {offsets = [0, 3, 0], sizes = [2, 1, 1], strides = [1, 1, 1]} : vector<2x4x4xf32> to vector<2x1x1xf32>
    %227 = vector.broadcast %226 : vector<2x1x1xf32> to vector<2x1x64xf32>
    %228 = arith.mulf %227, %218 : vector<2x1x64xf32>
    %229 = arith.addf %225, %228 : vector<2x1x64xf32>
    %230 = vector.extract_strided_slice %213 {offsets = [0, 0, 0], sizes = [2, 1, 64], strides = [1, 1, 1]} : vector<2x4x64xf32> to vector<2x1x64xf32>
    %231 = arith.subf %230, %229 : vector<2x1x64xf32>
    %cst_81 = arith.constant 1.000000e-16 : f32
    %232 = vector.broadcast %cst_81 : f32 to vector<2x1x64xf32>
    %233 = arith.addf %231, %232 : vector<2x1x64xf32>
    %234 = vector.extract_strided_slice %214 {offsets = [0, 0, 0], sizes = [2, 1, 1], strides = [1, 1, 1]} : vector<2x4x4xf32> to vector<2x1x1xf32>
    %cst_82 = arith.constant 1.000000e-16 : f32
    %235 = vector.broadcast %cst_82 : f32 to vector<2x1x1xf32>
    %236 = arith.addf %234, %235 : vector<2x1x1xf32>
    %237 = tpu.reciprocal %236 {approx = true} : vector<2x1x1xf32> -> vector<2x1x1xf32>
    %238 = vector.broadcast %237 : vector<2x1x1xf32> to vector<2x1x64xf32>
    %239 = arith.mulf %233, %238 : vector<2x1x64xf32>
    %c0_83 = arith.constant 0 : index
    %c0_84 = arith.constant 0 : index
    %c0_85 = arith.constant 0 : index
    %240 = vector.load %arg5[%c0_83, %c0_84, %c0_85] : memref<2x4x64xf32, #tpu.memory_space<vmem>>, vector<2x1x64xf32>
    tpu.vector_store %arg5[%c0_83, %c0_84, %c0_85], %239 {strides = array<i32>} : memref<2x4x64xf32, #tpu.memory_space<vmem>>, vector<2x1x64xf32>,
    %241 = vector.extract_strided_slice %214 {offsets = [0, 0, 1], sizes = [2, 1, 1], strides = [1, 1, 1]} : vector<2x4x4xf32> to vector<2x1x1xf32>
    %242 = vector.broadcast %241 : vector<2x1x1xf32> to vector<2x1x64xf32>
    %243 = arith.mulf %242, %239 : vector<2x1x64xf32>
    %244 = vector.extract_strided_slice %214 {offsets = [0, 2, 1], sizes = [2, 1, 1], strides = [1, 1, 1]} : vector<2x4x4xf32> to vector<2x1x1xf32>
    %245 = vector.broadcast %244 : vector<2x1x1xf32> to vector<2x1x64xf32>
    %246 = arith.mulf %245, %217 : vector<2x1x64xf32>
    %247 = arith.addf %243, %246 : vector<2x1x64xf32>
    %248 = vector.extract_strided_slice %214 {offsets = [0, 3, 1], sizes = [2, 1, 1], strides = [1, 1, 1]} : vector<2x4x4xf32> to vector<2x1x1xf32>
    %249 = vector.broadcast %248 : vector<2x1x1xf32> to vector<2x1x64xf32>
    %250 = arith.mulf %249, %218 : vector<2x1x64xf32>
    %251 = arith.addf %247, %250 : vector<2x1x64xf32>
    %252 = vector.extract_strided_slice %213 {offsets = [0, 1, 0], sizes = [2, 1, 64], strides = [1, 1, 1]} : vector<2x4x64xf32> to vector<2x1x64xf32>
    %253 = arith.subf %252, %251 : vector<2x1x64xf32>
    %cst_86 = arith.constant 1.000000e-16 : f32
    %254 = vector.broadcast %cst_86 : f32 to vector<2x1x64xf32>
    %255 = arith.addf %253, %254 : vector<2x1x64xf32>
    %256 = vector.extract_strided_slice %214 {offsets = [0, 1, 1], sizes = [2, 1, 1], strides = [1, 1, 1]} : vector<2x4x4xf32> to vector<2x1x1xf32>
    %cst_87 = arith.constant 1.000000e-16 : f32
    %257 = vector.broadcast %cst_87 : f32 to vector<2x1x1xf32>
    %258 = arith.addf %256, %257 : vector<2x1x1xf32>
    %259 = tpu.reciprocal %258 {approx = true} : vector<2x1x1xf32> -> vector<2x1x1xf32>
    %260 = vector.broadcast %259 : vector<2x1x1xf32> to vector<2x1x64xf32>
    %261 = arith.mulf %255, %260 : vector<2x1x64xf32>
    %c0_88 = arith.constant 0 : index
    %c1_89 = arith.constant 1 : index
    %c0_90 = arith.constant 0 : index
    %262 = vector.load %arg5[%c0_88, %c1_89, %c0_90] : memref<2x4x64xf32, #tpu.memory_space<vmem>>, vector<2x1x64xf32>
    tpu.vector_store %arg5[%c0_88, %c1_89, %c0_90], %261 {strides = array<i32>} : memref<2x4x64xf32, #tpu.memory_space<vmem>>, vector<2x1x64xf32>,
    %263 = vector.extract_strided_slice %214 {offsets = [0, 0, 2], sizes = [2, 1, 1], strides = [1, 1, 1]} : vector<2x4x4xf32> to vector<2x1x1xf32>
    %264 = vector.broadcast %263 : vector<2x1x1xf32> to vector<2x1x64xf32>
    %265 = arith.mulf %264, %239 : vector<2x1x64xf32>
    %266 = vector.extract_strided_slice %214 {offsets = [0, 1, 2], sizes = [2, 1, 1], strides = [1, 1, 1]} : vector<2x4x4xf32> to vector<2x1x1xf32>
    %267 = vector.broadcast %266 : vector<2x1x1xf32> to vector<2x1x64xf32>
    %268 = arith.mulf %267, %261 : vector<2x1x64xf32>
    %269 = arith.addf %265, %268 : vector<2x1x64xf32>
    %270 = vector.extract_strided_slice %214 {offsets = [0, 3, 2], sizes = [2, 1, 1], strides = [1, 1, 1]} : vector<2x4x4xf32> to vector<2x1x1xf32>
    %271 = vector.broadcast %270 : vector<2x1x1xf32> to vector<2x1x64xf32>
    %272 = arith.mulf %271, %218 : vector<2x1x64xf32>
    %273 = arith.addf %269, %272 : vector<2x1x64xf32>
    %274 = vector.extract_strided_slice %213 {offsets = [0, 2, 0], sizes = [2, 1, 64], strides = [1, 1, 1]} : vector<2x4x64xf32> to vector<2x1x64xf32>
    %275 = arith.subf %274, %273 : vector<2x1x64xf32>
    %cst_91 = arith.constant 1.000000e-16 : f32
    %276 = vector.broadcast %cst_91 : f32 to vector<2x1x64xf32>
    %277 = arith.addf %275, %276 : vector<2x1x64xf32>
    %278 = vector.extract_strided_slice %214 {offsets = [0, 2, 2], sizes = [2, 1, 1], strides = [1, 1, 1]} : vector<2x4x4xf32> to vector<2x1x1xf32>
    %cst_92 = arith.constant 1.000000e-16 : f32
    %279 = vector.broadcast %cst_92 : f32 to vector<2x1x1xf32>
    %280 = arith.addf %278, %279 : vector<2x1x1xf32>
    %281 = tpu.reciprocal %280 {approx = true} : vector<2x1x1xf32> -> vector<2x1x1xf32>
    %282 = vector.broadcast %281 : vector<2x1x1xf32> to vector<2x1x64xf32>
    %283 = arith.mulf %277, %282 : vector<2x1x64xf32>
    %c0_93 = arith.constant 0 : index
    %c2_94 = arith.constant 2 : index
    %c0_95 = arith.constant 0 : index
    %284 = vector.load %arg5[%c0_93, %c2_94, %c0_95] : memref<2x4x64xf32, #tpu.memory_space<vmem>>, vector<2x1x64xf32>
    tpu.vector_store %arg5[%c0_93, %c2_94, %c0_95], %283 {strides = array<i32>} : memref<2x4x64xf32, #tpu.memory_space<vmem>>, vector<2x1x64xf32>,
    %285 = vector.extract_strided_slice %214 {offsets = [0, 0, 3], sizes = [2, 1, 1], strides = [1, 1, 1]} : vector<2x4x4xf32> to vector<2x1x1xf32>
    %286 = vector.broadcast %285 : vector<2x1x1xf32> to vector<2x1x64xf32>
    %287 = arith.mulf %286, %239 : vector<2x1x64xf32>
    %288 = vector.extract_strided_slice %214 {offsets = [0, 1, 3], sizes = [2, 1, 1], strides = [1, 1, 1]} : vector<2x4x4xf32> to vector<2x1x1xf32>
    %289 = vector.broadcast %288 : vector<2x1x1xf32> to vector<2x1x64xf32>
    %290 = arith.mulf %289, %261 : vector<2x1x64xf32>
    %291 = arith.addf %287, %290 : vector<2x1x64xf32>
    %292 = vector.extract_strided_slice %214 {offsets = [0, 2, 3], sizes = [2, 1, 1], strides = [1, 1, 1]} : vector<2x4x4xf32> to vector<2x1x1xf32>
    %293 = vector.broadcast %292 : vector<2x1x1xf32> to vector<2x1x64xf32>
    %294 = arith.mulf %293, %283 : vector<2x1x64xf32>
    %295 = arith.addf %291, %294 : vector<2x1x64xf32>
    %296 = vector.extract_strided_slice %213 {offsets = [0, 3, 0], sizes = [2, 1, 64], strides = [1, 1, 1]} : vector<2x4x64xf32> to vector<2x1x64xf32>
    %297 = arith.subf %296, %295 : vector<2x1x64xf32>
    %cst_96 = arith.constant 1.000000e-16 : f32
    %298 = vector.broadcast %cst_96 : f32 to vector<2x1x64xf32>
    %299 = arith.addf %297, %298 : vector<2x1x64xf32>
    %300 = vector.extract_strided_slice %214 {offsets = [0, 3, 3], sizes = [2, 1, 1], strides = [1, 1, 1]} : vector<2x4x4xf32> to vector<2x1x1xf32>
    %cst_97 = arith.constant 1.000000e-16 : f32
    %301 = vector.broadcast %cst_97 : f32 to vector<2x1x1xf32>
    %302 = arith.addf %300, %301 : vector<2x1x1xf32>
    %303 = tpu.reciprocal %302 {approx = true} : vector<2x1x1xf32> -> vector<2x1x1xf32>
    %304 = vector.broadcast %303 : vector<2x1x1xf32> to vector<2x1x64xf32>
    %305 = arith.mulf %299, %304 : vector<2x1x64xf32>
    %c0_98 = arith.constant 0 : index
    %c3_99 = arith.constant 3 : index
    %c0_100 = arith.constant 0 : index
    %306 = vector.load %arg5[%c0_98, %c3_99, %c0_100] : memref<2x4x64xf32, #tpu.memory_space<vmem>>, vector<2x1x64xf32>
    tpu.vector_store %arg5[%c0_98, %c3_99, %c0_100], %305 {strides = array<i32>} : memref<2x4x64xf32, #tpu.memory_space<vmem>>, vector<2x1x64xf32>,
    %c0_101 = arith.constant 0 : index
    %c0_102 = arith.constant 0 : index
    %c0_103 = arith.constant 0 : index
    %307 = vector.load %arg5[%c0_101, %c0_102, %c0_103] : memref<2x4x64xf32, #tpu.memory_space<vmem>>, vector<2x4x64xf32>
    "tpu.trace_start"() <{level = 10 : i32, message = "grm,gmn->grn"}> : () -> ()
    %cst_104 = arith.constant dense<0.000000e+00> : vector<2x4x128xf32>
    %308 = tpu.matmul %307, %0, %cst_104 {dimension_numbers = #tpu.dot_dimension_numbers<[2], [1], [1], [2], [0, 0, 0, 1, 1, 2], [0], [0]>} : vector<2x4x64xf32>, vector<2x64x128xf32>, vector<2x4x128xf32> -> vector<2x4x128xf32>
    "tpu.trace_stop"() : () -> ()
    "tpu.trace_start"() <{level = 10 : i32, message = "grm,gsm->grs"}> : () -> ()
    %cst_105 = arith.constant dense<0.000000e+00> : vector<2x4x4xf32>
    %309 = tpu.matmul %307, %307, %cst_105 {dimension_numbers = #tpu.dot_dimension_numbers<[2], [2], [1], [1], [0, 0, 0, 1, 1, 1], [0], [0]>} : vector<2x4x64xf32>, vector<2x4x64xf32>, vector<2x4x4xf32> -> vector<2x4x4xf32>
    "tpu.trace_stop"() : () -> ()
    %c0_106 = arith.constant 0 : index
    %c0_107 = arith.constant 0 : index
    %c0_108 = arith.constant 0 : index
    %310 = vector.load %arg6[%c0_106, %c0_107, %c0_108] : memref<2x4x128xf32, #tpu.memory_space<vmem>>, vector<2x4x128xf32>
    %311 = vector.extract_strided_slice %310 {offsets = [0, 1, 0], sizes = [2, 1, 128], strides = [1, 1, 1]} : vector<2x4x128xf32> to vector<2x1x128xf32>
    %312 = vector.extract_strided_slice %310 {offsets = [0, 2, 0], sizes = [2, 1, 128], strides = [1, 1, 1]} : vector<2x4x128xf32> to vector<2x1x128xf32>
    %313 = vector.extract_strided_slice %310 {offsets = [0, 3, 0], sizes = [2, 1, 128], strides = [1, 1, 1]} : vector<2x4x128xf32> to vector<2x1x128xf32>
    %314 = vector.extract_strided_slice %309 {offsets = [0, 1, 0], sizes = [2, 1, 1], strides = [1, 1, 1]} : vector<2x4x4xf32> to vector<2x1x1xf32>
    %315 = vector.broadcast %314 : vector<2x1x1xf32> to vector<2x1x128xf32>
    %316 = arith.mulf %315, %311 : vector<2x1x128xf32>
    %317 = vector.extract_strided_slice %309 {offsets = [0, 2, 0], sizes = [2, 1, 1], strides = [1, 1, 1]} : vector<2x4x4xf32> to vector<2x1x1xf32>
    %318 = vector.broadcast %317 : vector<2x1x1xf32> to vector<2x1x128xf32>
    %319 = arith.mulf %318, %312 : vector<2x1x128xf32>
    %320 = arith.addf %316, %319 : vector<2x1x128xf32>
    %321 = vector.extract_strided_slice %309 {offsets = [0, 3, 0], sizes = [2, 1, 1], strides = [1, 1, 1]} : vector<2x4x4xf32> to vector<2x1x1xf32>
    %322 = vector.broadcast %321 : vector<2x1x1xf32> to vector<2x1x128xf32>
    %323 = arith.mulf %322, %313 : vector<2x1x128xf32>
    %324 = arith.addf %320, %323 : vector<2x1x128xf32>
    %325 = vector.extract_strided_slice %308 {offsets = [0, 0, 0], sizes = [2, 1, 128], strides = [1, 1, 1]} : vector<2x4x128xf32> to vector<2x1x128xf32>
    %326 = arith.subf %325, %324 : vector<2x1x128xf32>
    %cst_109 = arith.constant 1.000000e-16 : f32
    %327 = vector.broadcast %cst_109 : f32 to vector<2x1x128xf32>
    %328 = arith.addf %326, %327 : vector<2x1x128xf32>
    %329 = vector.extract_strided_slice %309 {offsets = [0, 0, 0], sizes = [2, 1, 1], strides = [1, 1, 1]} : vector<2x4x4xf32> to vector<2x1x1xf32>
    %cst_110 = arith.constant 1.000000e-16 : f32
    %330 = vector.broadcast %cst_110 : f32 to vector<2x1x1xf32>
    %331 = arith.addf %329, %330 : vector<2x1x1xf32>
    %332 = tpu.reciprocal %331 {approx = true} : vector<2x1x1xf32> -> vector<2x1x1xf32>
    %333 = vector.broadcast %332 : vector<2x1x1xf32> to vector<2x1x128xf32>
    %334 = arith.mulf %328, %333 : vector<2x1x128xf32>
    %c0_111 = arith.constant 0 : index
    %c0_112 = arith.constant 0 : index
    %c0_113 = arith.constant 0 : index
    %335 = vector.load %arg6[%c0_111, %c0_112, %c0_113] : memref<2x4x128xf32, #tpu.memory_space<vmem>>, vector<2x1x128xf32>
    tpu.vector_store %arg6[%c0_111, %c0_112, %c0_113], %334 {strides = array<i32>} : memref<2x4x128xf32, #tpu.memory_space<vmem>>, vector<2x1x128xf32>,
    %336 = vector.extract_strided_slice %309 {offsets = [0, 0, 1], sizes = [2, 1, 1], strides = [1, 1, 1]} : vector<2x4x4xf32> to vector<2x1x1xf32>
    %337 = vector.broadcast %336 : vector<2x1x1xf32> to vector<2x1x128xf32>
    %338 = arith.mulf %337, %334 : vector<2x1x128xf32>
    %339 = vector.extract_strided_slice %309 {offsets = [0, 2, 1], sizes = [2, 1, 1], strides = [1, 1, 1]} : vector<2x4x4xf32> to vector<2x1x1xf32>
    %340 = vector.broadcast %339 : vector<2x1x1xf32> to vector<2x1x128xf32>
    %341 = arith.mulf %340, %312 : vector<2x1x128xf32>
    %342 = arith.addf %338, %341 : vector<2x1x128xf32>
    %343 = vector.extract_strided_slice %309 {offsets = [0, 3, 1], sizes = [2, 1, 1], strides = [1, 1, 1]} : vector<2x4x4xf32> to vector<2x1x1xf32>
    %344 = vector.broadcast %343 : vector<2x1x1xf32> to vector<2x1x128xf32>
    %345 = arith.mulf %344, %313 : vector<2x1x128xf32>
    %346 = arith.addf %342, %345 : vector<2x1x128xf32>
    %347 = vector.extract_strided_slice %308 {offsets = [0, 1, 0], sizes = [2, 1, 128], strides = [1, 1, 1]} : vector<2x4x128xf32> to vector<2x1x128xf32>
    %348 = arith.subf %347, %346 : vector<2x1x128xf32>
    %cst_114 = arith.constant 1.000000e-16 : f32
    %349 = vector.broadcast %cst_114 : f32 to vector<2x1x128xf32>
    %350 = arith.addf %348, %349 : vector<2x1x128xf32>
    %351 = vector.extract_strided_slice %309 {offsets = [0, 1, 1], sizes = [2, 1, 1], strides = [1, 1, 1]} : vector<2x4x4xf32> to vector<2x1x1xf32>
    %cst_115 = arith.constant 1.000000e-16 : f32
    %352 = vector.broadcast %cst_115 : f32 to vector<2x1x1xf32>
    %353 = arith.addf %351, %352 : vector<2x1x1xf32>
    %354 = tpu.reciprocal %353 {approx = true} : vector<2x1x1xf32> -> vector<2x1x1xf32>
    %355 = vector.broadcast %354 : vector<2x1x1xf32> to vector<2x1x128xf32>
    %356 = arith.mulf %350, %355 : vector<2x1x128xf32>
    %c0_116 = arith.constant 0 : index
    %c1_117 = arith.constant 1 : index
    %c0_118 = arith.constant 0 : index
    %357 = vector.load %arg6[%c0_116, %c1_117, %c0_118] : memref<2x4x128xf32, #tpu.memory_space<vmem>>, vector<2x1x128xf32>
    tpu.vector_store %arg6[%c0_116, %c1_117, %c0_118], %356 {strides = array<i32>} : memref<2x4x128xf32, #tpu.memory_space<vmem>>, vector<2x1x128xf32>,
    %358 = vector.extract_strided_slice %309 {offsets = [0, 0, 2], sizes = [2, 1, 1], strides = [1, 1, 1]} : vector<2x4x4xf32> to vector<2x1x1xf32>
    %359 = vector.broadcast %358 : vector<2x1x1xf32> to vector<2x1x128xf32>
    %360 = arith.mulf %359, %334 : vector<2x1x128xf32>
    %361 = vector.extract_strided_slice %309 {offsets = [0, 1, 2], sizes = [2, 1, 1], strides = [1, 1, 1]} : vector<2x4x4xf32> to vector<2x1x1xf32>
    %362 = vector.broadcast %361 : vector<2x1x1xf32> to vector<2x1x128xf32>
    %363 = arith.mulf %362, %356 : vector<2x1x128xf32>
    %364 = arith.addf %360, %363 : vector<2x1x128xf32>
    %365 = vector.extract_strided_slice %309 {offsets = [0, 3, 2], sizes = [2, 1, 1], strides = [1, 1, 1]} : vector<2x4x4xf32> to vector<2x1x1xf32>
    %366 = vector.broadcast %365 : vector<2x1x1xf32> to vector<2x1x128xf32>
    %367 = arith.mulf %366, %313 : vector<2x1x128xf32>
    %368 = arith.addf %364, %367 : vector<2x1x128xf32>
    %369 = vector.extract_strided_slice %308 {offsets = [0, 2, 0], sizes = [2, 1, 128], strides = [1, 1, 1]} : vector<2x4x128xf32> to vector<2x1x128xf32>
    %370 = arith.subf %369, %368 : vector<2x1x128xf32>
    %cst_119 = arith.constant 1.000000e-16 : f32
    %371 = vector.broadcast %cst_119 : f32 to vector<2x1x128xf32>
    %372 = arith.addf %370, %371 : vector<2x1x128xf32>
    %373 = vector.extract_strided_slice %309 {offsets = [0, 2, 2], sizes = [2, 1, 1], strides = [1, 1, 1]} : vector<2x4x4xf32> to vector<2x1x1xf32>
    %cst_120 = arith.constant 1.000000e-16 : f32
    %374 = vector.broadcast %cst_120 : f32 to vector<2x1x1xf32>
    %375 = arith.addf %373, %374 : vector<2x1x1xf32>
    %376 = tpu.reciprocal %375 {approx = true} : vector<2x1x1xf32> -> vector<2x1x1xf32>
    %377 = vector.broadcast %376 : vector<2x1x1xf32> to vector<2x1x128xf32>
    %378 = arith.mulf %372, %377 : vector<2x1x128xf32>
    %c0_121 = arith.constant 0 : index
    %c2_122 = arith.constant 2 : index
    %c0_123 = arith.constant 0 : index
    %379 = vector.load %arg6[%c0_121, %c2_122, %c0_123] : memref<2x4x128xf32, #tpu.memory_space<vmem>>, vector<2x1x128xf32>
    tpu.vector_store %arg6[%c0_121, %c2_122, %c0_123], %378 {strides = array<i32>} : memref<2x4x128xf32, #tpu.memory_space<vmem>>, vector<2x1x128xf32>,
    %380 = vector.extract_strided_slice %309 {offsets = [0, 0, 3], sizes = [2, 1, 1], strides = [1, 1, 1]} : vector<2x4x4xf32> to vector<2x1x1xf32>
    %381 = vector.broadcast %380 : vector<2x1x1xf32> to vector<2x1x128xf32>
    %382 = arith.mulf %381, %334 : vector<2x1x128xf32>
    %383 = vector.extract_strided_slice %309 {offsets = [0, 1, 3], sizes = [2, 1, 1], strides = [1, 1, 1]} : vector<2x4x4xf32> to vector<2x1x1xf32>
    %384 = vector.broadcast %383 : vector<2x1x1xf32> to vector<2x1x128xf32>
    %385 = arith.mulf %384, %356 : vector<2x1x128xf32>
    %386 = arith.addf %382, %385 : vector<2x1x128xf32>
    %387 = vector.extract_strided_slice %309 {offsets = [0, 2, 3], sizes = [2, 1, 1], strides = [1, 1, 1]} : vector<2x4x4xf32> to vector<2x1x1xf32>
    %388 = vector.broadcast %387 : vector<2x1x1xf32> to vector<2x1x128xf32>
    %389 = arith.mulf %388, %378 : vector<2x1x128xf32>
    %390 = arith.addf %386, %389 : vector<2x1x128xf32>
    %391 = vector.extract_strided_slice %308 {offsets = [0, 3, 0], sizes = [2, 1, 128], strides = [1, 1, 1]} : vector<2x4x128xf32> to vector<2x1x128xf32>
    %392 = arith.subf %391, %390 : vector<2x1x128xf32>
    %cst_124 = arith.constant 1.000000e-16 : f32
    %393 = vector.broadcast %cst_124 : f32 to vector<2x1x128xf32>
    %394 = arith.addf %392, %393 : vector<2x1x128xf32>
    %395 = vector.extract_strided_slice %309 {offsets = [0, 3, 3], sizes = [2, 1, 1], strides = [1, 1, 1]} : vector<2x4x4xf32> to vector<2x1x1xf32>
    %cst_125 = arith.constant 1.000000e-16 : f32
    %396 = vector.broadcast %cst_125 : f32 to vector<2x1x1xf32>
    %397 = arith.addf %395, %396 : vector<2x1x1xf32>
    %398 = tpu.reciprocal %397 {approx = true} : vector<2x1x1xf32> -> vector<2x1x1xf32>
    %399 = vector.broadcast %398 : vector<2x1x1xf32> to vector<2x1x128xf32>
    %400 = arith.mulf %394, %399 : vector<2x1x128xf32>
    %c0_126 = arith.constant 0 : index
    %c3_127 = arith.constant 3 : index
    %c0_128 = arith.constant 0 : index
    %401 = vector.load %arg6[%c0_126, %c3_127, %c0_128] : memref<2x4x128xf32, #tpu.memory_space<vmem>>, vector<2x1x128xf32>
    tpu.vector_store %arg6[%c0_126, %c3_127, %c0_128], %400 {strides = array<i32>} : memref<2x4x128xf32, #tpu.memory_space<vmem>>, vector<2x1x128xf32>,
    %c0_129 = arith.constant 0 : index
    %c0_130 = arith.constant 0 : index
    %c0_131 = arith.constant 0 : index
    %402 = vector.load %arg6[%c0_129, %c0_130, %c0_131] : memref<2x4x128xf32, #tpu.memory_space<vmem>>, vector<2x4x128xf32>
    "tpu.trace_start"() <{level = 10 : i32, message = "grn,gnm->grm"}> : () -> ()
    %cst_132 = arith.constant dense<0.000000e+00> : vector<2x4x64xf32>
    %403 = tpu.matmul %402, %13, %cst_132 {dimension_numbers = #tpu.dot_dimension_numbers<[2], [1], [1], [2], [0, 0, 0, 1, 1, 2], [0], [0]>} : vector<2x4x128xf32>, vector<2x128x64xf32>, vector<2x4x64xf32> -> vector<2x4x64xf32>
    "tpu.trace_stop"() : () -> ()
    "tpu.trace_start"() <{level = 10 : i32, message = "grn,gsn->grs"}> : () -> ()
    %cst_133 = arith.constant dense<0.000000e+00> : vector<2x4x4xf32>
    %404 = tpu.matmul %402, %402, %cst_133 {dimension_numbers = #tpu.dot_dimension_numbers<[2], [2], [1], [1], [0, 0, 0, 1, 1, 1], [0], [0]>} : vector<2x4x128xf32>, vector<2x4x128xf32>, vector<2x4x4xf32> -> vector<2x4x4xf32>
    "tpu.trace_stop"() : () -> ()
    %c0_134 = arith.constant 0 : index
    %c0_135 = arith.constant 0 : index
    %c0_136 = arith.constant 0 : index
    %405 = vector.load %arg5[%c0_134, %c0_135, %c0_136] : memref<2x4x64xf32, #tpu.memory_space<vmem>>, vector<2x4x64xf32>
    %406 = vector.extract_strided_slice %405 {offsets = [0, 1, 0], sizes = [2, 1, 64], strides = [1, 1, 1]} : vector<2x4x64xf32> to vector<2x1x64xf32>
    %407 = vector.extract_strided_slice %405 {offsets = [0, 2, 0], sizes = [2, 1, 64], strides = [1, 1, 1]} : vector<2x4x64xf32> to vector<2x1x64xf32>
    %408 = vector.extract_strided_slice %405 {offsets = [0, 3, 0], sizes = [2, 1, 64], strides = [1, 1, 1]} : vector<2x4x64xf32> to vector<2x1x64xf32>
    %409 = vector.extract_strided_slice %404 {offsets = [0, 1, 0], sizes = [2, 1, 1], strides = [1, 1, 1]} : vector<2x4x4xf32> to vector<2x1x1xf32>
    %410 = vector.broadcast %409 : vector<2x1x1xf32> to vector<2x1x64xf32>
    %411 = arith.mulf %410, %406 : vector<2x1x64xf32>
    %412 = vector.extract_strided_slice %404 {offsets = [0, 2, 0], sizes = [2, 1, 1], strides = [1, 1, 1]} : vector<2x4x4xf32> to vector<2x1x1xf32>
    %413 = vector.broadcast %412 : vector<2x1x1xf32> to vector<2x1x64xf32>
    %414 = arith.mulf %413, %407 : vector<2x1x64xf32>
    %415 = arith.addf %411, %414 : vector<2x1x64xf32>
    %416 = vector.extract_strided_slice %404 {offsets = [0, 3, 0], sizes = [2, 1, 1], strides = [1, 1, 1]} : vector<2x4x4xf32> to vector<2x1x1xf32>
    %417 = vector.broadcast %416 : vector<2x1x1xf32> to vector<2x1x64xf32>
    %418 = arith.mulf %417, %408 : vector<2x1x64xf32>
    %419 = arith.addf %415, %418 : vector<2x1x64xf32>
    %420 = vector.extract_strided_slice %403 {offsets = [0, 0, 0], sizes = [2, 1, 64], strides = [1, 1, 1]} : vector<2x4x64xf32> to vector<2x1x64xf32>
    %421 = arith.subf %420, %419 : vector<2x1x64xf32>
    %cst_137 = arith.constant 1.000000e-16 : f32
    %422 = vector.broadcast %cst_137 : f32 to vector<2x1x64xf32>
    %423 = arith.addf %421, %422 : vector<2x1x64xf32>
    %424 = vector.extract_strided_slice %404 {offsets = [0, 0, 0], sizes = [2, 1, 1], strides = [1, 1, 1]} : vector<2x4x4xf32> to vector<2x1x1xf32>
    %cst_138 = arith.constant 1.000000e-16 : f32
    %425 = vector.broadcast %cst_138 : f32 to vector<2x1x1xf32>
    %426 = arith.addf %424, %425 : vector<2x1x1xf32>
    %427 = tpu.reciprocal %426 {approx = true} : vector<2x1x1xf32> -> vector<2x1x1xf32>
    %428 = vector.broadcast %427 : vector<2x1x1xf32> to vector<2x1x64xf32>
    %429 = arith.mulf %423, %428 : vector<2x1x64xf32>
    %c0_139 = arith.constant 0 : index
    %c0_140 = arith.constant 0 : index
    %c0_141 = arith.constant 0 : index
    %430 = vector.load %arg5[%c0_139, %c0_140, %c0_141] : memref<2x4x64xf32, #tpu.memory_space<vmem>>, vector<2x1x64xf32>
    tpu.vector_store %arg5[%c0_139, %c0_140, %c0_141], %429 {strides = array<i32>} : memref<2x4x64xf32, #tpu.memory_space<vmem>>, vector<2x1x64xf32>,
    %431 = vector.extract_strided_slice %404 {offsets = [0, 0, 1], sizes = [2, 1, 1], strides = [1, 1, 1]} : vector<2x4x4xf32> to vector<2x1x1xf32>
    %432 = vector.broadcast %431 : vector<2x1x1xf32> to vector<2x1x64xf32>
    %433 = arith.mulf %432, %429 : vector<2x1x64xf32>
    %434 = vector.extract_strided_slice %404 {offsets = [0, 2, 1], sizes = [2, 1, 1], strides = [1, 1, 1]} : vector<2x4x4xf32> to vector<2x1x1xf32>
    %435 = vector.broadcast %434 : vector<2x1x1xf32> to vector<2x1x64xf32>
    %436 = arith.mulf %435, %407 : vector<2x1x64xf32>
    %437 = arith.addf %433, %436 : vector<2x1x64xf32>
    %438 = vector.extract_strided_slice %404 {offsets = [0, 3, 1], sizes = [2, 1, 1], strides = [1, 1, 1]} : vector<2x4x4xf32> to vector<2x1x1xf32>
    %439 = vector.broadcast %438 : vector<2x1x1xf32> to vector<2x1x64xf32>
    %440 = arith.mulf %439, %408 : vector<2x1x64xf32>
    %441 = arith.addf %437, %440 : vector<2x1x64xf32>
    %442 = vector.extract_strided_slice %403 {offsets = [0, 1, 0], sizes = [2, 1, 64], strides = [1, 1, 1]} : vector<2x4x64xf32> to vector<2x1x64xf32>
    %443 = arith.subf %442, %441 : vector<2x1x64xf32>
    %cst_142 = arith.constant 1.000000e-16 : f32
    %444 = vector.broadcast %cst_142 : f32 to vector<2x1x64xf32>
    %445 = arith.addf %443, %444 : vector<2x1x64xf32>
    %446 = vector.extract_strided_slice %404 {offsets = [0, 1, 1], sizes = [2, 1, 1], strides = [1, 1, 1]} : vector<2x4x4xf32> to vector<2x1x1xf32>
    %cst_143 = arith.constant 1.000000e-16 : f32
    %447 = vector.broadcast %cst_143 : f32 to vector<2x1x1xf32>
    %448 = arith.addf %446, %447 : vector<2x1x1xf32>
    %449 = tpu.reciprocal %448 {approx = true} : vector<2x1x1xf32> -> vector<2x1x1xf32>
    %450 = vector.broadcast %449 : vector<2x1x1xf32> to vector<2x1x64xf32>
    %451 = arith.mulf %445, %450 : vector<2x1x64xf32>
    %c0_144 = arith.constant 0 : index
    %c1_145 = arith.constant 1 : index
    %c0_146 = arith.constant 0 : index
    %452 = vector.load %arg5[%c0_144, %c1_145, %c0_146] : memref<2x4x64xf32, #tpu.memory_space<vmem>>, vector<2x1x64xf32>
    tpu.vector_store %arg5[%c0_144, %c1_145, %c0_146], %451 {strides = array<i32>} : memref<2x4x64xf32, #tpu.memory_space<vmem>>, vector<2x1x64xf32>,
    %453 = vector.extract_strided_slice %404 {offsets = [0, 0, 2], sizes = [2, 1, 1], strides = [1, 1, 1]} : vector<2x4x4xf32> to vector<2x1x1xf32>
    %454 = vector.broadcast %453 : vector<2x1x1xf32> to vector<2x1x64xf32>
    %455 = arith.mulf %454, %429 : vector<2x1x64xf32>
    %456 = vector.extract_strided_slice %404 {offsets = [0, 1, 2], sizes = [2, 1, 1], strides = [1, 1, 1]} : vector<2x4x4xf32> to vector<2x1x1xf32>
    %457 = vector.broadcast %456 : vector<2x1x1xf32> to vector<2x1x64xf32>
    %458 = arith.mulf %457, %451 : vector<2x1x64xf32>
    %459 = arith.addf %455, %458 : vector<2x1x64xf32>
    %460 = vector.extract_strided_slice %404 {offsets = [0, 3, 2], sizes = [2, 1, 1], strides = [1, 1, 1]} : vector<2x4x4xf32> to vector<2x1x1xf32>
    %461 = vector.broadcast %460 : vector<2x1x1xf32> to vector<2x1x64xf32>
    %462 = arith.mulf %461, %408 : vector<2x1x64xf32>
    %463 = arith.addf %459, %462 : vector<2x1x64xf32>
    %464 = vector.extract_strided_slice %403 {offsets = [0, 2, 0], sizes = [2, 1, 64], strides = [1, 1, 1]} : vector<2x4x64xf32> to vector<2x1x64xf32>
    %465 = arith.subf %464, %463 : vector<2x1x64xf32>
    %cst_147 = arith.constant 1.000000e-16 : f32
    %466 = vector.broadcast %cst_147 : f32 to vector<2x1x64xf32>
    %467 = arith.addf %465, %466 : vector<2x1x64xf32>
    %468 = vector.extract_strided_slice %404 {offsets = [0, 2, 2], sizes = [2, 1, 1], strides = [1, 1, 1]} : vector<2x4x4xf32> to vector<2x1x1xf32>
    %cst_148 = arith.constant 1.000000e-16 : f32
    %469 = vector.broadcast %cst_148 : f32 to vector<2x1x1xf32>
    %470 = arith.addf %468, %469 : vector<2x1x1xf32>
    %471 = tpu.reciprocal %470 {approx = true} : vector<2x1x1xf32> -> vector<2x1x1xf32>
    %472 = vector.broadcast %471 : vector<2x1x1xf32> to vector<2x1x64xf32>
    %473 = arith.mulf %467, %472 : vector<2x1x64xf32>
    %c0_149 = arith.constant 0 : index
    %c2_150 = arith.constant 2 : index
    %c0_151 = arith.constant 0 : index
    %474 = vector.load %arg5[%c0_149, %c2_150, %c0_151] : memref<2x4x64xf32, #tpu.memory_space<vmem>>, vector<2x1x64xf32>
    tpu.vector_store %arg5[%c0_149, %c2_150, %c0_151], %473 {strides = array<i32>} : memref<2x4x64xf32, #tpu.memory_space<vmem>>, vector<2x1x64xf32>,
    %475 = vector.extract_strided_slice %404 {offsets = [0, 0, 3], sizes = [2, 1, 1], strides = [1, 1, 1]} : vector<2x4x4xf32> to vector<2x1x1xf32>
    %476 = vector.broadcast %475 : vector<2x1x1xf32> to vector<2x1x64xf32>
    %477 = arith.mulf %476, %429 : vector<2x1x64xf32>
    %478 = vector.extract_strided_slice %404 {offsets = [0, 1, 3], sizes = [2, 1, 1], strides = [1, 1, 1]} : vector<2x4x4xf32> to vector<2x1x1xf32>
    %479 = vector.broadcast %478 : vector<2x1x1xf32> to vector<2x1x64xf32>
    %480 = arith.mulf %479, %451 : vector<2x1x64xf32>
    %481 = arith.addf %477, %480 : vector<2x1x64xf32>
    %482 = vector.extract_strided_slice %404 {offsets = [0, 2, 3], sizes = [2, 1, 1], strides = [1, 1, 1]} : vector<2x4x4xf32> to vector<2x1x1xf32>
    %483 = vector.broadcast %482 : vector<2x1x1xf32> to vector<2x1x64xf32>
    %484 = arith.mulf %483, %473 : vector<2x1x64xf32>
    %485 = arith.addf %481, %484 : vector<2x1x64xf32>
    %486 = vector.extract_strided_slice %403 {offsets = [0, 3, 0], sizes = [2, 1, 64], strides = [1, 1, 1]} : vector<2x4x64xf32> to vector<2x1x64xf32>
    %487 = arith.subf %486, %485 : vector<2x1x64xf32>
    %cst_152 = arith.constant 1.000000e-16 : f32
    %488 = vector.broadcast %cst_152 : f32 to vector<2x1x64xf32>
    %489 = arith.addf %487, %488 : vector<2x1x64xf32>
    %490 = vector.extract_strided_slice %404 {offsets = [0, 3, 3], sizes = [2, 1, 1], strides = [1, 1, 1]} : vector<2x4x4xf32> to vector<2x1x1xf32>
    %cst_153 = arith.constant 1.000000e-16 : f32
    %491 = vector.broadcast %cst_153 : f32 to vector<2x1x1xf32>
    %492 = arith.addf %490, %491 : vector<2x1x1xf32>
    %493 = tpu.reciprocal %492 {approx = true} : vector<2x1x1xf32> -> vector<2x1x1xf32>
    %494 = vector.broadcast %493 : vector<2x1x1xf32> to vector<2x1x64xf32>
    %495 = arith.mulf %489, %494 : vector<2x1x64xf32>
    %c0_154 = arith.constant 0 : index
    %c3_155 = arith.constant 3 : index
    %c0_156 = arith.constant 0 : index
    %496 = vector.load %arg5[%c0_154, %c3_155, %c0_156] : memref<2x4x64xf32, #tpu.memory_space<vmem>>, vector<2x1x64xf32>
    tpu.vector_store %arg5[%c0_154, %c3_155, %c0_156], %495 {strides = array<i32>} : memref<2x4x64xf32, #tpu.memory_space<vmem>>, vector<2x1x64xf32>,
    %c0_157 = arith.constant 0 : index
    %c0_158 = arith.constant 0 : index
    %c0_159 = arith.constant 0 : index
    %497 = vector.load %arg5[%c0_157, %c0_158, %c0_159] : memref<2x4x64xf32, #tpu.memory_space<vmem>>, vector<2x4x64xf32>
    "tpu.trace_start"() <{level = 10 : i32, message = "grm,gmn->grn"}> : () -> ()
    %cst_160 = arith.constant dense<0.000000e+00> : vector<2x4x128xf32>
    %498 = tpu.matmul %497, %0, %cst_160 {dimension_numbers = #tpu.dot_dimension_numbers<[2], [1], [1], [2], [0, 0, 0, 1, 1, 2], [0], [0]>} : vector<2x4x64xf32>, vector<2x64x128xf32>, vector<2x4x128xf32> -> vector<2x4x128xf32>
    "tpu.trace_stop"() : () -> ()
    "tpu.trace_start"() <{level = 10 : i32, message = "grm,gsm->grs"}> : () -> ()
    %cst_161 = arith.constant dense<0.000000e+00> : vector<2x4x4xf32>
    %499 = tpu.matmul %497, %497, %cst_161 {dimension_numbers = #tpu.dot_dimension_numbers<[2], [2], [1], [1], [0, 0, 0, 1, 1, 1], [0], [0]>} : vector<2x4x64xf32>, vector<2x4x64xf32>, vector<2x4x4xf32> -> vector<2x4x4xf32>
    "tpu.trace_stop"() : () -> ()
    %c0_162 = arith.constant 0 : index
    %c0_163 = arith.constant 0 : index
    %c0_164 = arith.constant 0 : index
    %500 = vector.load %arg6[%c0_162, %c0_163, %c0_164] : memref<2x4x128xf32, #tpu.memory_space<vmem>>, vector<2x4x128xf32>
    %501 = vector.extract_strided_slice %500 {offsets = [0, 1, 0], sizes = [2, 1, 128], strides = [1, 1, 1]} : vector<2x4x128xf32> to vector<2x1x128xf32>
    %502 = vector.extract_strided_slice %500 {offsets = [0, 2, 0], sizes = [2, 1, 128], strides = [1, 1, 1]} : vector<2x4x128xf32> to vector<2x1x128xf32>
    %503 = vector.extract_strided_slice %500 {offsets = [0, 3, 0], sizes = [2, 1, 128], strides = [1, 1, 1]} : vector<2x4x128xf32> to vector<2x1x128xf32>
    %504 = vector.extract_strided_slice %499 {offsets = [0, 1, 0], sizes = [2, 1, 1], strides = [1, 1, 1]} : vector<2x4x4xf32> to vector<2x1x1xf32>
    %505 = vector.broadcast %504 : vector<2x1x1xf32> to vector<2x1x128xf32>
    %506 = arith.mulf %505, %501 : vector<2x1x128xf32>
    %507 = vector.extract_strided_slice %499 {offsets = [0, 2, 0], sizes = [2, 1, 1], strides = [1, 1, 1]} : vector<2x4x4xf32> to vector<2x1x1xf32>
    %508 = vector.broadcast %507 : vector<2x1x1xf32> to vector<2x1x128xf32>
    %509 = arith.mulf %508, %502 : vector<2x1x128xf32>
    %510 = arith.addf %506, %509 : vector<2x1x128xf32>
    %511 = vector.extract_strided_slice %499 {offsets = [0, 3, 0], sizes = [2, 1, 1], strides = [1, 1, 1]} : vector<2x4x4xf32> to vector<2x1x1xf32>
    %512 = vector.broadcast %511 : vector<2x1x1xf32> to vector<2x1x128xf32>
    %513 = arith.mulf %512, %503 : vector<2x1x128xf32>
    %514 = arith.addf %510, %513 : vector<2x1x128xf32>
    %515 = vector.extract_strided_slice %498 {offsets = [0, 0, 0], sizes = [2, 1, 128], strides = [1, 1, 1]} : vector<2x4x128xf32> to vector<2x1x128xf32>
    %516 = arith.subf %515, %514 : vector<2x1x128xf32>
    %cst_165 = arith.constant 1.000000e-16 : f32
    %517 = vector.broadcast %cst_165 : f32 to vector<2x1x128xf32>
    %518 = arith.addf %516, %517 : vector<2x1x128xf32>
    %519 = vector.extract_strided_slice %499 {offsets = [0, 0, 0], sizes = [2, 1, 1], strides = [1, 1, 1]} : vector<2x4x4xf32> to vector<2x1x1xf32>
    %cst_166 = arith.constant 1.000000e-16 : f32
    %520 = vector.broadcast %cst_166 : f32 to vector<2x1x1xf32>
    %521 = arith.addf %519, %520 : vector<2x1x1xf32>
    %522 = tpu.reciprocal %521 {approx = true} : vector<2x1x1xf32> -> vector<2x1x1xf32>
    %523 = vector.broadcast %522 : vector<2x1x1xf32> to vector<2x1x128xf32>
    %524 = arith.mulf %518, %523 : vector<2x1x128xf32>
    %c0_167 = arith.constant 0 : index
    %c0_168 = arith.constant 0 : index
    %c0_169 = arith.constant 0 : index
    %525 = vector.load %arg6[%c0_167, %c0_168, %c0_169] : memref<2x4x128xf32, #tpu.memory_space<vmem>>, vector<2x1x128xf32>
    tpu.vector_store %arg6[%c0_167, %c0_168, %c0_169], %524 {strides = array<i32>} : memref<2x4x128xf32, #tpu.memory_space<vmem>>, vector<2x1x128xf32>,
    %526 = vector.extract_strided_slice %499 {offsets = [0, 0, 1], sizes = [2, 1, 1], strides = [1, 1, 1]} : vector<2x4x4xf32> to vector<2x1x1xf32>
    %527 = vector.broadcast %526 : vector<2x1x1xf32> to vector<2x1x128xf32>
    %528 = arith.mulf %527, %524 : vector<2x1x128xf32>
    %529 = vector.extract_strided_slice %499 {offsets = [0, 2, 1], sizes = [2, 1, 1], strides = [1, 1, 1]} : vector<2x4x4xf32> to vector<2x1x1xf32>
    %530 = vector.broadcast %529 : vector<2x1x1xf32> to vector<2x1x128xf32>
    %531 = arith.mulf %530, %502 : vector<2x1x128xf32>
    %532 = arith.addf %528, %531 : vector<2x1x128xf32>
    %533 = vector.extract_strided_slice %499 {offsets = [0, 3, 1], sizes = [2, 1, 1], strides = [1, 1, 1]} : vector<2x4x4xf32> to vector<2x1x1xf32>
    %534 = vector.broadcast %533 : vector<2x1x1xf32> to vector<2x1x128xf32>
    %535 = arith.mulf %534, %503 : vector<2x1x128xf32>
    %536 = arith.addf %532, %535 : vector<2x1x128xf32>
    %537 = vector.extract_strided_slice %498 {offsets = [0, 1, 0], sizes = [2, 1, 128], strides = [1, 1, 1]} : vector<2x4x128xf32> to vector<2x1x128xf32>
    %538 = arith.subf %537, %536 : vector<2x1x128xf32>
    %cst_170 = arith.constant 1.000000e-16 : f32
    %539 = vector.broadcast %cst_170 : f32 to vector<2x1x128xf32>
    %540 = arith.addf %538, %539 : vector<2x1x128xf32>
    %541 = vector.extract_strided_slice %499 {offsets = [0, 1, 1], sizes = [2, 1, 1], strides = [1, 1, 1]} : vector<2x4x4xf32> to vector<2x1x1xf32>
    %cst_171 = arith.constant 1.000000e-16 : f32
    %542 = vector.broadcast %cst_171 : f32 to vector<2x1x1xf32>
    %543 = arith.addf %541, %542 : vector<2x1x1xf32>
    %544 = tpu.reciprocal %543 {approx = true} : vector<2x1x1xf32> -> vector<2x1x1xf32>
    %545 = vector.broadcast %544 : vector<2x1x1xf32> to vector<2x1x128xf32>
    %546 = arith.mulf %540, %545 : vector<2x1x128xf32>
    %c0_172 = arith.constant 0 : index
    %c1_173 = arith.constant 1 : index
    %c0_174 = arith.constant 0 : index
    %547 = vector.load %arg6[%c0_172, %c1_173, %c0_174] : memref<2x4x128xf32, #tpu.memory_space<vmem>>, vector<2x1x128xf32>
    tpu.vector_store %arg6[%c0_172, %c1_173, %c0_174], %546 {strides = array<i32>} : memref<2x4x128xf32, #tpu.memory_space<vmem>>, vector<2x1x128xf32>,
    %548 = vector.extract_strided_slice %499 {offsets = [0, 0, 2], sizes = [2, 1, 1], strides = [1, 1, 1]} : vector<2x4x4xf32> to vector<2x1x1xf32>
    %549 = vector.broadcast %548 : vector<2x1x1xf32> to vector<2x1x128xf32>
    %550 = arith.mulf %549, %524 : vector<2x1x128xf32>
    %551 = vector.extract_strided_slice %499 {offsets = [0, 1, 2], sizes = [2, 1, 1], strides = [1, 1, 1]} : vector<2x4x4xf32> to vector<2x1x1xf32>
    %552 = vector.broadcast %551 : vector<2x1x1xf32> to vector<2x1x128xf32>
    %553 = arith.mulf %552, %546 : vector<2x1x128xf32>
    %554 = arith.addf %550, %553 : vector<2x1x128xf32>
    %555 = vector.extract_strided_slice %499 {offsets = [0, 3, 2], sizes = [2, 1, 1], strides = [1, 1, 1]} : vector<2x4x4xf32> to vector<2x1x1xf32>
    %556 = vector.broadcast %555 : vector<2x1x1xf32> to vector<2x1x128xf32>
    %557 = arith.mulf %556, %503 : vector<2x1x128xf32>
    %558 = arith.addf %554, %557 : vector<2x1x128xf32>
    %559 = vector.extract_strided_slice %498 {offsets = [0, 2, 0], sizes = [2, 1, 128], strides = [1, 1, 1]} : vector<2x4x128xf32> to vector<2x1x128xf32>
    %560 = arith.subf %559, %558 : vector<2x1x128xf32>
    %cst_175 = arith.constant 1.000000e-16 : f32
    %561 = vector.broadcast %cst_175 : f32 to vector<2x1x128xf32>
    %562 = arith.addf %560, %561 : vector<2x1x128xf32>
    %563 = vector.extract_strided_slice %499 {offsets = [0, 2, 2], sizes = [2, 1, 1], strides = [1, 1, 1]} : vector<2x4x4xf32> to vector<2x1x1xf32>
    %cst_176 = arith.constant 1.000000e-16 : f32
    %564 = vector.broadcast %cst_176 : f32 to vector<2x1x1xf32>
    %565 = arith.addf %563, %564 : vector<2x1x1xf32>
    %566 = tpu.reciprocal %565 {approx = true} : vector<2x1x1xf32> -> vector<2x1x1xf32>
    %567 = vector.broadcast %566 : vector<2x1x1xf32> to vector<2x1x128xf32>
    %568 = arith.mulf %562, %567 : vector<2x1x128xf32>
    %c0_177 = arith.constant 0 : index
    %c2_178 = arith.constant 2 : index
    %c0_179 = arith.constant 0 : index
    %569 = vector.load %arg6[%c0_177, %c2_178, %c0_179] : memref<2x4x128xf32, #tpu.memory_space<vmem>>, vector<2x1x128xf32>
    tpu.vector_store %arg6[%c0_177, %c2_178, %c0_179], %568 {strides = array<i32>} : memref<2x4x128xf32, #tpu.memory_space<vmem>>, vector<2x1x128xf32>,
    %570 = vector.extract_strided_slice %499 {offsets = [0, 0, 3], sizes = [2, 1, 1], strides = [1, 1, 1]} : vector<2x4x4xf32> to vector<2x1x1xf32>
    %571 = vector.broadcast %570 : vector<2x1x1xf32> to vector<2x1x128xf32>
    %572 = arith.mulf %571, %524 : vector<2x1x128xf32>
    %573 = vector.extract_strided_slice %499 {offsets = [0, 1, 3], sizes = [2, 1, 1], strides = [1, 1, 1]} : vector<2x4x4xf32> to vector<2x1x1xf32>
    %574 = vector.broadcast %573 : vector<2x1x1xf32> to vector<2x1x128xf32>
    %575 = arith.mulf %574, %546 : vector<2x1x128xf32>
    %576 = arith.addf %572, %575 : vector<2x1x128xf32>
    %577 = vector.extract_strided_slice %499 {offsets = [0, 2, 3], sizes = [2, 1, 1], strides = [1, 1, 1]} : vector<2x4x4xf32> to vector<2x1x1xf32>
    %578 = vector.broadcast %577 : vector<2x1x1xf32> to vector<2x1x128xf32>
    %579 = arith.mulf %578, %568 : vector<2x1x128xf32>
    %580 = arith.addf %576, %579 : vector<2x1x128xf32>
    %581 = vector.extract_strided_slice %498 {offsets = [0, 3, 0], sizes = [2, 1, 128], strides = [1, 1, 1]} : vector<2x4x128xf32> to vector<2x1x128xf32>
    %582 = arith.subf %581, %580 : vector<2x1x128xf32>
    %cst_180 = arith.constant 1.000000e-16 : f32
    %583 = vector.broadcast %cst_180 : f32 to vector<2x1x128xf32>
    %584 = arith.addf %582, %583 : vector<2x1x128xf32>
    %585 = vector.extract_strided_slice %499 {offsets = [0, 3, 3], sizes = [2, 1, 1], strides = [1, 1, 1]} : vector<2x4x4xf32> to vector<2x1x1xf32>
    %cst_181 = arith.constant 1.000000e-16 : f32
    %586 = vector.broadcast %cst_181 : f32 to vector<2x1x1xf32>
    %587 = arith.addf %585, %586 : vector<2x1x1xf32>
    %588 = tpu.reciprocal %587 {approx = true} : vector<2x1x1xf32> -> vector<2x1x1xf32>
    %589 = vector.broadcast %588 : vector<2x1x1xf32> to vector<2x1x128xf32>
    %590 = arith.mulf %584, %589 : vector<2x1x128xf32>
    %c0_182 = arith.constant 0 : index
    %c3_183 = arith.constant 3 : index
    %c0_184 = arith.constant 0 : index
    %591 = vector.load %arg6[%c0_182, %c3_183, %c0_184] : memref<2x4x128xf32, #tpu.memory_space<vmem>>, vector<2x1x128xf32>
    tpu.vector_store %arg6[%c0_182, %c3_183, %c0_184], %590 {strides = array<i32>} : memref<2x4x128xf32, #tpu.memory_space<vmem>>, vector<2x1x128xf32>,
    %c0_185 = arith.constant 0 : index
    %c0_186 = arith.constant 0 : index
    %c0_187 = arith.constant 0 : index
    %592 = vector.load %arg6[%c0_185, %c0_186, %c0_187] : memref<2x4x128xf32, #tpu.memory_space<vmem>>, vector<2x4x128xf32>
    "tpu.trace_start"() <{level = 10 : i32, message = "grn,gnm->grm"}> : () -> ()
    %cst_188 = arith.constant dense<0.000000e+00> : vector<2x4x64xf32>
    %593 = tpu.matmul %592, %13, %cst_188 {dimension_numbers = #tpu.dot_dimension_numbers<[2], [1], [1], [2], [0, 0, 0, 1, 1, 2], [0], [0]>} : vector<2x4x128xf32>, vector<2x128x64xf32>, vector<2x4x64xf32> -> vector<2x4x64xf32>
    "tpu.trace_stop"() : () -> ()
    "tpu.trace_start"() <{level = 10 : i32, message = "grn,gsn->grs"}> : () -> ()
    %cst_189 = arith.constant dense<0.000000e+00> : vector<2x4x4xf32>
    %594 = tpu.matmul %592, %592, %cst_189 {dimension_numbers = #tpu.dot_dimension_numbers<[2], [2], [1], [1], [0, 0, 0, 1, 1, 1], [0], [0]>} : vector<2x4x128xf32>, vector<2x4x128xf32>, vector<2x4x4xf32> -> vector<2x4x4xf32>
    "tpu.trace_stop"() : () -> ()
    %c0_190 = arith.constant 0 : index
    %c0_191 = arith.constant 0 : index
    %c0_192 = arith.constant 0 : index
    %595 = vector.load %arg5[%c0_190, %c0_191, %c0_192] : memref<2x4x64xf32, #tpu.memory_space<vmem>>, vector<2x4x64xf32>
    %596 = vector.extract_strided_slice %595 {offsets = [0, 1, 0], sizes = [2, 1, 64], strides = [1, 1, 1]} : vector<2x4x64xf32> to vector<2x1x64xf32>
    %597 = vector.extract_strided_slice %595 {offsets = [0, 2, 0], sizes = [2, 1, 64], strides = [1, 1, 1]} : vector<2x4x64xf32> to vector<2x1x64xf32>
    %598 = vector.extract_strided_slice %595 {offsets = [0, 3, 0], sizes = [2, 1, 64], strides = [1, 1, 1]} : vector<2x4x64xf32> to vector<2x1x64xf32>
    %599 = vector.extract_strided_slice %594 {offsets = [0, 1, 0], sizes = [2, 1, 1], strides = [1, 1, 1]} : vector<2x4x4xf32> to vector<2x1x1xf32>
    %600 = vector.broadcast %599 : vector<2x1x1xf32> to vector<2x1x64xf32>
    %601 = arith.mulf %600, %596 : vector<2x1x64xf32>
    %602 = vector.extract_strided_slice %594 {offsets = [0, 2, 0], sizes = [2, 1, 1], strides = [1, 1, 1]} : vector<2x4x4xf32> to vector<2x1x1xf32>
    %603 = vector.broadcast %602 : vector<2x1x1xf32> to vector<2x1x64xf32>
    %604 = arith.mulf %603, %597 : vector<2x1x64xf32>
    %605 = arith.addf %601, %604 : vector<2x1x64xf32>
    %606 = vector.extract_strided_slice %594 {offsets = [0, 3, 0], sizes = [2, 1, 1], strides = [1, 1, 1]} : vector<2x4x4xf32> to vector<2x1x1xf32>
    %607 = vector.broadcast %606 : vector<2x1x1xf32> to vector<2x1x64xf32>
    %608 = arith.mulf %607, %598 : vector<2x1x64xf32>
    %609 = arith.addf %605, %608 : vector<2x1x64xf32>
    %610 = vector.extract_strided_slice %593 {offsets = [0, 0, 0], sizes = [2, 1, 64], strides = [1, 1, 1]} : vector<2x4x64xf32> to vector<2x1x64xf32>
    %611 = arith.subf %610, %609 : vector<2x1x64xf32>
    %cst_193 = arith.constant 1.000000e-16 : f32
    %612 = vector.broadcast %cst_193 : f32 to vector<2x1x64xf32>
    %613 = arith.addf %611, %612 : vector<2x1x64xf32>
    %614 = vector.extract_strided_slice %594 {offsets = [0, 0, 0], sizes = [2, 1, 1], strides = [1, 1, 1]} : vector<2x4x4xf32> to vector<2x1x1xf32>
    %cst_194 = arith.constant 1.000000e-16 : f32
    %615 = vector.broadcast %cst_194 : f32 to vector<2x1x1xf32>
    %616 = arith.addf %614, %615 : vector<2x1x1xf32>
    %617 = tpu.reciprocal %616 {approx = true} : vector<2x1x1xf32> -> vector<2x1x1xf32>
    %618 = vector.broadcast %617 : vector<2x1x1xf32> to vector<2x1x64xf32>
    %619 = arith.mulf %613, %618 : vector<2x1x64xf32>
    %c0_195 = arith.constant 0 : index
    %c0_196 = arith.constant 0 : index
    %c0_197 = arith.constant 0 : index
    %620 = vector.load %arg5[%c0_195, %c0_196, %c0_197] : memref<2x4x64xf32, #tpu.memory_space<vmem>>, vector<2x1x64xf32>
    tpu.vector_store %arg5[%c0_195, %c0_196, %c0_197], %619 {strides = array<i32>} : memref<2x4x64xf32, #tpu.memory_space<vmem>>, vector<2x1x64xf32>,
    %621 = vector.extract_strided_slice %594 {offsets = [0, 0, 1], sizes = [2, 1, 1], strides = [1, 1, 1]} : vector<2x4x4xf32> to vector<2x1x1xf32>
    %622 = vector.broadcast %621 : vector<2x1x1xf32> to vector<2x1x64xf32>
    %623 = arith.mulf %622, %619 : vector<2x1x64xf32>
    %624 = vector.extract_strided_slice %594 {offsets = [0, 2, 1], sizes = [2, 1, 1], strides = [1, 1, 1]} : vector<2x4x4xf32> to vector<2x1x1xf32>
    %625 = vector.broadcast %624 : vector<2x1x1xf32> to vector<2x1x64xf32>
    %626 = arith.mulf %625, %597 : vector<2x1x64xf32>
    %627 = arith.addf %623, %626 : vector<2x1x64xf32>
    %628 = vector.extract_strided_slice %594 {offsets = [0, 3, 1], sizes = [2, 1, 1], strides = [1, 1, 1]} : vector<2x4x4xf32> to vector<2x1x1xf32>
    %629 = vector.broadcast %628 : vector<2x1x1xf32> to vector<2x1x64xf32>
    %630 = arith.mulf %629, %598 : vector<2x1x64xf32>
    %631 = arith.addf %627, %630 : vector<2x1x64xf32>
    %632 = vector.extract_strided_slice %593 {offsets = [0, 1, 0], sizes = [2, 1, 64], strides = [1, 1, 1]} : vector<2x4x64xf32> to vector<2x1x64xf32>
    %633 = arith.subf %632, %631 : vector<2x1x64xf32>
    %cst_198 = arith.constant 1.000000e-16 : f32
    %634 = vector.broadcast %cst_198 : f32 to vector<2x1x64xf32>
    %635 = arith.addf %633, %634 : vector<2x1x64xf32>
    %636 = vector.extract_strided_slice %594 {offsets = [0, 1, 1], sizes = [2, 1, 1], strides = [1, 1, 1]} : vector<2x4x4xf32> to vector<2x1x1xf32>
    %cst_199 = arith.constant 1.000000e-16 : f32
    %637 = vector.broadcast %cst_199 : f32 to vector<2x1x1xf32>
    %638 = arith.addf %636, %637 : vector<2x1x1xf32>
    %639 = tpu.reciprocal %638 {approx = true} : vector<2x1x1xf32> -> vector<2x1x1xf32>
    %640 = vector.broadcast %639 : vector<2x1x1xf32> to vector<2x1x64xf32>
    %641 = arith.mulf %635, %640 : vector<2x1x64xf32>
    %c0_200 = arith.constant 0 : index
    %c1_201 = arith.constant 1 : index
    %c0_202 = arith.constant 0 : index
    %642 = vector.load %arg5[%c0_200, %c1_201, %c0_202] : memref<2x4x64xf32, #tpu.memory_space<vmem>>, vector<2x1x64xf32>
    tpu.vector_store %arg5[%c0_200, %c1_201, %c0_202], %641 {strides = array<i32>} : memref<2x4x64xf32, #tpu.memory_space<vmem>>, vector<2x1x64xf32>,
    %643 = vector.extract_strided_slice %594 {offsets = [0, 0, 2], sizes = [2, 1, 1], strides = [1, 1, 1]} : vector<2x4x4xf32> to vector<2x1x1xf32>
    %644 = vector.broadcast %643 : vector<2x1x1xf32> to vector<2x1x64xf32>
    %645 = arith.mulf %644, %619 : vector<2x1x64xf32>
    %646 = vector.extract_strided_slice %594 {offsets = [0, 1, 2], sizes = [2, 1, 1], strides = [1, 1, 1]} : vector<2x4x4xf32> to vector<2x1x1xf32>
    %647 = vector.broadcast %646 : vector<2x1x1xf32> to vector<2x1x64xf32>
    %648 = arith.mulf %647, %641 : vector<2x1x64xf32>
    %649 = arith.addf %645, %648 : vector<2x1x64xf32>
    %650 = vector.extract_strided_slice %594 {offsets = [0, 3, 2], sizes = [2, 1, 1], strides = [1, 1, 1]} : vector<2x4x4xf32> to vector<2x1x1xf32>
    %651 = vector.broadcast %650 : vector<2x1x1xf32> to vector<2x1x64xf32>
    %652 = arith.mulf %651, %598 : vector<2x1x64xf32>
    %653 = arith.addf %649, %652 : vector<2x1x64xf32>
    %654 = vector.extract_strided_slice %593 {offsets = [0, 2, 0], sizes = [2, 1, 64], strides = [1, 1, 1]} : vector<2x4x64xf32> to vector<2x1x64xf32>
    %655 = arith.subf %654, %653 : vector<2x1x64xf32>
    %cst_203 = arith.constant 1.000000e-16 : f32
    %656 = vector.broadcast %cst_203 : f32 to vector<2x1x64xf32>
    %657 = arith.addf %655, %656 : vector<2x1x64xf32>
    %658 = vector.extract_strided_slice %594 {offsets = [0, 2, 2], sizes = [2, 1, 1], strides = [1, 1, 1]} : vector<2x4x4xf32> to vector<2x1x1xf32>
    %cst_204 = arith.constant 1.000000e-16 : f32
    %659 = vector.broadcast %cst_204 : f32 to vector<2x1x1xf32>
    %660 = arith.addf %658, %659 : vector<2x1x1xf32>
    %661 = tpu.reciprocal %660 {approx = true} : vector<2x1x1xf32> -> vector<2x1x1xf32>
    %662 = vector.broadcast %661 : vector<2x1x1xf32> to vector<2x1x64xf32>
    %663 = arith.mulf %657, %662 : vector<2x1x64xf32>
    %c0_205 = arith.constant 0 : index
    %c2_206 = arith.constant 2 : index
    %c0_207 = arith.constant 0 : index
    %664 = vector.load %arg5[%c0_205, %c2_206, %c0_207] : memref<2x4x64xf32, #tpu.memory_space<vmem>>, vector<2x1x64xf32>
    tpu.vector_store %arg5[%c0_205, %c2_206, %c0_207], %663 {strides = array<i32>} : memref<2x4x64xf32, #tpu.memory_space<vmem>>, vector<2x1x64xf32>,
    %665 = vector.extract_strided_slice %594 {offsets = [0, 0, 3], sizes = [2, 1, 1], strides = [1, 1, 1]} : vector<2x4x4xf32> to vector<2x1x1xf32>
    %666 = vector.broadcast %665 : vector<2x1x1xf32> to vector<2x1x64xf32>
    %667 = arith.mulf %666, %619 : vector<2x1x64xf32>
    %668 = vector.extract_strided_slice %594 {offsets = [0, 1, 3], sizes = [2, 1, 1], strides = [1, 1, 1]} : vector<2x4x4xf32> to vector<2x1x1xf32>
    %669 = vector.broadcast %668 : vector<2x1x1xf32> to vector<2x1x64xf32>
    %670 = arith.mulf %669, %641 : vector<2x1x64xf32>
    %671 = arith.addf %667, %670 : vector<2x1x64xf32>
    %672 = vector.extract_strided_slice %594 {offsets = [0, 2, 3], sizes = [2, 1, 1], strides = [1, 1, 1]} : vector<2x4x4xf32> to vector<2x1x1xf32>
    %673 = vector.broadcast %672 : vector<2x1x1xf32> to vector<2x1x64xf32>
    %674 = arith.mulf %673, %663 : vector<2x1x64xf32>
    %675 = arith.addf %671, %674 : vector<2x1x64xf32>
    %676 = vector.extract_strided_slice %593 {offsets = [0, 3, 0], sizes = [2, 1, 64], strides = [1, 1, 1]} : vector<2x4x64xf32> to vector<2x1x64xf32>
    %677 = arith.subf %676, %675 : vector<2x1x64xf32>
    %cst_208 = arith.constant 1.000000e-16 : f32
    %678 = vector.broadcast %cst_208 : f32 to vector<2x1x64xf32>
    %679 = arith.addf %677, %678 : vector<2x1x64xf32>
    %680 = vector.extract_strided_slice %594 {offsets = [0, 3, 3], sizes = [2, 1, 1], strides = [1, 1, 1]} : vector<2x4x4xf32> to vector<2x1x1xf32>
    %cst_209 = arith.constant 1.000000e-16 : f32
    %681 = vector.broadcast %cst_209 : f32 to vector<2x1x1xf32>
    %682 = arith.addf %680, %681 : vector<2x1x1xf32>
    %683 = tpu.reciprocal %682 {approx = true} : vector<2x1x1xf32> -> vector<2x1x1xf32>
    %684 = vector.broadcast %683 : vector<2x1x1xf32> to vector<2x1x64xf32>
    %685 = arith.mulf %679, %684 : vector<2x1x64xf32>
    %c0_210 = arith.constant 0 : index
    %c3_211 = arith.constant 3 : index
    %c0_212 = arith.constant 0 : index
    %686 = vector.load %arg5[%c0_210, %c3_211, %c0_212] : memref<2x4x64xf32, #tpu.memory_space<vmem>>, vector<2x1x64xf32>
    tpu.vector_store %arg5[%c0_210, %c3_211, %c0_212], %685 {strides = array<i32>} : memref<2x4x64xf32, #tpu.memory_space<vmem>>, vector<2x1x64xf32>,
    %c0_213 = arith.constant 0 : index
    %c0_214 = arith.constant 0 : index
    %c0_215 = arith.constant 0 : index
    %687 = vector.load %arg5[%c0_213, %c0_214, %c0_215] : memref<2x4x64xf32, #tpu.memory_space<vmem>>, vector<2x4x64xf32>
    "tpu.trace_start"() <{level = 10 : i32, message = "grm,gmn->grn"}> : () -> ()
    %cst_216 = arith.constant dense<0.000000e+00> : vector<2x4x128xf32>
    %688 = tpu.matmul %687, %0, %cst_216 {dimension_numbers = #tpu.dot_dimension_numbers<[2], [1], [1], [2], [0, 0, 0, 1, 1, 2], [0], [0]>} : vector<2x4x64xf32>, vector<2x64x128xf32>, vector<2x4x128xf32> -> vector<2x4x128xf32>
    "tpu.trace_stop"() : () -> ()
    "tpu.trace_start"() <{level = 10 : i32, message = "grm,gsm->grs"}> : () -> ()
    %cst_217 = arith.constant dense<0.000000e+00> : vector<2x4x4xf32>
    %689 = tpu.matmul %687, %687, %cst_217 {dimension_numbers = #tpu.dot_dimension_numbers<[2], [2], [1], [1], [0, 0, 0, 1, 1, 1], [0], [0]>} : vector<2x4x64xf32>, vector<2x4x64xf32>, vector<2x4x4xf32> -> vector<2x4x4xf32>
    "tpu.trace_stop"() : () -> ()
    %c0_218 = arith.constant 0 : index
    %c0_219 = arith.constant 0 : index
    %c0_220 = arith.constant 0 : index
    %690 = vector.load %arg6[%c0_218, %c0_219, %c0_220] : memref<2x4x128xf32, #tpu.memory_space<vmem>>, vector<2x4x128xf32>
    %691 = vector.extract_strided_slice %690 {offsets = [0, 1, 0], sizes = [2, 1, 128], strides = [1, 1, 1]} : vector<2x4x128xf32> to vector<2x1x128xf32>
    %692 = vector.extract_strided_slice %690 {offsets = [0, 2, 0], sizes = [2, 1, 128], strides = [1, 1, 1]} : vector<2x4x128xf32> to vector<2x1x128xf32>
    %693 = vector.extract_strided_slice %690 {offsets = [0, 3, 0], sizes = [2, 1, 128], strides = [1, 1, 1]} : vector<2x4x128xf32> to vector<2x1x128xf32>
    %694 = vector.extract_strided_slice %689 {offsets = [0, 1, 0], sizes = [2, 1, 1], strides = [1, 1, 1]} : vector<2x4x4xf32> to vector<2x1x1xf32>
    %695 = vector.broadcast %694 : vector<2x1x1xf32> to vector<2x1x128xf32>
    %696 = arith.mulf %695, %691 : vector<2x1x128xf32>
    %697 = vector.extract_strided_slice %689 {offsets = [0, 2, 0], sizes = [2, 1, 1], strides = [1, 1, 1]} : vector<2x4x4xf32> to vector<2x1x1xf32>
    %698 = vector.broadcast %697 : vector<2x1x1xf32> to vector<2x1x128xf32>
    %699 = arith.mulf %698, %692 : vector<2x1x128xf32>
    %700 = arith.addf %696, %699 : vector<2x1x128xf32>
    %701 = vector.extract_strided_slice %689 {offsets = [0, 3, 0], sizes = [2, 1, 1], strides = [1, 1, 1]} : vector<2x4x4xf32> to vector<2x1x1xf32>
    %702 = vector.broadcast %701 : vector<2x1x1xf32> to vector<2x1x128xf32>
    %703 = arith.mulf %702, %693 : vector<2x1x128xf32>
    %704 = arith.addf %700, %703 : vector<2x1x128xf32>
    %705 = vector.extract_strided_slice %688 {offsets = [0, 0, 0], sizes = [2, 1, 128], strides = [1, 1, 1]} : vector<2x4x128xf32> to vector<2x1x128xf32>
    %706 = arith.subf %705, %704 : vector<2x1x128xf32>
    %cst_221 = arith.constant 1.000000e-16 : f32
    %707 = vector.broadcast %cst_221 : f32 to vector<2x1x128xf32>
    %708 = arith.addf %706, %707 : vector<2x1x128xf32>
    %709 = vector.extract_strided_slice %689 {offsets = [0, 0, 0], sizes = [2, 1, 1], strides = [1, 1, 1]} : vector<2x4x4xf32> to vector<2x1x1xf32>
    %cst_222 = arith.constant 1.000000e-16 : f32
    %710 = vector.broadcast %cst_222 : f32 to vector<2x1x1xf32>
    %711 = arith.addf %709, %710 : vector<2x1x1xf32>
    %712 = tpu.reciprocal %711 {approx = true} : vector<2x1x1xf32> -> vector<2x1x1xf32>
    %713 = vector.broadcast %712 : vector<2x1x1xf32> to vector<2x1x128xf32>
    %714 = arith.mulf %708, %713 : vector<2x1x128xf32>
    %c0_223 = arith.constant 0 : index
    %c0_224 = arith.constant 0 : index
    %c0_225 = arith.constant 0 : index
    %715 = vector.load %arg6[%c0_223, %c0_224, %c0_225] : memref<2x4x128xf32, #tpu.memory_space<vmem>>, vector<2x1x128xf32>
    tpu.vector_store %arg6[%c0_223, %c0_224, %c0_225], %714 {strides = array<i32>} : memref<2x4x128xf32, #tpu.memory_space<vmem>>, vector<2x1x128xf32>,
    %716 = vector.extract_strided_slice %689 {offsets = [0, 0, 1], sizes = [2, 1, 1], strides = [1, 1, 1]} : vector<2x4x4xf32> to vector<2x1x1xf32>
    %717 = vector.broadcast %716 : vector<2x1x1xf32> to vector<2x1x128xf32>
    %718 = arith.mulf %717, %714 : vector<2x1x128xf32>
    %719 = vector.extract_strided_slice %689 {offsets = [0, 2, 1], sizes = [2, 1, 1], strides = [1, 1, 1]} : vector<2x4x4xf32> to vector<2x1x1xf32>
    %720 = vector.broadcast %719 : vector<2x1x1xf32> to vector<2x1x128xf32>
    %721 = arith.mulf %720, %692 : vector<2x1x128xf32>
    %722 = arith.addf %718, %721 : vector<2x1x128xf32>
    %723 = vector.extract_strided_slice %689 {offsets = [0, 3, 1], sizes = [2, 1, 1], strides = [1, 1, 1]} : vector<2x4x4xf32> to vector<2x1x1xf32>
    %724 = vector.broadcast %723 : vector<2x1x1xf32> to vector<2x1x128xf32>
    %725 = arith.mulf %724, %693 : vector<2x1x128xf32>
    %726 = arith.addf %722, %725 : vector<2x1x128xf32>
    %727 = vector.extract_strided_slice %688 {offsets = [0, 1, 0], sizes = [2, 1, 128], strides = [1, 1, 1]} : vector<2x4x128xf32> to vector<2x1x128xf32>
    %728 = arith.subf %727, %726 : vector<2x1x128xf32>
    %cst_226 = arith.constant 1.000000e-16 : f32
    %729 = vector.broadcast %cst_226 : f32 to vector<2x1x128xf32>
    %730 = arith.addf %728, %729 : vector<2x1x128xf32>
    %731 = vector.extract_strided_slice %689 {offsets = [0, 1, 1], sizes = [2, 1, 1], strides = [1, 1, 1]} : vector<2x4x4xf32> to vector<2x1x1xf32>
    %cst_227 = arith.constant 1.000000e-16 : f32
    %732 = vector.broadcast %cst_227 : f32 to vector<2x1x1xf32>
    %733 = arith.addf %731, %732 : vector<2x1x1xf32>
    %734 = tpu.reciprocal %733 {approx = true} : vector<2x1x1xf32> -> vector<2x1x1xf32>
    %735 = vector.broadcast %734 : vector<2x1x1xf32> to vector<2x1x128xf32>
    %736 = arith.mulf %730, %735 : vector<2x1x128xf32>
    %c0_228 = arith.constant 0 : index
    %c1_229 = arith.constant 1 : index
    %c0_230 = arith.constant 0 : index
    %737 = vector.load %arg6[%c0_228, %c1_229, %c0_230] : memref<2x4x128xf32, #tpu.memory_space<vmem>>, vector<2x1x128xf32>
    tpu.vector_store %arg6[%c0_228, %c1_229, %c0_230], %736 {strides = array<i32>} : memref<2x4x128xf32, #tpu.memory_space<vmem>>, vector<2x1x128xf32>,
    %738 = vector.extract_strided_slice %689 {offsets = [0, 0, 2], sizes = [2, 1, 1], strides = [1, 1, 1]} : vector<2x4x4xf32> to vector<2x1x1xf32>
    %739 = vector.broadcast %738 : vector<2x1x1xf32> to vector<2x1x128xf32>
    %740 = arith.mulf %739, %714 : vector<2x1x128xf32>
    %741 = vector.extract_strided_slice %689 {offsets = [0, 1, 2], sizes = [2, 1, 1], strides = [1, 1, 1]} : vector<2x4x4xf32> to vector<2x1x1xf32>
    %742 = vector.broadcast %741 : vector<2x1x1xf32> to vector<2x1x128xf32>
    %743 = arith.mulf %742, %736 : vector<2x1x128xf32>
    %744 = arith.addf %740, %743 : vector<2x1x128xf32>
    %745 = vector.extract_strided_slice %689 {offsets = [0, 3, 2], sizes = [2, 1, 1], strides = [1, 1, 1]} : vector<2x4x4xf32> to vector<2x1x1xf32>
    %746 = vector.broadcast %745 : vector<2x1x1xf32> to vector<2x1x128xf32>
    %747 = arith.mulf %746, %693 : vector<2x1x128xf32>
    %748 = arith.addf %744, %747 : vector<2x1x128xf32>
    %749 = vector.extract_strided_slice %688 {offsets = [0, 2, 0], sizes = [2, 1, 128], strides = [1, 1, 1]} : vector<2x4x128xf32> to vector<2x1x128xf32>
    %750 = arith.subf %749, %748 : vector<2x1x128xf32>
    %cst_231 = arith.constant 1.000000e-16 : f32
    %751 = vector.broadcast %cst_231 : f32 to vector<2x1x128xf32>
    %752 = arith.addf %750, %751 : vector<2x1x128xf32>
    %753 = vector.extract_strided_slice %689 {offsets = [0, 2, 2], sizes = [2, 1, 1], strides = [1, 1, 1]} : vector<2x4x4xf32> to vector<2x1x1xf32>
    %cst_232 = arith.constant 1.000000e-16 : f32
    %754 = vector.broadcast %cst_232 : f32 to vector<2x1x1xf32>
    %755 = arith.addf %753, %754 : vector<2x1x1xf32>
    %756 = tpu.reciprocal %755 {approx = true} : vector<2x1x1xf32> -> vector<2x1x1xf32>
    %757 = vector.broadcast %756 : vector<2x1x1xf32> to vector<2x1x128xf32>
    %758 = arith.mulf %752, %757 : vector<2x1x128xf32>
    %c0_233 = arith.constant 0 : index
    %c2_234 = arith.constant 2 : index
    %c0_235 = arith.constant 0 : index
    %759 = vector.load %arg6[%c0_233, %c2_234, %c0_235] : memref<2x4x128xf32, #tpu.memory_space<vmem>>, vector<2x1x128xf32>
    tpu.vector_store %arg6[%c0_233, %c2_234, %c0_235], %758 {strides = array<i32>} : memref<2x4x128xf32, #tpu.memory_space<vmem>>, vector<2x1x128xf32>,
    %760 = vector.extract_strided_slice %689 {offsets = [0, 0, 3], sizes = [2, 1, 1], strides = [1, 1, 1]} : vector<2x4x4xf32> to vector<2x1x1xf32>
    %761 = vector.broadcast %760 : vector<2x1x1xf32> to vector<2x1x128xf32>
    %762 = arith.mulf %761, %714 : vector<2x1x128xf32>
    %763 = vector.extract_strided_slice %689 {offsets = [0, 1, 3], sizes = [2, 1, 1], strides = [1, 1, 1]} : vector<2x4x4xf32> to vector<2x1x1xf32>
    %764 = vector.broadcast %763 : vector<2x1x1xf32> to vector<2x1x128xf32>
    %765 = arith.mulf %764, %736 : vector<2x1x128xf32>
    %766 = arith.addf %762, %765 : vector<2x1x128xf32>
    %767 = vector.extract_strided_slice %689 {offsets = [0, 2, 3], sizes = [2, 1, 1], strides = [1, 1, 1]} : vector<2x4x4xf32> to vector<2x1x1xf32>
    %768 = vector.broadcast %767 : vector<2x1x1xf32> to vector<2x1x128xf32>
    %769 = arith.mulf %768, %758 : vector<2x1x128xf32>
    %770 = arith.addf %766, %769 : vector<2x1x128xf32>
    %771 = vector.extract_strided_slice %688 {offsets = [0, 3, 0], sizes = [2, 1, 128], strides = [1, 1, 1]} : vector<2x4x128xf32> to vector<2x1x128xf32>
    %772 = arith.subf %771, %770 : vector<2x1x128xf32>
    %cst_236 = arith.constant 1.000000e-16 : f32
    %773 = vector.broadcast %cst_236 : f32 to vector<2x1x128xf32>
    %774 = arith.addf %772, %773 : vector<2x1x128xf32>
    %775 = vector.extract_strided_slice %689 {offsets = [0, 3, 3], sizes = [2, 1, 1], strides = [1, 1, 1]} : vector<2x4x4xf32> to vector<2x1x1xf32>
    %cst_237 = arith.constant 1.000000e-16 : f32
    %776 = vector.broadcast %cst_237 : f32 to vector<2x1x1xf32>
    %777 = arith.addf %775, %776 : vector<2x1x1xf32>
    %778 = tpu.reciprocal %777 {approx = true} : vector<2x1x1xf32> -> vector<2x1x1xf32>
    %779 = vector.broadcast %778 : vector<2x1x1xf32> to vector<2x1x128xf32>
    %780 = arith.mulf %774, %779 : vector<2x1x128xf32>
    %c0_238 = arith.constant 0 : index
    %c3_239 = arith.constant 3 : index
    %c0_240 = arith.constant 0 : index
    %781 = vector.load %arg6[%c0_238, %c3_239, %c0_240] : memref<2x4x128xf32, #tpu.memory_space<vmem>>, vector<2x1x128xf32>
    tpu.vector_store %arg6[%c0_238, %c3_239, %c0_240], %780 {strides = array<i32>} : memref<2x4x128xf32, #tpu.memory_space<vmem>>, vector<2x1x128xf32>,
    %c0_241 = arith.constant 0 : index
    %c0_242 = arith.constant 0 : index
    %c0_243 = arith.constant 0 : index
    %782 = vector.load %arg6[%c0_241, %c0_242, %c0_243] : memref<2x4x128xf32, #tpu.memory_space<vmem>>, vector<2x4x128xf32>
    "tpu.trace_start"() <{level = 10 : i32, message = "grn,gnm->grm"}> : () -> ()
    %cst_244 = arith.constant dense<0.000000e+00> : vector<2x4x64xf32>
    %783 = tpu.matmul %782, %13, %cst_244 {dimension_numbers = #tpu.dot_dimension_numbers<[2], [1], [1], [2], [0, 0, 0, 1, 1, 2], [0], [0]>} : vector<2x4x128xf32>, vector<2x128x64xf32>, vector<2x4x64xf32> -> vector<2x4x64xf32>
    "tpu.trace_stop"() : () -> ()
    "tpu.trace_start"() <{level = 10 : i32, message = "grn,gsn->grs"}> : () -> ()
    %cst_245 = arith.constant dense<0.000000e+00> : vector<2x4x4xf32>
    %784 = tpu.matmul %782, %782, %cst_245 {dimension_numbers = #tpu.dot_dimension_numbers<[2], [2], [1], [1], [0, 0, 0, 1, 1, 1], [0], [0]>} : vector<2x4x128xf32>, vector<2x4x128xf32>, vector<2x4x4xf32> -> vector<2x4x4xf32>
    "tpu.trace_stop"() : () -> ()
    %c0_246 = arith.constant 0 : index
    %c0_247 = arith.constant 0 : index
    %c0_248 = arith.constant 0 : index
    %785 = vector.load %arg5[%c0_246, %c0_247, %c0_248] : memref<2x4x64xf32, #tpu.memory_space<vmem>>, vector<2x4x64xf32>
    %786 = vector.extract_strided_slice %785 {offsets = [0, 1, 0], sizes = [2, 1, 64], strides = [1, 1, 1]} : vector<2x4x64xf32> to vector<2x1x64xf32>
    %787 = vector.extract_strided_slice %785 {offsets = [0, 2, 0], sizes = [2, 1, 64], strides = [1, 1, 1]} : vector<2x4x64xf32> to vector<2x1x64xf32>
    %788 = vector.extract_strided_slice %785 {offsets = [0, 3, 0], sizes = [2, 1, 64], strides = [1, 1, 1]} : vector<2x4x64xf32> to vector<2x1x64xf32>
    %789 = vector.extract_strided_slice %784 {offsets = [0, 1, 0], sizes = [2, 1, 1], strides = [1, 1, 1]} : vector<2x4x4xf32> to vector<2x1x1xf32>
    %790 = vector.broadcast %789 : vector<2x1x1xf32> to vector<2x1x64xf32>
    %791 = arith.mulf %790, %786 : vector<2x1x64xf32>
    %792 = vector.extract_strided_slice %784 {offsets = [0, 2, 0], sizes = [2, 1, 1], strides = [1, 1, 1]} : vector<2x4x4xf32> to vector<2x1x1xf32>
    %793 = vector.broadcast %792 : vector<2x1x1xf32> to vector<2x1x64xf32>
    %794 = arith.mulf %793, %787 : vector<2x1x64xf32>
    %795 = arith.addf %791, %794 : vector<2x1x64xf32>
    %796 = vector.extract_strided_slice %784 {offsets = [0, 3, 0], sizes = [2, 1, 1], strides = [1, 1, 1]} : vector<2x4x4xf32> to vector<2x1x1xf32>
    %797 = vector.broadcast %796 : vector<2x1x1xf32> to vector<2x1x64xf32>
    %798 = arith.mulf %797, %788 : vector<2x1x64xf32>
    %799 = arith.addf %795, %798 : vector<2x1x64xf32>
    %800 = vector.extract_strided_slice %783 {offsets = [0, 0, 0], sizes = [2, 1, 64], strides = [1, 1, 1]} : vector<2x4x64xf32> to vector<2x1x64xf32>
    %801 = arith.subf %800, %799 : vector<2x1x64xf32>
    %cst_249 = arith.constant 1.000000e-16 : f32
    %802 = vector.broadcast %cst_249 : f32 to vector<2x1x64xf32>
    %803 = arith.addf %801, %802 : vector<2x1x64xf32>
    %804 = vector.extract_strided_slice %784 {offsets = [0, 0, 0], sizes = [2, 1, 1], strides = [1, 1, 1]} : vector<2x4x4xf32> to vector<2x1x1xf32>
    %cst_250 = arith.constant 1.000000e-16 : f32
    %805 = vector.broadcast %cst_250 : f32 to vector<2x1x1xf32>
    %806 = arith.addf %804, %805 : vector<2x1x1xf32>
    %807 = tpu.reciprocal %806 {approx = true} : vector<2x1x1xf32> -> vector<2x1x1xf32>
    %808 = vector.broadcast %807 : vector<2x1x1xf32> to vector<2x1x64xf32>
    %809 = arith.mulf %803, %808 : vector<2x1x64xf32>
    %c0_251 = arith.constant 0 : index
    %c0_252 = arith.constant 0 : index
    %c0_253 = arith.constant 0 : index
    %810 = vector.load %arg5[%c0_251, %c0_252, %c0_253] : memref<2x4x64xf32, #tpu.memory_space<vmem>>, vector<2x1x64xf32>
    tpu.vector_store %arg5[%c0_251, %c0_252, %c0_253], %809 {strides = array<i32>} : memref<2x4x64xf32, #tpu.memory_space<vmem>>, vector<2x1x64xf32>,
    %811 = vector.extract_strided_slice %784 {offsets = [0, 0, 1], sizes = [2, 1, 1], strides = [1, 1, 1]} : vector<2x4x4xf32> to vector<2x1x1xf32>
    %812 = vector.broadcast %811 : vector<2x1x1xf32> to vector<2x1x64xf32>
    %813 = arith.mulf %812, %809 : vector<2x1x64xf32>
    %814 = vector.extract_strided_slice %784 {offsets = [0, 2, 1], sizes = [2, 1, 1], strides = [1, 1, 1]} : vector<2x4x4xf32> to vector<2x1x1xf32>
    %815 = vector.broadcast %814 : vector<2x1x1xf32> to vector<2x1x64xf32>
    %816 = arith.mulf %815, %787 : vector<2x1x64xf32>
    %817 = arith.addf %813, %816 : vector<2x1x64xf32>
    %818 = vector.extract_strided_slice %784 {offsets = [0, 3, 1], sizes = [2, 1, 1], strides = [1, 1, 1]} : vector<2x4x4xf32> to vector<2x1x1xf32>
    %819 = vector.broadcast %818 : vector<2x1x1xf32> to vector<2x1x64xf32>
    %820 = arith.mulf %819, %788 : vector<2x1x64xf32>
    %821 = arith.addf %817, %820 : vector<2x1x64xf32>
    %822 = vector.extract_strided_slice %783 {offsets = [0, 1, 0], sizes = [2, 1, 64], strides = [1, 1, 1]} : vector<2x4x64xf32> to vector<2x1x64xf32>
    %823 = arith.subf %822, %821 : vector<2x1x64xf32>
    %cst_254 = arith.constant 1.000000e-16 : f32
    %824 = vector.broadcast %cst_254 : f32 to vector<2x1x64xf32>
    %825 = arith.addf %823, %824 : vector<2x1x64xf32>
    %826 = vector.extract_strided_slice %784 {offsets = [0, 1, 1], sizes = [2, 1, 1], strides = [1, 1, 1]} : vector<2x4x4xf32> to vector<2x1x1xf32>
    %cst_255 = arith.constant 1.000000e-16 : f32
    %827 = vector.broadcast %cst_255 : f32 to vector<2x1x1xf32>
    %828 = arith.addf %826, %827 : vector<2x1x1xf32>
    %829 = tpu.reciprocal %828 {approx = true} : vector<2x1x1xf32> -> vector<2x1x1xf32>
    %830 = vector.broadcast %829 : vector<2x1x1xf32> to vector<2x1x64xf32>
    %831 = arith.mulf %825, %830 : vector<2x1x64xf32>
    %c0_256 = arith.constant 0 : index
    %c1_257 = arith.constant 1 : index
    %c0_258 = arith.constant 0 : index
    %832 = vector.load %arg5[%c0_256, %c1_257, %c0_258] : memref<2x4x64xf32, #tpu.memory_space<vmem>>, vector<2x1x64xf32>
    tpu.vector_store %arg5[%c0_256, %c1_257, %c0_258], %831 {strides = array<i32>} : memref<2x4x64xf32, #tpu.memory_space<vmem>>, vector<2x1x64xf32>,
    %833 = vector.extract_strided_slice %784 {offsets = [0, 0, 2], sizes = [2, 1, 1], strides = [1, 1, 1]} : vector<2x4x4xf32> to vector<2x1x1xf32>
    %834 = vector.broadcast %833 : vector<2x1x1xf32> to vector<2x1x64xf32>
    %835 = arith.mulf %834, %809 : vector<2x1x64xf32>
    %836 = vector.extract_strided_slice %784 {offsets = [0, 1, 2], sizes = [2, 1, 1], strides = [1, 1, 1]} : vector<2x4x4xf32> to vector<2x1x1xf32>
    %837 = vector.broadcast %836 : vector<2x1x1xf32> to vector<2x1x64xf32>
    %838 = arith.mulf %837, %831 : vector<2x1x64xf32>
    %839 = arith.addf %835, %838 : vector<2x1x64xf32>
    %840 = vector.extract_strided_slice %784 {offsets = [0, 3, 2], sizes = [2, 1, 1], strides = [1, 1, 1]} : vector<2x4x4xf32> to vector<2x1x1xf32>
    %841 = vector.broadcast %840 : vector<2x1x1xf32> to vector<2x1x64xf32>
    %842 = arith.mulf %841, %788 : vector<2x1x64xf32>
    %843 = arith.addf %839, %842 : vector<2x1x64xf32>
    %844 = vector.extract_strided_slice %783 {offsets = [0, 2, 0], sizes = [2, 1, 64], strides = [1, 1, 1]} : vector<2x4x64xf32> to vector<2x1x64xf32>
    %845 = arith.subf %844, %843 : vector<2x1x64xf32>
    %cst_259 = arith.constant 1.000000e-16 : f32
    %846 = vector.broadcast %cst_259 : f32 to vector<2x1x64xf32>
    %847 = arith.addf %845, %846 : vector<2x1x64xf32>
    %848 = vector.extract_strided_slice %784 {offsets = [0, 2, 2], sizes = [2, 1, 1], strides = [1, 1, 1]} : vector<2x4x4xf32> to vector<2x1x1xf32>
    %cst_260 = arith.constant 1.000000e-16 : f32
    %849 = vector.broadcast %cst_260 : f32 to vector<2x1x1xf32>
    %850 = arith.addf %848, %849 : vector<2x1x1xf32>
    %851 = tpu.reciprocal %850 {approx = true} : vector<2x1x1xf32> -> vector<2x1x1xf32>
    %852 = vector.broadcast %851 : vector<2x1x1xf32> to vector<2x1x64xf32>
    %853 = arith.mulf %847, %852 : vector<2x1x64xf32>
    %c0_261 = arith.constant 0 : index
    %c2_262 = arith.constant 2 : index
    %c0_263 = arith.constant 0 : index
    %854 = vector.load %arg5[%c0_261, %c2_262, %c0_263] : memref<2x4x64xf32, #tpu.memory_space<vmem>>, vector<2x1x64xf32>
    tpu.vector_store %arg5[%c0_261, %c2_262, %c0_263], %853 {strides = array<i32>} : memref<2x4x64xf32, #tpu.memory_space<vmem>>, vector<2x1x64xf32>,
    %855 = vector.extract_strided_slice %784 {offsets = [0, 0, 3], sizes = [2, 1, 1], strides = [1, 1, 1]} : vector<2x4x4xf32> to vector<2x1x1xf32>
    %856 = vector.broadcast %855 : vector<2x1x1xf32> to vector<2x1x64xf32>
    %857 = arith.mulf %856, %809 : vector<2x1x64xf32>
    %858 = vector.extract_strided_slice %784 {offsets = [0, 1, 3], sizes = [2, 1, 1], strides = [1, 1, 1]} : vector<2x4x4xf32> to vector<2x1x1xf32>
    %859 = vector.broadcast %858 : vector<2x1x1xf32> to vector<2x1x64xf32>
    %860 = arith.mulf %859, %831 : vector<2x1x64xf32>
    %861 = arith.addf %857, %860 : vector<2x1x64xf32>
    %862 = vector.extract_strided_slice %784 {offsets = [0, 2, 3], sizes = [2, 1, 1], strides = [1, 1, 1]} : vector<2x4x4xf32> to vector<2x1x1xf32>
    %863 = vector.broadcast %862 : vector<2x1x1xf32> to vector<2x1x64xf32>
    %864 = arith.mulf %863, %853 : vector<2x1x64xf32>
    %865 = arith.addf %861, %864 : vector<2x1x64xf32>
    %866 = vector.extract_strided_slice %783 {offsets = [0, 3, 0], sizes = [2, 1, 64], strides = [1, 1, 1]} : vector<2x4x64xf32> to vector<2x1x64xf32>
    %867 = arith.subf %866, %865 : vector<2x1x64xf32>
    %cst_264 = arith.constant 1.000000e-16 : f32
    %868 = vector.broadcast %cst_264 : f32 to vector<2x1x64xf32>
    %869 = arith.addf %867, %868 : vector<2x1x64xf32>
    %870 = vector.extract_strided_slice %784 {offsets = [0, 3, 3], sizes = [2, 1, 1], strides = [1, 1, 1]} : vector<2x4x4xf32> to vector<2x1x1xf32>
    %cst_265 = arith.constant 1.000000e-16 : f32
    %871 = vector.broadcast %cst_265 : f32 to vector<2x1x1xf32>
    %872 = arith.addf %870, %871 : vector<2x1x1xf32>
    %873 = tpu.reciprocal %872 {approx = true} : vector<2x1x1xf32> -> vector<2x1x1xf32>
    %874 = vector.broadcast %873 : vector<2x1x1xf32> to vector<2x1x64xf32>
    %875 = arith.mulf %869, %874 : vector<2x1x64xf32>
    %c0_266 = arith.constant 0 : index
    %c3_267 = arith.constant 3 : index
    %c0_268 = arith.constant 0 : index
    %876 = vector.load %arg5[%c0_266, %c3_267, %c0_268] : memref<2x4x64xf32, #tpu.memory_space<vmem>>, vector<2x1x64xf32>
    tpu.vector_store %arg5[%c0_266, %c3_267, %c0_268], %875 {strides = array<i32>} : memref<2x4x64xf32, #tpu.memory_space<vmem>>, vector<2x1x64xf32>,
    %c0_269 = arith.constant 0 : index
    %c0_270 = arith.constant 0 : index
    %c0_271 = arith.constant 0 : index
    %877 = vector.load %arg5[%c0_269, %c0_270, %c0_271] : memref<2x4x64xf32, #tpu.memory_space<vmem>>, vector<2x4x64xf32>
    "tpu.trace_start"() <{level = 10 : i32, message = "grm,gmn->grn"}> : () -> ()
    %cst_272 = arith.constant dense<0.000000e+00> : vector<2x4x128xf32>
    %878 = tpu.matmul %877, %0, %cst_272 {dimension_numbers = #tpu.dot_dimension_numbers<[2], [1], [1], [2], [0, 0, 0, 1, 1, 2], [0], [0]>} : vector<2x4x64xf32>, vector<2x64x128xf32>, vector<2x4x128xf32> -> vector<2x4x128xf32>
    "tpu.trace_stop"() : () -> ()
    "tpu.trace_start"() <{level = 10 : i32, message = "grm,gsm->grs"}> : () -> ()
    %cst_273 = arith.constant dense<0.000000e+00> : vector<2x4x4xf32>
    %879 = tpu.matmul %877, %877, %cst_273 {dimension_numbers = #tpu.dot_dimension_numbers<[2], [2], [1], [1], [0, 0, 0, 1, 1, 1], [0], [0]>} : vector<2x4x64xf32>, vector<2x4x64xf32>, vector<2x4x4xf32> -> vector<2x4x4xf32>
    "tpu.trace_stop"() : () -> ()
    %c0_274 = arith.constant 0 : index
    %c0_275 = arith.constant 0 : index
    %c0_276 = arith.constant 0 : index
    %880 = vector.load %arg6[%c0_274, %c0_275, %c0_276] : memref<2x4x128xf32, #tpu.memory_space<vmem>>, vector<2x4x128xf32>
    %881 = vector.extract_strided_slice %880 {offsets = [0, 1, 0], sizes = [2, 1, 128], strides = [1, 1, 1]} : vector<2x4x128xf32> to vector<2x1x128xf32>
    %882 = vector.extract_strided_slice %880 {offsets = [0, 2, 0], sizes = [2, 1, 128], strides = [1, 1, 1]} : vector<2x4x128xf32> to vector<2x1x128xf32>
    %883 = vector.extract_strided_slice %880 {offsets = [0, 3, 0], sizes = [2, 1, 128], strides = [1, 1, 1]} : vector<2x4x128xf32> to vector<2x1x128xf32>
    %884 = vector.extract_strided_slice %879 {offsets = [0, 1, 0], sizes = [2, 1, 1], strides = [1, 1, 1]} : vector<2x4x4xf32> to vector<2x1x1xf32>
    %885 = vector.broadcast %884 : vector<2x1x1xf32> to vector<2x1x128xf32>
    %886 = arith.mulf %885, %881 : vector<2x1x128xf32>
    %887 = vector.extract_strided_slice %879 {offsets = [0, 2, 0], sizes = [2, 1, 1], strides = [1, 1, 1]} : vector<2x4x4xf32> to vector<2x1x1xf32>
    %888 = vector.broadcast %887 : vector<2x1x1xf32> to vector<2x1x128xf32>
    %889 = arith.mulf %888, %882 : vector<2x1x128xf32>
    %890 = arith.addf %886, %889 : vector<2x1x128xf32>
    %891 = vector.extract_strided_slice %879 {offsets = [0, 3, 0], sizes = [2, 1, 1], strides = [1, 1, 1]} : vector<2x4x4xf32> to vector<2x1x1xf32>
    %892 = vector.broadcast %891 : vector<2x1x1xf32> to vector<2x1x128xf32>
    %893 = arith.mulf %892, %883 : vector<2x1x128xf32>
    %894 = arith.addf %890, %893 : vector<2x1x128xf32>
    %895 = vector.extract_strided_slice %878 {offsets = [0, 0, 0], sizes = [2, 1, 128], strides = [1, 1, 1]} : vector<2x4x128xf32> to vector<2x1x128xf32>
    %896 = arith.subf %895, %894 : vector<2x1x128xf32>
    %cst_277 = arith.constant 1.000000e-16 : f32
    %897 = vector.broadcast %cst_277 : f32 to vector<2x1x128xf32>
    %898 = arith.addf %896, %897 : vector<2x1x128xf32>
    %899 = vector.extract_strided_slice %879 {offsets = [0, 0, 0], sizes = [2, 1, 1], strides = [1, 1, 1]} : vector<2x4x4xf32> to vector<2x1x1xf32>
    %cst_278 = arith.constant 1.000000e-16 : f32
    %900 = vector.broadcast %cst_278 : f32 to vector<2x1x1xf32>
    %901 = arith.addf %899, %900 : vector<2x1x1xf32>
    %902 = tpu.reciprocal %901 {approx = true} : vector<2x1x1xf32> -> vector<2x1x1xf32>
    %903 = vector.broadcast %902 : vector<2x1x1xf32> to vector<2x1x128xf32>
    %904 = arith.mulf %898, %903 : vector<2x1x128xf32>
    %c0_279 = arith.constant 0 : index
    %c0_280 = arith.constant 0 : index
    %c0_281 = arith.constant 0 : index
    %905 = vector.load %arg6[%c0_279, %c0_280, %c0_281] : memref<2x4x128xf32, #tpu.memory_space<vmem>>, vector<2x1x128xf32>
    tpu.vector_store %arg6[%c0_279, %c0_280, %c0_281], %904 {strides = array<i32>} : memref<2x4x128xf32, #tpu.memory_space<vmem>>, vector<2x1x128xf32>,
    %906 = vector.extract_strided_slice %879 {offsets = [0, 0, 1], sizes = [2, 1, 1], strides = [1, 1, 1]} : vector<2x4x4xf32> to vector<2x1x1xf32>
    %907 = vector.broadcast %906 : vector<2x1x1xf32> to vector<2x1x128xf32>
    %908 = arith.mulf %907, %904 : vector<2x1x128xf32>
    %909 = vector.extract_strided_slice %879 {offsets = [0, 2, 1], sizes = [2, 1, 1], strides = [1, 1, 1]} : vector<2x4x4xf32> to vector<2x1x1xf32>
    %910 = vector.broadcast %909 : vector<2x1x1xf32> to vector<2x1x128xf32>
    %911 = arith.mulf %910, %882 : vector<2x1x128xf32>
    %912 = arith.addf %908, %911 : vector<2x1x128xf32>
    %913 = vector.extract_strided_slice %879 {offsets = [0, 3, 1], sizes = [2, 1, 1], strides = [1, 1, 1]} : vector<2x4x4xf32> to vector<2x1x1xf32>
    %914 = vector.broadcast %913 : vector<2x1x1xf32> to vector<2x1x128xf32>
    %915 = arith.mulf %914, %883 : vector<2x1x128xf32>
    %916 = arith.addf %912, %915 : vector<2x1x128xf32>
    %917 = vector.extract_strided_slice %878 {offsets = [0, 1, 0], sizes = [2, 1, 128], strides = [1, 1, 1]} : vector<2x4x128xf32> to vector<2x1x128xf32>
    %918 = arith.subf %917, %916 : vector<2x1x128xf32>
    %cst_282 = arith.constant 1.000000e-16 : f32
    %919 = vector.broadcast %cst_282 : f32 to vector<2x1x128xf32>
    %920 = arith.addf %918, %919 : vector<2x1x128xf32>
    %921 = vector.extract_strided_slice %879 {offsets = [0, 1, 1], sizes = [2, 1, 1], strides = [1, 1, 1]} : vector<2x4x4xf32> to vector<2x1x1xf32>
    %cst_283 = arith.constant 1.000000e-16 : f32
    %922 = vector.broadcast %cst_283 : f32 to vector<2x1x1xf32>
    %923 = arith.addf %921, %922 : vector<2x1x1xf32>
    %924 = tpu.reciprocal %923 {approx = true} : vector<2x1x1xf32> -> vector<2x1x1xf32>
    %925 = vector.broadcast %924 : vector<2x1x1xf32> to vector<2x1x128xf32>
    %926 = arith.mulf %920, %925 : vector<2x1x128xf32>
    %c0_284 = arith.constant 0 : index
    %c1_285 = arith.constant 1 : index
    %c0_286 = arith.constant 0 : index
    %927 = vector.load %arg6[%c0_284, %c1_285, %c0_286] : memref<2x4x128xf32, #tpu.memory_space<vmem>>, vector<2x1x128xf32>
    tpu.vector_store %arg6[%c0_284, %c1_285, %c0_286], %926 {strides = array<i32>} : memref<2x4x128xf32, #tpu.memory_space<vmem>>, vector<2x1x128xf32>,
    %928 = vector.extract_strided_slice %879 {offsets = [0, 0, 2], sizes = [2, 1, 1], strides = [1, 1, 1]} : vector<2x4x4xf32> to vector<2x1x1xf32>
    %929 = vector.broadcast %928 : vector<2x1x1xf32> to vector<2x1x128xf32>
    %930 = arith.mulf %929, %904 : vector<2x1x128xf32>
    %931 = vector.extract_strided_slice %879 {offsets = [0, 1, 2], sizes = [2, 1, 1], strides = [1, 1, 1]} : vector<2x4x4xf32> to vector<2x1x1xf32>
    %932 = vector.broadcast %931 : vector<2x1x1xf32> to vector<2x1x128xf32>
    %933 = arith.mulf %932, %926 : vector<2x1x128xf32>
    %934 = arith.addf %930, %933 : vector<2x1x128xf32>
    %935 = vector.extract_strided_slice %879 {offsets = [0, 3, 2], sizes = [2, 1, 1], strides = [1, 1, 1]} : vector<2x4x4xf32> to vector<2x1x1xf32>
    %936 = vector.broadcast %935 : vector<2x1x1xf32> to vector<2x1x128xf32>
    %937 = arith.mulf %936, %883 : vector<2x1x128xf32>
    %938 = arith.addf %934, %937 : vector<2x1x128xf32>
    %939 = vector.extract_strided_slice %878 {offsets = [0, 2, 0], sizes = [2, 1, 128], strides = [1, 1, 1]} : vector<2x4x128xf32> to vector<2x1x128xf32>
    %940 = arith.subf %939, %938 : vector<2x1x128xf32>
    %cst_287 = arith.constant 1.000000e-16 : f32
    %941 = vector.broadcast %cst_287 : f32 to vector<2x1x128xf32>
    %942 = arith.addf %940, %941 : vector<2x1x128xf32>
    %943 = vector.extract_strided_slice %879 {offsets = [0, 2, 2], sizes = [2, 1, 1], strides = [1, 1, 1]} : vector<2x4x4xf32> to vector<2x1x1xf32>
    %cst_288 = arith.constant 1.000000e-16 : f32
    %944 = vector.broadcast %cst_288 : f32 to vector<2x1x1xf32>
    %945 = arith.addf %943, %944 : vector<2x1x1xf32>
    %946 = tpu.reciprocal %945 {approx = true} : vector<2x1x1xf32> -> vector<2x1x1xf32>
    %947 = vector.broadcast %946 : vector<2x1x1xf32> to vector<2x1x128xf32>
    %948 = arith.mulf %942, %947 : vector<2x1x128xf32>
    %c0_289 = arith.constant 0 : index
    %c2_290 = arith.constant 2 : index
    %c0_291 = arith.constant 0 : index
    %949 = vector.load %arg6[%c0_289, %c2_290, %c0_291] : memref<2x4x128xf32, #tpu.memory_space<vmem>>, vector<2x1x128xf32>
    tpu.vector_store %arg6[%c0_289, %c2_290, %c0_291], %948 {strides = array<i32>} : memref<2x4x128xf32, #tpu.memory_space<vmem>>, vector<2x1x128xf32>,
    %950 = vector.extract_strided_slice %879 {offsets = [0, 0, 3], sizes = [2, 1, 1], strides = [1, 1, 1]} : vector<2x4x4xf32> to vector<2x1x1xf32>
    %951 = vector.broadcast %950 : vector<2x1x1xf32> to vector<2x1x128xf32>
    %952 = arith.mulf %951, %904 : vector<2x1x128xf32>
    %953 = vector.extract_strided_slice %879 {offsets = [0, 1, 3], sizes = [2, 1, 1], strides = [1, 1, 1]} : vector<2x4x4xf32> to vector<2x1x1xf32>
    %954 = vector.broadcast %953 : vector<2x1x1xf32> to vector<2x1x128xf32>
    %955 = arith.mulf %954, %926 : vector<2x1x128xf32>
    %956 = arith.addf %952, %955 : vector<2x1x128xf32>
    %957 = vector.extract_strided_slice %879 {offsets = [0, 2, 3], sizes = [2, 1, 1], strides = [1, 1, 1]} : vector<2x4x4xf32> to vector<2x1x1xf32>
    %958 = vector.broadcast %957 : vector<2x1x1xf32> to vector<2x1x128xf32>
    %959 = arith.mulf %958, %948 : vector<2x1x128xf32>
    %960 = arith.addf %956, %959 : vector<2x1x128xf32>
    %961 = vector.extract_strided_slice %878 {offsets = [0, 3, 0], sizes = [2, 1, 128], strides = [1, 1, 1]} : vector<2x4x128xf32> to vector<2x1x128xf32>
    %962 = arith.subf %961, %960 : vector<2x1x128xf32>
    %cst_292 = arith.constant 1.000000e-16 : f32
    %963 = vector.broadcast %cst_292 : f32 to vector<2x1x128xf32>
    %964 = arith.addf %962, %963 : vector<2x1x128xf32>
    %965 = vector.extract_strided_slice %879 {offsets = [0, 3, 3], sizes = [2, 1, 1], strides = [1, 1, 1]} : vector<2x4x4xf32> to vector<2x1x1xf32>
    %cst_293 = arith.constant 1.000000e-16 : f32
    %966 = vector.broadcast %cst_293 : f32 to vector<2x1x1xf32>
    %967 = arith.addf %965, %966 : vector<2x1x1xf32>
    %968 = tpu.reciprocal %967 {approx = true} : vector<2x1x1xf32> -> vector<2x1x1xf32>
    %969 = vector.broadcast %968 : vector<2x1x1xf32> to vector<2x1x128xf32>
    %970 = arith.mulf %964, %969 : vector<2x1x128xf32>
    %c0_294 = arith.constant 0 : index
    %c3_295 = arith.constant 3 : index
    %c0_296 = arith.constant 0 : index
    %971 = vector.load %arg6[%c0_294, %c3_295, %c0_296] : memref<2x4x128xf32, #tpu.memory_space<vmem>>, vector<2x1x128xf32>
    tpu.vector_store %arg6[%c0_294, %c3_295, %c0_296], %970 {strides = array<i32>} : memref<2x4x128xf32, #tpu.memory_space<vmem>>, vector<2x1x128xf32>,
    %c0_297 = arith.constant 0 : index
    %c0_298 = arith.constant 0 : index
    %c0_299 = arith.constant 0 : index
    %972 = vector.load %arg5[%c0_297, %c0_298, %c0_299] : memref<2x4x64xf32, #tpu.memory_space<vmem>>, vector<1x4x64xf32>
    %973 = vector.shape_cast %972 : vector<1x4x64xf32> to vector<4x64xf32>
    %974 = tpu.transpose %973, [1, 0] : vector<4x64xf32> -> vector<64x4xf32>
    %c0_300 = arith.constant 0 : index
    %c0_301 = arith.constant 0 : index
    %c0_302 = arith.constant 0 : index
    %975 = vector.load %arg6[%c0_300, %c0_301, %c0_302] : memref<2x4x128xf32, #tpu.memory_space<vmem>>, vector<1x4x128xf32>
    %976 = vector.shape_cast %975 : vector<1x4x128xf32> to vector<4x128xf32>
    %cst_303 = arith.constant dense<0.000000e+00> : vector<64x128xf32>
    %977 = tpu.matmul %974, %976, %cst_303 {dimension_numbers = #tpu.dot_dimension_numbers<[1], [0], [0], [1], [0, 0, 1, 1], [], []>} : vector<64x4xf32>, vector<4x128xf32>, vector<64x128xf32> -> vector<64x128xf32>
    %c0_304 = arith.constant 0 : index
    %c0_305 = arith.constant 0 : index
    %c0_306 = arith.constant 0 : index
    %978 = vector.load %arg4[%c0_304, %c0_305, %c0_306] : memref<2x64x128xf32, #tpu.memory_space<vmem>>, vector<1x64x128xf32>
    %979 = vector.shape_cast %978 : vector<1x64x128xf32> to vector<64x128xf32>
    %980 = vector.shape_cast %977 : vector<64x128xf32> to vector<1x64x128xf32>
    tpu.vector_store %arg4[%c0_304, %c0_305, %c0_306], %980 {strides = array<i32>} : memref<2x64x128xf32, #tpu.memory_space<vmem>>, vector<1x64x128xf32>,
    %c1_307 = arith.constant 1 : index
    %c0_308 = arith.constant 0 : index
    %c0_309 = arith.constant 0 : index
    %981 = vector.load %arg5[%c1_307, %c0_308, %c0_309] : memref<2x4x64xf32, #tpu.memory_space<vmem>>, vector<1x4x64xf32>
    %982 = vector.shape_cast %981 : vector<1x4x64xf32> to vector<4x64xf32>
    %983 = tpu.transpose %982, [1, 0] : vector<4x64xf32> -> vector<64x4xf32>
    %c1_310 = arith.constant 1 : index
    %c0_311 = arith.constant 0 : index
    %c0_312 = arith.constant 0 : index
    %984 = vector.load %arg6[%c1_310, %c0_311, %c0_312] : memref<2x4x128xf32, #tpu.memory_space<vmem>>, vector<1x4x128xf32>
    %985 = vector.shape_cast %984 : vector<1x4x128xf32> to vector<4x128xf32>
    %cst_313 = arith.constant dense<0.000000e+00> : vector<64x128xf32>
    %986 = tpu.matmul %983, %985, %cst_313 {dimension_numbers = #tpu.dot_dimension_numbers<[1], [0], [0], [1], [0, 0, 1, 1], [], []>} : vector<64x4xf32>, vector<4x128xf32>, vector<64x128xf32> -> vector<64x128xf32>
    %c1_314 = arith.constant 1 : index
    %c0_315 = arith.constant 0 : index
    %c0_316 = arith.constant 0 : index
    %987 = vector.load %arg4[%c1_314, %c0_315, %c0_316] : memref<2x64x128xf32, #tpu.memory_space<vmem>>, vector<1x64x128xf32>
    %988 = vector.shape_cast %987 : vector<1x64x128xf32> to vector<64x128xf32>
    %989 = vector.shape_cast %986 : vector<64x128xf32> to vector<1x64x128xf32>
    tpu.vector_store %arg4[%c1_314, %c0_315, %c0_316], %989 {strides = array<i32>} : memref<2x64x128xf32, #tpu.memory_space<vmem>>, vector<1x64x128xf32>,
    return
  }
  func.func @transform_0(%arg0: i32) -> (i32, i32, i32) {
    %c0_i32 = arith.constant 0 : i32
    %c0_i32_0 = arith.constant 0 : i32
    %c0_i32_1 = arith.constant 0 : i32
    return %arg0, %c0_i32, %c0_i32_0 : i32, i32, i32
  }
  func.func @transform_1(%arg0: i32) -> (i32, i32) {
    %c0_i32 = arith.constant 0 : i32
    %c0_i32_0 = arith.constant 0 : i32
    %c0_i32_1 = arith.constant 0 : i32
    return %c0_i32, %c0_i32_0 : i32, i32
  }
  func.func @transform_2(%arg0: i32) -> (i32, i32) {
    %c0_i32 = arith.constant 0 : i32
    %c0_i32_0 = arith.constant 0 : i32
    %c0_i32_1 = arith.constant 0 : i32
    return %c0_i32, %c0_i32_0 : i32, i32
  }
  func.func @transform_3(%arg0: i32) -> (i32, i32, i32) {
    %c0_i32 = arith.constant 0 : i32
    %c0_i32_0 = arith.constant 0 : i32
    %c0_i32_1 = arith.constant 0 : i32
    return %arg0, %c0_i32, %c0_i32_0 : i32, i32, i32
  }
}

</mosaic_0001>

<bundles_post_ra>
// kernel: tpu_custom_call.1
= control target key start
LH: loop header
LB: loop body
LE: loop exit
PB: predicated region body
PF: predicated region fallthrough
CT: control target
= control target key end

     0   :  { %8 = vsyncpa [#allocation6], 0  ;;  %s8074_s0 = inlined_call_operand.hbm [shape: f32[2,64,128], index: 0, kind: input, shape index: {}]   ;;  %s8075_s1 = inlined_call_operand.hbm [shape: f32[4,64], index: 1, kind: input, shape index: {}]   ;;  %s8076_s2 = inlined_call_operand.hbm [shape: f32[4,128], index: 2, kind: input, shape index: {}]   ;;  %s8077_s3 = inlined_call_operand.hbm [shape: f32[2,64,128], index: 3, kind: output, shape index: {}]  }
   0x1   :  { %9 = vsyncpa [#allocation9], 0 }
   0x2   :  { %10 = vsyncpa [#allocation7], 0  ;;  %s6858_s12 = smov [#allocation8]   ;;  %s6859_s14 = smov [#allocation5]  }
   0x3   :  { %s29_s13 = sshll.u32 %s6858_s12, 4  ;;  %s16_s15 = sshll.u32 %s6859_s14, 4  ;;  %s30_s13 = int_to_ptr.vmem [resolvable:$true] %s29_s13  ;;  %s17_s15 = int_to_ptr.vmem [resolvable:$true] %s16_s15 }
   0x4   :  { %s6780_s16 = scalar_lea.vmem %s30_s13, 64  ;;  %p6785_p1 = scmp.lt.s32.totalorder %s30_s13, %s30_s13 }
   0x5   :  { %p6781_p0 = scmp.ne.s32.totalorder %s30_s13, %s6780_s16  ;;  %p6786_p2 = scmp.lt.s32.totalorder %s6780_s16, %s6780_s16 }
   0x7   :  { %p6787_p3 = por %p6786_p2, %p6785_p1 }
   0x9   :  { %p6788_p4 = pnand %p6787_p3, %p6781_p0 }
   0xb   :  { %6791 = shalt.err (!%p6788_p4)
}
   0xc   :  { %32 = dma.hbm_to_vmem [thread:$0]  %s8075_s1, 64, %s30_s13, [#allocation9]  }
   0xd   :  { %s6800_s19 = scalar_lea.vmem %s17_s15, 2048  ;;  %p6805_p6 = scmp.lt.s32.totalorder %s17_s15, %s17_s15 }
   0xe   :  { %p6801_p5 = scmp.ne.s32.totalorder %s17_s15, %s6800_s19  ;;  %p6806_p7 = scmp.lt.s32.totalorder %s6800_s19, %s6800_s19 }
  0x10   :  { %p6807_p8 = por %p6806_p7, %p6805_p6 }
  0x12   :  { %p6808_p9 = pnand %p6807_p8, %p6801_p5 }
  0x14   :  { %6811 = shalt.err (!%p6808_p9)
}
  0x15   :  { %s6860_s20 = smov 128   ;;  %s6861_s21 = smov 8  }
  0x16   :  { %22 = dma.hbm_to_vmem [thread:$0]  %s8074_s0, 2048, %s17_s15, [#allocation6], %s6860_s20, %s6860_s20, %s6861_s21  }
  0x17   :  { %s6862_s24 = smov [#allocation10]  }
  0x18   :  { %s39_s25 = sshll.u32 %s6862_s24, 4  ;;  %s40_s25 = int_to_ptr.vmem [resolvable:$true] %s39_s25 }
  0x19   :  { %s6820_s1 = scalar_lea.vmem %s40_s25, 64  ;;  %p6825_p11 = scmp.lt.s32.totalorder %s40_s25, %s40_s25 }
  0x1a   :  { %p6821_p10 = scmp.ne.s32.totalorder %s40_s25, %s6820_s1  ;;  %p6826_p12 = scmp.lt.s32.totalorder %s6820_s1, %s6820_s1 }
  0x1c   :  { %p6827_p13 = por %p6826_p12, %p6825_p11 }
  0x1e   :  { %p6828_p0 = pnand %p6827_p13, %p6821_p10 }
  0x20   :  { %6831 = shalt.err (!%p6828_p0)
}
  0x21   :  { %42 = dma.hbm_to_vmem [thread:$0]  %s8076_s2, 64, %s40_s25, [#allocation9]  }
  0x22   :  { %6852 = dma.done.wait [#allocation6], 2048  }
  0x23   :  { %6853 = vsyncadd [#allocation6], 4294965248 }
  0x24   :  { %6854 = dma.done.wait [#allocation9], 128  }
  0x25   :  { %6855 = vsyncadd [#allocation9], 4294967168  ;;  %v6902_v0 = vld [vmem:[#allocation5 + $0x40] sm:$0xff]  ;;  %v6908_v2 = vld [vmem:[#allocation5 + $0x48] sm:$0xff]  ;;  %v8086_v16 = vmov 0.0   ;;  %vm6864_vm0 = vmmov 0  }
  0x26   :  { %v6904_v1 = vld [vmem:[#allocation5] sm:$0xff]  ;;  %117 = vxpose.xlu1.b32.start [1/8] (short) %v6902_v0, 128  ;;  %v6910_v3 = vld [vmem:[#allocation5 + $0x8] sm:$0xff]  ;;  %v6914_v4 = vld [vmem:[#allocation5 + $0x50] sm:$0xff]  ;;  %5876 = vmatprep.subr.mxu0 %v8086_v16  ;;  %vm100_vm1 = vcmask 523264   ;;  %vm199_vm2 = vcmask 519168   ;;  %vm541_vm3 = vcmask 516096  }
  0x27   :  { %68 = vxpose.xlu0.b32.start [1/8] (short) %v6904_v1, 128  ;;  %v6916_v5 = vld [vmem:[#allocation5 + $0x10] sm:$0xff]  ;;  %v6920_v6 = vld [vmem:[#allocation5 + $0x58] sm:$0xff]  ;;  %v6926_v8 = vld [vmem:[#allocation5 + $0x60] sm:$0xff]  ;;  %5911 = vmatprep.subr.mxu1 %v8086_v16  ;;  %vm590_vm4 = vcmask 517121   ;;  %vm643_vm5 = vcmask 518146   ;;  %vm696_vm6 = vcmask 519171  }
  0x28   :  { %v6922_v7 = vld [vmem:[#allocation5 + $0x18] sm:$0xff]  ;;  %v6928_v9 = vld [vmem:[#allocation5 + $0x20] sm:$0xff]  ;;  %v6932_v10 = vld [vmem:[#allocation5 + $0x68] sm:$0xff]  ;;  %5908 = vmatprep.mubr.msk.f32.mxu0 %vm6864_vm0, %v8086_v16  ;;  %5943 = vmatprep.mubr.msk.f32.mxu1 %vm6864_vm0, %v8086_v16  ;;  %vm5173_vm7 = vcmask 31744   ;;  %vm5198_vm8 = vcmask 1043456   ;;  %s6869_s0 = smov [#allocation11]  }
  0x29   :  { %v6934_v11 = vld [vmem:[#allocation5 + $0x28] sm:$0xff]  ;;  %v6938_v12 = vld [vmem:[#allocation5 + $0x70] sm:$0xff]  ;;  %v6944_v14 = vld [vmem:[#allocation5 + $0x78] sm:$0xff]  ;;  %s5497_s2 = sshll.u32 %s6869_s0, 4  ;;  %s5498_s2 = int_to_ptr.vmem [resolvable:$true] %s5497_s2 }
  0x2a   :  { %118 = vxpose.xlu1.b32.cont [2/8] (short) %v6908_v2, 128  ;;  %v6940_v13 = vld [vmem:[#allocation5 + $0x30] sm:$0xff]  ;;  %v6946_v15 = vld [vmem:[#allocation5 + $0x38] sm:$0xff]  ;;  %v202_v17 = vld [vmem:[#allocation10] sm:$0xf]  ;;  %s6832_s28 = scalar_lea.vmem %s5498_s2, 2048  ;;  %p6837_p2 = scmp.lt.s32.totalorder %s5498_s2, %s5498_s2 }
  0x2b   :  { %69 = vxpose.xlu0.b32.cont [2/8] (short) %v6910_v3, 128  ;;  %203 = vst [vmem:[#allocation3] sm:$0xf] %v202_v17  ;;  %204 = vst [vmem:[#allocation3 + $0x4] sm:$0xf] %v202_v17  ;;  %p6833_p1 = scmp.ne.s32.totalorder %s5498_s2, %s6832_s28  ;;  %p6838_p3 = scmp.lt.s32.totalorder %s6832_s28, %s6832_s28 }
  0x2d   :  { %p6839_p4 = por %p6838_p3, %p6837_p2 }
  0x2e   :  { %119 = vxpose.xlu1.b32.cont [3/8] (short) %v6914_v4, 128 }
  0x2f   :  { %70 = vxpose.xlu0.b32.cont [3/8] (short) %v6916_v5, 128  ;;  %p6840_p5 = pnand %p6839_p4, %p6833_p1 }
  0x32   :  { %120 = vxpose.xlu1.b32.cont [4/8] (short) %v6920_v6, 128 }
  0x33   :  { %71 = vxpose.xlu0.b32.cont [4/8] (short) %v6922_v7, 128 }
  0x36   :  { %121 = vxpose.xlu1.b32.cont [5/8] (short) %v6926_v8, 128 }
  0x37   :  { %72 = vxpose.xlu0.b32.cont [5/8] (short) %v6928_v9, 128 }
  0x3a   :  { %122 = vxpose.xlu1.b32.cont [6/8] (short) %v6932_v10, 128 }
  0x3b   :  { %73 = vxpose.xlu0.b32.cont [6/8] (short) %v6934_v11, 128 }
  0x3e   :  { %123 = vxpose.xlu1.b32.cont [7/8] (short) %v6938_v12, 128 }
  0x3f   :  { %74 = vxpose.xlu0.b32.cont [7/8] (short) %v6940_v13, 128 }
  0x42   :  { %124 = vxpose.xlu1.b32.end [8/8] (short) %v6944_v14, 128 }
  0x43   :  { %75 = vxpose.xlu0.b32.end [8/8] (short) %v6946_v15, 128 }
  0xa2   :  { %v133_v18 = vpop.trf.xlu1 }
  0xa3   :  { %v84_v19 = vpop.trf.xlu0  ;;  %150 = vst.msk [vmem:[#allocation4 + $0x80] sm:$0xff] %vm100_vm1, %v133_v18 }
  0xa4   :  { %101 = vst.msk [vmem:[#allocation4] sm:$0xff] %vm100_vm1, %v84_v19 }
  0xa6   :  { %v134_v20 = vpop.trf.xlu1 }
  0xa7   :  { %v85_v21 = vpop.trf.xlu0  ;;  %151 = vst.msk [vmem:[#allocation4 + $0x88] sm:$0xff] %vm100_vm1, %v134_v20 }
  0xa8   :  { %102 = vst.msk [vmem:[#allocation4 + $0x8] sm:$0xff] %vm100_vm1, %v85_v21 }
  0xaa   :  { %v135_v22 = vpop.trf.xlu1 }
  0xab   :  { %v86_v23 = vpop.trf.xlu0  ;;  %152 = vst.msk [vmem:[#allocation4 + $0x90] sm:$0xff] %vm100_vm1, %v135_v22 }
  0xac   :  { %103 = vst.msk [vmem:[#allocation4 + $0x10] sm:$0xff] %vm100_vm1, %v86_v23 }
  0xae   :  { %v136_v24 = vpop.trf.xlu1 }
  0xaf   :  { %v87_v25 = vpop.trf.xlu0  ;;  %153 = vst.msk [vmem:[#allocation4 + $0x98] sm:$0xff] %vm100_vm1, %v136_v24 }
  0xb0   :  { %104 = vst.msk [vmem:[#allocation4 + $0x18] sm:$0xff] %vm100_vm1, %v87_v25 }
  0xb2   :  { %v137_v26 = vpop.trf.xlu1 }
  0xb3   :  { %v88_v27 = vpop.trf.xlu0  ;;  %154 = vst.msk [vmem:[#allocation4 + $0xa0] sm:$0xff] %vm100_vm1, %v137_v26 }
  0xb4   :  { %105 = vst.msk [vmem:[#allocation4 + $0x20] sm:$0xff] %vm100_vm1, %v88_v27 }
  0xb6   :  { %v138_v28 = vpop.trf.xlu1 }
  0xb7   :  { %v89_v29 = vpop.trf.xlu0  ;;  %155 = vst.msk [vmem:[#allocation4 + $0xa8] sm:$0xff] %vm100_vm1, %v138_v28  ;;  %v7084_v27 = vld [vmem:[#allocation4 + $0x18] sm:$0xff] }
  0xb8   :  { %106 = vst.msk [vmem:[#allocation4 + $0x28] sm:$0xff] %vm100_vm1, %v89_v29  ;;  %v7086_v28 = vld [vmem:[#allocation4 + $0x98] sm:$0xff]  ;;  %v7092_v29 = vld [vmem:[#allocation4 + $0x10] sm:$0xff] }
  0xba   :  { %v139_v30 = vpop.trf.xlu1  ;;  %v7078_v26 = vld [vmem:[#allocation4 + $0xa0] sm:$0xff] }
  0xbb   :  { %v90_v31 = vpop.trf.xlu0  ;;  %156 = vst.msk [vmem:[#allocation4 + $0xb0] sm:$0xff] %vm100_vm1, %v139_v30  ;;  %v7076_v25 = vld [vmem:[#allocation4 + $0x20] sm:$0xff]  ;;  %v7094_v30 = vld [vmem:[#allocation4 + $0x90] sm:$0xff] }
  0xbc   :  { %107 = vst.msk [vmem:[#allocation4 + $0x30] sm:$0xff] %vm100_vm1, %v90_v31  ;;  %v7100_v31 = vld [vmem:[#allocation4 + $0x8] sm:$0xff] }
  0xbe   :  { %v140_v32 = vpop.trf.xlu1  ;;  %v7070_v24 = vld [vmem:[#allocation4 + $0xa8] sm:$0xff] }
  0xbf   :  { %v91_v33 = vpop.trf.xlu0  ;;  %157 = vst.msk [vmem:[#allocation4 + $0xb8] sm:$0xff] %vm100_vm1, %v140_v32  ;;  %v7068_v23 = vld [vmem:[#allocation4 + $0x28] sm:$0xff] }
  0xc0   :  { %108 = vst.msk [vmem:[#allocation4 + $0x38] sm:$0xff] %vm100_vm1, %v91_v33  ;;  %v7102_v32 = vld [vmem:[#allocation4 + $0x88] sm:$0xff]  ;;  %v205_v33 = vld [vmem:[#allocation3] sm:$0xf] }
  0xc2   :  { %v141_v34 = vpop.trf.xlu1  ;;  %v7062_v22 = vld [vmem:[#allocation4 + $0xb0] sm:$0xff] }
  0xc3   :  { %v92_v35 = vpop.trf.xlu0  ;;  %158 = vst.msk [vmem:[#allocation4 + $0xc0] sm:$0xff] %vm100_vm1, %v141_v34  ;;  %v7060_v21 = vld [vmem:[#allocation4 + $0x30] sm:$0xff]  ;;  %v206_v34 = vld [vmem:[#allocation3 + $0x4] sm:$0xf] }
  0xc4   :  { %109 = vst.msk [vmem:[#allocation4 + $0x40] sm:$0xff] %vm100_vm1, %v92_v35  ;;  %v7108_v35 = vld [vmem:[#allocation4] sm:$0xff] }
  0xc6   :  { %v142_v36 = vpop.trf.xlu1  ;;  %v7054_v20 = vld [vmem:[#allocation4 + $0xb8] sm:$0xff] }
  0xc7   :  { %v93_v37 = vpop.trf.xlu0  ;;  %159 = vst.msk [vmem:[#allocation4 + $0xc8] sm:$0xff] %vm100_vm1, %v142_v36  ;;  %v7052_v19 = vld [vmem:[#allocation4 + $0x38] sm:$0xff]  ;;  %v7110_v36 = vld [vmem:[#allocation4 + $0x80] sm:$0xff] }
  0xc8   :  { %110 = vst.msk [vmem:[#allocation4 + $0x48] sm:$0xff] %vm100_vm1, %v93_v37  ;;  %v8080_v37 = vmov 3  }
  0xca   :  { %v143_v38 = vpop.trf.xlu1  ;;  %v7046_v18 = vld [vmem:[#allocation4 + $0xc0] sm:$0xff] }
  0xcb   :  { %v94_v39 = vpop.trf.xlu0  ;;  %160 = vst.msk [vmem:[#allocation4 + $0xd0] sm:$0xff] %vm100_vm1, %v143_v38  ;;  %v7044_v17 = vld [vmem:[#allocation4 + $0x40] sm:$0xff] }
  0xcc   :  { %111 = vst.msk [vmem:[#allocation4 + $0x50] sm:$0xff] %vm100_vm1, %v94_v39 }
  0xce   :  { %v144_v40 = vpop.trf.xlu1  ;;  %v7038_v63 = vld [vmem:[#allocation4 + $0xc8] sm:$0xff] }
  0xcf   :  { %v95_v41 = vpop.trf.xlu0  ;;  %161 = vst.msk [vmem:[#allocation4 + $0xd8] sm:$0xff] %vm100_vm1, %v144_v40  ;;  %v7036_v62 = vld [vmem:[#allocation4 + $0x48] sm:$0xff] }
  0xd0   :  { %112 = vst.msk [vmem:[#allocation4 + $0x58] sm:$0xff] %vm100_vm1, %v95_v41 }
  0xd2   :  { %v145_v42 = vpop.trf.xlu1  ;;  %v7030_v61 = vld [vmem:[#allocation4 + $0xd0] sm:$0xff] }
  0xd3   :  { %v96_v43 = vpop.trf.xlu0  ;;  %162 = vst.msk [vmem:[#allocation4 + $0xe0] sm:$0xff] %vm100_vm1, %v145_v42  ;;  %v7028_v60 = vld [vmem:[#allocation4 + $0x50] sm:$0xff] }
  0xd4   :  { %113 = vst.msk [vmem:[#allocation4 + $0x60] sm:$0xff] %vm100_vm1, %v96_v43 }
  0xd6   :  { %v146_v44 = vpop.trf.xlu1  ;;  %v7022_v59 = vld [vmem:[#allocation4 + $0xd8] sm:$0xff] }
  0xd7   :  { %v97_v45 = vpop.trf.xlu0  ;;  %163 = vst.msk [vmem:[#allocation4 + $0xe8] sm:$0xff] %vm100_vm1, %v146_v44  ;;  %v7020_v58 = vld [vmem:[#allocation4 + $0x58] sm:$0xff] }
  0xd8   :  { %114 = vst.msk [vmem:[#allocation4 + $0x68] sm:$0xff] %vm100_vm1, %v97_v45 }
  0xda   :  { %v147_v46 = vpop.trf.xlu1  ;;  %v7014_v57 = vld [vmem:[#allocation4 + $0xe0] sm:$0xff] }
  0xdb   :  { %v98_v47 = vpop.trf.xlu0  ;;  %164 = vst.msk [vmem:[#allocation4 + $0xf0] sm:$0xff] %vm100_vm1, %v147_v46  ;;  %v7012_v56 = vld [vmem:[#allocation4 + $0x60] sm:$0xff] }
  0xdc   :  { %115 = vst.msk [vmem:[#allocation4 + $0x70] sm:$0xff] %vm100_vm1, %v98_v47 }
  0xde   :  { %v148_v48 = vpop.trf.xlu1  ;;  %v7006_v55 = vld [vmem:[#allocation4 + $0xe8] sm:$0xff] }
  0xdf   :  { %v99_v49 = vpop.trf.xlu0  ;;  %165 = vst.msk [vmem:[#allocation4 + $0xf8] sm:$0xff] %vm100_vm1, %v148_v48  ;;  %v7004_v54 = vld [vmem:[#allocation4 + $0x68] sm:$0xff] }
  0xe0   :  { %116 = vst.msk [vmem:[#allocation4 + $0x78] sm:$0xff] %vm100_vm1, %v99_v49 }
  0xe2   :  { %v6998_v53 = vld [vmem:[#allocation4 + $0xf0] sm:$0xff] }
  0xe3   :  { %v6996_v52 = vld [vmem:[#allocation4 + $0x70] sm:$0xff] }
  0xe6   :  { %v6990_v51 = vld [vmem:[#allocation4 + $0xf8] sm:$0xff] }
  0xe7   :  { %v6988_v50 = vld [vmem:[#allocation4 + $0x78] sm:$0xff]  ;;  %5912 = vmatpush3.msra.mxu1 %v6990_v51 }
  0xe8   :  { %5877 = vmatpush3.msra.mxu0 %v6988_v50  ;;  %5913 = vmatprep.subr.mxu1 %v8086_v16 }
  0xe9   :  { %5878 = vmatprep.subr.mxu0 %v8086_v16  ;;  %5914 = vmatpush3.msra.mxu1 %v6998_v53 }
  0xea   :  { %5879 = vmatpush3.msra.mxu0 %v6996_v52  ;;  %5915 = vmatprep.subr.mxu1 %v8086_v16 }
  0xeb   :  { %5880 = vmatprep.subr.mxu0 %v8086_v16  ;;  %5916 = vmatpush3.msra.mxu1 %v7006_v55 }
  0xec   :  { %5881 = vmatpush3.msra.mxu0 %v7004_v54  ;;  %5917 = vmatprep.subr.mxu1 %v8086_v16 }
  0xed   :  { %5882 = vmatprep.subr.mxu0 %v8086_v16  ;;  %5918 = vmatpush3.msra.mxu1 %v7014_v57 }
  0xee   :  { %5883 = vmatpush3.msra.mxu0 %v7012_v56  ;;  %5919 = vmatprep.subr.mxu1 %v8086_v16 }
  0xef   :  { %5884 = vmatprep.subr.mxu0 %v8086_v16  ;;  %5920 = vmatpush3.msra.mxu1 %v7022_v59 }
  0xf0   :  { %5885 = vmatpush3.msra.mxu0 %v7020_v58  ;;  %5921 = vmatprep.subr.mxu1 %v8086_v16 }
  0xf1   :  { %5886 = vmatprep.subr.mxu0 %v8086_v16  ;;  %5922 = vmatpush3.msra.mxu1 %v7030_v61 }
  0xf2   :  { %5887 = vmatpush3.msra.mxu0 %v7028_v60  ;;  %5923 = vmatprep.subr.mxu1 %v8086_v16 }
  0xf3   :  { %5888 = vmatprep.subr.mxu0 %v8086_v16  ;;  %5924 = vmatpush3.msra.mxu1 %v7038_v63 }
  0xf4   :  { %5889 = vmatpush3.msra.mxu0 %v7036_v62  ;;  %5925 = vmatprep.subr.mxu1 %v8086_v16 }
  0xf5   :  { %5890 = vmatprep.subr.mxu0 %v8086_v16  ;;  %5926 = vmatpush3.msra.mxu1 %v7046_v18 }
  0xf6   :  { %5891 = vmatpush3.msra.mxu0 %v7044_v17  ;;  %5927 = vmatprep.subr.mxu1 %v8086_v16 }
  0xf7   :  { %5892 = vmatprep.subr.mxu0 %v8086_v16  ;;  %5928 = vmatpush3.msra.mxu1 %v7054_v20 }
  0xf8   :  { %5893 = vmatpush3.msra.mxu0 %v7052_v19  ;;  %5929 = vmatprep.subr.mxu1 %v8086_v16 }
  0xf9   :  { %5894 = vmatprep.subr.mxu0 %v8086_v16  ;;  %5930 = vmatpush3.msra.mxu1 %v7062_v22 }
  0xfa   :  { %5895 = vmatpush3.msra.mxu0 %v7060_v21  ;;  %5931 = vmatprep.subr.mxu1 %v8086_v16 }
  0xfb   :  { %5896 = vmatprep.subr.mxu0 %v8086_v16  ;;  %5932 = vmatpush3.msra.mxu1 %v7070_v24 }
  0xfc   :  { %5897 = vmatpush3.msra.mxu0 %v7068_v23  ;;  %5933 = vmatprep.subr.mxu1 %v8086_v16 }
  0xfd   :  { %5898 = vmatprep.subr.mxu0 %v8086_v16  ;;  %5934 = vmatpush3.msra.mxu1 %v7078_v26 }
  0xfe   :  { %5899 = vmatpush3.msra.mxu0 %v7076_v25  ;;  %5935 = vmatprep.subr.mxu1 %v8086_v16 }
  0xff   :  { %5900 = vmatprep.subr.mxu0 %v8086_v16  ;;  %5936 = vmatpush3.msra.mxu1 %v7086_v28 }
 0x100   :  { %5901 = vmatpush3.msra.mxu0 %v7084_v27  ;;  %5937 = vmatprep.subr.mxu1 %v8086_v16 }
 0x101   :  { %5902 = vmatprep.subr.mxu0 %v8086_v16  ;;  %5938 = vmatpush3.msra.mxu1 %v7094_v30 }
 0x102   :  { %5903 = vmatpush3.msra.mxu0 %v7092_v29  ;;  %5939 = vmatprep.subr.mxu1 %v8086_v16 }
 0x103   :  { %5904 = vmatprep.subr.mxu0 %v8086_v16  ;;  %5940 = vmatpush3.msra.mxu1 %v7102_v32 }
 0x104   :  { %5905 = vmatpush3.msra.mxu0 %v7100_v31  ;;  %5941 = vmatprep.subr.mxu1 %v8086_v16 }
 0x105   :  { %5906 = vmatprep.subr.mxu0 %v8086_v16  ;;  %5942 = vmatpush3.msra.mxu1 %v7110_v36 }
 0x106   :  { %5907 = vmatpush3.msra.mxu0 %v7108_v35  ;;  %5944 = vmatmul.mubr.f32.vlgmr.msra.gmra.mxu1 %v206_v34 }
 0x107   :  { %5909 = vmatmul.mubr.f32.vlgmr.msra.gmra.mxu0 %v205_v33  ;;  %5946 = vmatprep.subr.mxu0 %v8086_v16 }
 0x108   :  { %5951 = vmatprep.subr.mxu1 %v8086_v16  ;;  %5947 = vmatpush3.xpose.msra.mxu0 %v205_v33 }
 0x109   :  { %5952 = vmatpush3.xpose.msra.mxu1 %v206_v34  ;;  %5948 = vmatprep.mubr.msk.f32.mxu0 %vm6864_vm0, %v8086_v16 }
 0x10a   :  { %5953 = vmatprep.mubr.msk.f32.mxu1 %vm6864_vm0, %v8086_v16  ;;  %5975 = vmatprep.subr.mxu1 %v8086_v16 }
 0x10b   :  { %5956 = vmatprep.subr.mxu0 %v8086_v16  ;;  %5949 = vmatmul.mubr.f32.vlgmr.msra.gmra.mxu0 %v205_v33 }
 0x10c   :  { %5954 = vmatmul.mubr.f32.vlgmr.msra.gmra.mxu1 %v206_v34  ;;  %5957 = vmatpush3.msra.mxu0 %v6946_v15 }
 0x10d   :  { %5976 = vmatpush3.msra.mxu1 %v6944_v14  ;;  %5958 = vmatprep.subr.mxu0 %v8086_v16 }
 0x10e   :  { %5977 = vmatprep.subr.mxu1 %v8086_v16  ;;  %5959 = vmatpush3.msra.mxu0 %v6940_v13  ;;  %v8082_v13 = vmov 2  }
 0x10f   :  { %5978 = vmatpush3.msra.mxu1 %v6938_v12  ;;  %5960 = vmatprep.subr.mxu0 %v8086_v16  ;;  %v8084_v12 = vmov 1  }
 0x110   :  { %5979 = vmatprep.subr.mxu1 %v8086_v16  ;;  %5961 = vmatpush3.msra.mxu0 %v6934_v11 }
 0x111   :  { %5980 = vmatpush3.msra.mxu1 %v6932_v10  ;;  %5962 = vmatprep.subr.mxu0 %v8086_v16 }
 0x112   :  { %5981 = vmatprep.subr.mxu1 %v8086_v16  ;;  %5963 = vmatpush3.msra.mxu0 %v6928_v9 }
 0x113   :  { %5982 = vmatpush3.msra.mxu1 %v6926_v8  ;;  %5964 = vmatprep.subr.mxu0 %v8086_v16 }
 0x114   :  { %5983 = vmatprep.subr.mxu1 %v8086_v16  ;;  %5965 = vmatpush3.msra.mxu0 %v6922_v7 }
 0x115   :  { %5984 = vmatpush3.msra.mxu1 %v6920_v6  ;;  %5966 = vmatprep.subr.mxu0 %v8086_v16 }
 0x116   :  { %5985 = vmatprep.subr.mxu1 %v8086_v16  ;;  %5967 = vmatpush3.msra.mxu0 %v6916_v5 }
 0x117   :  { %5986 = vmatpush3.msra.mxu1 %v6914_v4  ;;  %5968 = vmatprep.subr.mxu0 %v8086_v16 }
 0x118   :  { %5987 = vmatprep.subr.mxu1 %v8086_v16  ;;  %5969 = vmatpush3.msra.mxu0 %v6910_v3  ;;  %v198_v3 = vld [vmem:[#allocation8] sm:$0xf] }
 0x119   :  { %5988 = vmatpush3.msra.mxu1 %v6908_v2  ;;  %5991 = vmatprep.mubr.msk.f32.mxu1 %vm6864_vm0, %v8086_v16  ;;  %v8078_v2 = vmov 0   ;;  %201 = vst.msk [vmem:[#allocation2 + $0x4] sm:$0xf] %vm199_vm2, %v198_v3  ;;  %200 = vst.msk [vmem:[#allocation2] sm:$0xf] %vm199_vm2, %v198_v3 }
 0x11a   :  { %5989 = vmatprep.subr.mxu1 %v8086_v16  ;;  %5970 = vmatprep.subr.mxu0 %v8086_v16 }
 0x11b   :  { %5990 = vmatpush3.msra.mxu1 %v6902_v0  ;;  %5971 = vmatpush3.msra.mxu0 %v6904_v1 }
 0x11c   :  { %5999 = vmatprep.subr.mxu1 %v8086_v16  ;;  %5972 = vmatprep.mubr.msk.f32.mxu0 %vm6864_vm0, %v8086_v16 }
 0x11d   :  { %5994 = vmatprep.subr.mxu0 %v8086_v16  ;;  %6557 = vset.pattern.permute.xlu1 %v8078_v2 }
 0x11e   :  { %6556 = vset.pattern.permute.xlu0 %v8078_v2 }
 0x120   :  { %v488_v38 = vld [vmem:[#allocation2 + $0x4] sm:$0xf]  ;;  %v487_v39 = vld [vmem:[#allocation2] sm:$0xf] }
 0x1c6   :  { %v7162_v4 = vpop.f32.mrf.mxu1 }
 0x1c7   :  { %v7160_v0 = vpop.f32.mrf.mxu0 }
 0x1c8   :  { %v5945_v1 = vpop.f32.mrf.mxu1 }
 0x1c9   :  { %v5910_v5 = vpop.f32.mrf.mxu0 }
 0x1cb   :  { %v413_v7 = vpop.f32.mrf.mxu0 }
 0x1cc   :  { %v483_v6 = vpop.f32.mrf.mxu1  ;;  %v525_v9 = vadd.f32 1e-16, %v413_v7  ;;  %491 = vperm.xlu0 %6556, %v413_v7  }
 0x1cd   :  { %v526_v8 = vadd.f32 1e-16, %v483_v6  ;;  %496 = vperm.xlu1 %6557, %v483_v6   ;;  %v5950_v10 = vpop.f32.mrf.mxu0 }
 0x1ce   :  { %v5955_v11 = vpop.f32.mrf.mxu1 }
 0x1cf   :  { %6636 = vrcp.f32 %v526_v8 }
 0x1d0   :  { %6638 = vrcp.f32 %v525_v9  ;;  %6559 = vset.pattern.permute.xlu0 %v8084_v12 }
 0x1d1   :  { %549 = vperm.xlu0 %6559, %v483_v6  }
 0x1d5   :  { %6560 = vset.pattern.permute.xlu0 %v8082_v13 }
 0x1d6   :  { %594 = vperm.xlu0 %6560, %v413_v7  }
 0x1dc   :  { %v6637_v14 = vpop.eup %6636 }
 0x1dd   :  { %v6639_v15 = vpop.eup %6638  ;;  %638 = vperm.xlu0 %6560, %v6637_v14  }
 0x1de   :  { %531 = vperm.xlu1 %6557, %v6639_v15  }
 0x1e1   :  { %6563 = vset.pattern.permute.xlu0 %v8080_v37 }
 0x1e2   :  { %536 = vperm.xlu1 %6557, %v6637_v14   ;;  %651 = vperm.xlu0 %6563, %v483_v6  }
 0x1e6   :  { %6558 = vset.pattern.permute.xlu1 %v8084_v12  ;;  %6564 = vset.pattern.permute.xlu0 %v8078_v2 }
 0x1e7   :  { %545 = vperm.xlu1 %6558, %v413_v7  }
 0x1eb   :  { %581 = vperm.xlu1 %6558, %v6639_v15  }
 0x1ef   :  { %585 = vperm.xlu1 %6558, %v6637_v14  }
 0x1f3   :  { %6561 = vset.pattern.permute.xlu1 %v8082_v13 }
 0x1f4   :  { %598 = vperm.xlu1 %6561, %v483_v6  }
 0x1f8   :  { %634 = vperm.xlu1 %6561, %v6639_v15  }
 0x1fc   :  { %6562 = vset.pattern.permute.xlu1 %v8080_v37 }
 0x1fd   :  { %647 = vperm.xlu1 %6562, %v413_v7  }
 0x201   :  { %687 = vperm.xlu1 %6562, %v6639_v15  }
 0x205   :  { %691 = vperm.xlu1 %6562, %v6637_v14  }
 0x209   :  { %6565 = vset.pattern.permute.xlu1 %v8078_v2 }
 0x247   :  { %v492_v41 = vpop.permute.xlu0 %491 }
 0x248   :  { %v497_v40 = vpop.permute.xlu1 %496  ;;  %v499_v43 = vmul.f32 %v492_v41, %v487_v39 }
 0x249   :  { %v500_v42 = vmul.f32 %v497_v40, %v488_v38 }
 0x24a   :  { %v503_v45 = vrot.slane %v499_v43, 1  ;;  %v509_v49 = vrot.slane %v499_v43, 2 }
 0x24b   :  { %v504_v44 = vrot.slane %v500_v42, 1  ;;  %v510_v46 = vrot.slane %v500_v42, 2 }
 0x24c   :  { %v507_v48 = vadd.f32 %v503_v45, %v499_v43  ;;  %v550_v8 = vpop.permute.xlu0 %549 }
 0x24d   :  { %v508_v47 = vadd.f32 %v504_v44, %v500_v42  ;;  %v555_v11 = vmul.f32 %v550_v8, %v488_v38 }
 0x24e   :  { %v513_v33 = vadd.f32 %v509_v49, %v507_v48 }
 0x24f   :  { %v514_v34 = vadd.f32 %v510_v46, %v508_v47  ;;  %v559_v41 = vrot.slane %v555_v11, 2  ;;  %v565_v43 = vrot.slane %v555_v11, 3 }
 0x250   :  { %v517_v3 = vrot.slane %v513_v33, 1 }
 0x251   :  { %v518_v1 = vrot.slane %v514_v34, 1 }
 0x252   :  { %v521_v5 = vsub.f32 %v7160_v0, %v517_v3 }
 0x253   :  { %v522_v7 = vsub.f32 %v7162_v4, %v518_v1 }
 0x254   :  { %v523_v6 = vadd.f32 1e-16, %v521_v5 }
 0x255   :  { %v524_v14 = vadd.f32 1e-16, %v522_v7 }
 0x259   :  { %v532_v9 = vpop.permute.xlu1 %531 }
 0x25a   :  { %v7174_v10 = vmul.f32 %v532_v9, %v523_v6 }
 0x25c   :  { %542 = vst.msk [vmem:[#allocation2] sm:$0x1] %vm541_vm3, %v7174_v10 }
 0x25d   :  { %v537_v15 = vpop.permute.xlu1 %536 }
 0x25e   :  { %v540_v40 = vmul.f32 %v537_v15, %v524_v14  ;;  %v595_v15 = vpop.permute.xlu0 %594 }
 0x260   :  { %543 = vst.msk [vmem:[#allocation2 + $0x4] sm:$0x1] %vm541_vm3, %v540_v40  ;;  %v553_v42 = vmul.f32 %v550_v8, %v540_v40 }
 0x262   :  { %v546_v44 = vpop.permute.xlu1 %545  ;;  %v563_v45 = vadd.f32 %v559_v41, %v553_v42 }
 0x263   :  { %v554_v46 = vmul.f32 %v546_v44, %v487_v39  ;;  %v552_v48 = vmul.f32 %v546_v44, %v7174_v10 }
 0x264   :  { %v569_v47 = vadd.f32 %v565_v43, %v563_v45 }
 0x265   :  { %v558_v49 = vrot.slane %v554_v46, 2  ;;  %v564_v5 = vrot.slane %v554_v46, 3 }
 0x266   :  { %v582_v33 = vpop.permute.xlu1 %581  ;;  %v573_v34 = vrot.slane %v569_v47, 7 }
 0x267   :  { %v562_v3 = vadd.f32 %v558_v49, %v552_v48  ;;  %v613_v48 = vmul.f32 %v595_v15, %v487_v39  ;;  %v639_v49 = vpop.permute.xlu0 %638 }
 0x268   :  { %v577_v1 = vsub.f32 %v7162_v4, %v573_v34 }
 0x269   :  { %v568_v6 = vadd.f32 %v564_v5, %v562_v3 }
 0x26a   :  { %v579_v7 = vadd.f32 1e-16, %v577_v1  ;;  %v586_v9 = vpop.permute.xlu1 %585 }
 0x26b   :  { %v572_v14 = vrot.slane %v568_v6, 7  ;;  %v601_v6 = vmul.f32 %v595_v15, %v7174_v10  ;;  %v652_v37 = vpop.permute.xlu0 %651 }
 0x26c   :  { %v589_v8 = vmul.f32 %v586_v9, %v579_v7 }
 0x26d   :  { %v576_v11 = vsub.f32 %v7160_v0, %v572_v14  ;;  %v617_v14 = vrot.slane %v613_v48, 3 }
 0x26e   :  { %592 = vst.msk [vmem:[#allocation2 + $0x4] sm:$0x2] %vm590_vm4, %v589_v8 }
 0x26f   :  { %v578_v41 = vadd.f32 1e-16, %v576_v11  ;;  %v599_v42 = vpop.permute.xlu1 %598 }
 0x270   :  { %v604_v43 = vmul.f32 %v599_v42, %v589_v8  ;;  %v614_v44 = vmul.f32 %v599_v42, %v488_v38  ;;  %v602_v47 = vmul.f32 %v599_v42, %v540_v40 }
 0x271   :  { %v588_v45 = vmul.f32 %v582_v33, %v578_v41  ;;  %v657_v33 = vmul.f32 %v652_v37, %v589_v8 }
 0x272   :  { %v608_v46 = vrot.slane %v604_v43, 1  ;;  %v618_v5 = vrot.slane %v614_v44, 3 }
 0x273   :  { %591 = vst.msk [vmem:[#allocation2] sm:$0x2] %vm590_vm4, %v588_v45  ;;  %v603_v34 = vmul.f32 %v595_v15, %v588_v45  ;;  %v635_v1 = vpop.permute.xlu1 %634 }
 0x274   :  { %v612_v3 = vadd.f32 %v608_v46, %v602_v47  ;;  %v661_v47 = vrot.slane %v657_v33, 1 }
 0x275   :  { %v607_v7 = vrot.slane %v603_v34, 1  ;;  %v655_v34 = vmul.f32 %v652_v37, %v540_v40 }
 0x276   :  { %v622_v9 = vadd.f32 %v618_v5, %v612_v3 }
 0x277   :  { %v611_v11 = vadd.f32 %v607_v7, %v601_v6  ;;  %v665_v6 = vadd.f32 %v661_v47, %v655_v34 }
 0x278   :  { %v626_v2 = vrot.slane %v622_v9, 6  ;;  %v648_v39 = vpop.permute.xlu1 %647 }
 0x279   :  { %v621_v38 = vadd.f32 %v617_v14, %v611_v11  ;;  %v656_v44 = vmul.f32 %v648_v39, %v588_v45 }
 0x27a   :  { %v630_v41 = vsub.f32 %v7162_v4, %v626_v2  ;;  %v654_v2 = vmul.f32 %v648_v39, %v7174_v10 }
 0x27b   :  { %v625_v42 = vrot.slane %v621_v38, 6  ;;  %v660_v5 = vrot.slane %v656_v44, 1 }
 0x27c   :  { %v632_v43 = vadd.f32 1e-16, %v630_v41  ;;  %v688_v45 = vpop.permute.xlu1 %687 }
 0x27d   :  { %v629_v13 = vsub.f32 %v7160_v0, %v625_v42  ;;  %v664_v14 = vadd.f32 %v660_v5, %v654_v2 }
 0x27e   :  { %v642_v46 = vmul.f32 %v639_v49, %v632_v43 }
 0x27f   :  { %v631_v15 = vadd.f32 1e-16, %v629_v13 }
 0x280   :  { %645 = vst.msk [vmem:[#allocation2 + $0x4] sm:$0x4] %vm643_vm5, %v642_v46  ;;  %v667_v48 = vmul.f32 %v652_v37, %v642_v46 }
 0x281   :  { %v641_v3 = vmul.f32 %v635_v1, %v631_v15  ;;  %v692_v1 = vpop.permute.xlu1 %691 }
 0x282   :  { %v671_v8 = vrot.slane %v667_v48, 2 }
 0x283   :  { %644 = vst.msk [vmem:[#allocation2] sm:$0x4] %vm643_vm5, %v641_v3  ;;  %v666_v7 = vmul.f32 %v648_v39, %v641_v3 }
 0x284   :  { %v675_v9 = vadd.f32 %v671_v8, %v665_v6 }
 0x285   :  { %v670_v11 = vrot.slane %v666_v7, 2 }
 0x286   :  { %v679_v38 = vrot.slane %v675_v9, 5 }
 0x287   :  { %v674_v49 = vadd.f32 %v670_v11, %v664_v14 }
 0x288   :  { %v683_v13 = vsub.f32 %v7162_v4, %v679_v38 }
 0x289   :  { %v678_v40 = vrot.slane %v674_v49, 5 }
 0x28a   :  { %v685_v33 = vadd.f32 1e-16, %v683_v13 }
 0x28b   :  { %v682_v37 = vsub.f32 %v7160_v0, %v678_v40 }
 0x28c   :  { %v695_v41 = vmul.f32 %v692_v1, %v685_v33 }
 0x28d   :  { %v684_v42 = vadd.f32 1e-16, %v682_v37 }
 0x28e   :  { %698 = vst.msk [vmem:[#allocation2 + $0x4] sm:$0x8] %vm696_vm6, %v695_v41 }
 0x28f   :  { %v694_v10 = vmul.f32 %v688_v45, %v684_v42 }
 0x291   :  { %697 = vst.msk [vmem:[#allocation2] sm:$0x8] %vm696_vm6, %v694_v10 }
 0x295   :  { %v700_v39 = vld [vmem:[#allocation2 + $0x4] sm:$0xf] }
 0x296   :  { %5992 = vmatmul.mubr.msk.f32.vlgmr.msra.gmra.mxu1 %vm100_vm1, %v700_v39 }
 0x297   :  { %6000 = vmatpush3.xpose.msk.msra.mxu1 %vm100_vm1, %v700_v39  ;;  %6001 = vmatprep.mubr.msk.f32.mxu1 %vm6864_vm0, %v8086_v16 }
 0x298   :  { %v699_v4 = vld [vmem:[#allocation2] sm:$0xf]  ;;  %6039 = vmatprep.subr.mxu1 %v8086_v16 }
 0x299   :  { %5973 = vmatmul.mubr.msk.f32.vlgmr.msra.gmra.mxu0 %vm100_vm1, %v699_v4 }
 0x29a   :  { %5995 = vmatpush3.xpose.msk.msra.mxu0 %vm100_vm1, %v699_v4  ;;  %6002 = vmatmul.mubr.msk.f32.vlgmr.msra.gmra.mxu1 %vm100_vm1, %v700_v39 }
 0x29b   :  { %6040 = vmatpush3.msra.mxu1 %v6990_v51  ;;  %5996 = vmatprep.mubr.msk.f32.mxu0 %vm6864_vm0, %v8086_v16 }
 0x29c   :  { %6041 = vmatprep.subr.mxu1 %v8086_v16  ;;  %6004 = vmatprep.subr.mxu0 %v8086_v16 }
 0x29d   :  { %6042 = vmatpush3.msra.mxu1 %v6998_v53  ;;  %5997 = vmatmul.mubr.msk.f32.vlgmr.msra.gmra.mxu0 %vm100_vm1, %v699_v4 }
 0x29e   :  { %6005 = vmatpush3.msra.mxu0 %v6988_v50  ;;  %6043 = vmatprep.subr.mxu1 %v8086_v16 }
 0x29f   :  { %6006 = vmatprep.subr.mxu0 %v8086_v16  ;;  %6044 = vmatpush3.msra.mxu1 %v7006_v55 }
 0x2a0   :  { %6007 = vmatpush3.msra.mxu0 %v6996_v52  ;;  %6045 = vmatprep.subr.mxu1 %v8086_v16 }
 0x2a1   :  { %6008 = vmatprep.subr.mxu0 %v8086_v16  ;;  %6046 = vmatpush3.msra.mxu1 %v7014_v57 }
 0x2a2   :  { %6009 = vmatpush3.msra.mxu0 %v7004_v54  ;;  %6047 = vmatprep.subr.mxu1 %v8086_v16 }
 0x2a3   :  { %6010 = vmatprep.subr.mxu0 %v8086_v16  ;;  %6048 = vmatpush3.msra.mxu1 %v7022_v59 }
 0x2a4   :  { %6011 = vmatpush3.msra.mxu0 %v7012_v56  ;;  %6049 = vmatprep.subr.mxu1 %v8086_v16 }
 0x2a5   :  { %6012 = vmatprep.subr.mxu0 %v8086_v16  ;;  %6050 = vmatpush3.msra.mxu1 %v7030_v61 }
 0x2a6   :  { %6013 = vmatpush3.msra.mxu0 %v7020_v58  ;;  %6051 = vmatprep.subr.mxu1 %v8086_v16 }
 0x2a7   :  { %6014 = vmatprep.subr.mxu0 %v8086_v16  ;;  %6052 = vmatpush3.msra.mxu1 %v7038_v63  ;;  %v8108_v63 = vmov 3  }
 0x2a8   :  { %6015 = vmatpush3.msra.mxu0 %v7028_v60  ;;  %6053 = vmatprep.subr.mxu1 %v8086_v16 }
 0x2a9   :  { %6016 = vmatprep.subr.mxu0 %v8086_v16  ;;  %6054 = vmatpush3.msra.mxu1 %v7046_v18  ;;  %v988_v18 = vld [vmem:[#allocation3 + $0x4] sm:$0xf] }
 0x2aa   :  { %6017 = vmatpush3.msra.mxu0 %v7036_v62  ;;  %6055 = vmatprep.subr.mxu1 %v8086_v16  ;;  %v8107_v62 = vmov 2  }
 0x2ab   :  { %6018 = vmatprep.subr.mxu0 %v8086_v16  ;;  %6056 = vmatpush3.msra.mxu1 %v7054_v20 }
 0x2ac   :  { %6019 = vmatpush3.msra.mxu0 %v7044_v17  ;;  %6057 = vmatprep.subr.mxu1 %v8086_v16  ;;  %v8109_v17 = vmov 0  }
 0x2ad   :  { %6020 = vmatprep.subr.mxu0 %v8086_v16  ;;  %6058 = vmatpush3.msra.mxu1 %v7062_v22 }
 0x2ae   :  { %6021 = vmatpush3.msra.mxu0 %v7052_v19  ;;  %6059 = vmatprep.subr.mxu1 %v8086_v16 }
 0x2af   :  { %6022 = vmatprep.subr.mxu0 %v8086_v16  ;;  %6060 = vmatpush3.msra.mxu1 %v7070_v24 }
 0x2b0   :  { %6023 = vmatpush3.msra.mxu0 %v7060_v21  ;;  %6061 = vmatprep.subr.mxu1 %v8086_v16  ;;  %v987_v21 = vld [vmem:[#allocation3] sm:$0xf] }
 0x2b1   :  { %6024 = vmatprep.subr.mxu0 %v8086_v16  ;;  %6062 = vmatpush3.msra.mxu1 %v7078_v26 }
 0x2b2   :  { %6025 = vmatpush3.msra.mxu0 %v7068_v23  ;;  %6063 = vmatprep.subr.mxu1 %v8086_v16 }
 0x2b3   :  { %6026 = vmatprep.subr.mxu0 %v8086_v16  ;;  %6064 = vmatpush3.msra.mxu1 %v7086_v28 }
 0x2b4   :  { %6027 = vmatpush3.msra.mxu0 %v7076_v25  ;;  %6065 = vmatprep.subr.mxu1 %v8086_v16 }
 0x2b5   :  { %6028 = vmatprep.subr.mxu0 %v8086_v16  ;;  %6066 = vmatpush3.msra.mxu1 %v7094_v30 }
 0x2b6   :  { %6029 = vmatpush3.msra.mxu0 %v7084_v27  ;;  %6067 = vmatprep.subr.mxu1 %v8086_v16 }
 0x2b7   :  { %6030 = vmatprep.subr.mxu0 %v8086_v16  ;;  %6068 = vmatpush3.msra.mxu1 %v7102_v32 }
 0x2b8   :  { %6031 = vmatpush3.msra.mxu0 %v7092_v29  ;;  %6069 = vmatprep.subr.mxu1 %v8086_v16 }
 0x2b9   :  { %6032 = vmatprep.subr.mxu0 %v8086_v16  ;;  %6070 = vmatpush3.msra.mxu1 %v7110_v36 }
 0x2ba   :  { %6033 = vmatpush3.msra.mxu0 %v7100_v31  ;;  %6071 = vmatprep.mubr.msk.f32.mxu1 %vm6864_vm0, %v8086_v16 }
 0x2bb   :  { %6034 = vmatprep.subr.mxu0 %v8086_v16  ;;  %6079 = vmatprep.subr.mxu1 %v8086_v16 }
 0x2bc   :  { %6035 = vmatpush3.msra.mxu0 %v7108_v35  ;;  %6036 = vmatprep.mubr.msk.f32.mxu0 %vm6864_vm0, %v8086_v16 }
 0x2bd   :  { %6074 = vmatprep.subr.mxu0 %v8086_v16 }
 0x356   :  { %v7274_v50 = vpop.f32.mrf.mxu1 }
 0x358   :  { %v5993_v51 = vpop.f32.mrf.mxu1 }
 0x359   :  { %v7276_v52 = vpop.f32.mrf.mxu0 }
 0x35a   :  { %v983_v53 = vpop.f32.mrf.mxu1 }
 0x35b   :  { %v1026_v54 = vadd.f32 1e-16, %v983_v53  ;;  %996 = vperm.xlu1 %6565, %v983_v53   ;;  %v5974_v55 = vpop.f32.mrf.mxu0 }
 0x35c   :  { %v6003_v56 = vpop.f32.mrf.mxu1 }
 0x35d   :  { %6640 = vrcp.f32 %v1026_v54  ;;  %v913_v57 = vpop.f32.mrf.mxu0 }
 0x35e   :  { %v1025_v58 = vadd.f32 1e-16, %v913_v57  ;;  %991 = vperm.xlu0 %6564, %v913_v57  }
 0x35f   :  { %v5998_v59 = vpop.f32.mrf.mxu0 }
 0x360   :  { %6642 = vrcp.f32 %v1025_v58 }
 0x36a   :  { %v6641_v60 = vpop.eup %6640 }
 0x36b   :  { %1036 = vperm.xlu0 %6564, %v6641_v60  }
 0x36d   :  { %v6643_v61 = vpop.eup %6642 }
 0x36e   :  { %1031 = vperm.xlu1 %6565, %v6643_v61  }
 0x36f   :  { %6567 = vset.pattern.permute.xlu0 %v8084_v12 }
 0x370   :  { %1048 = vperm.xlu0 %6567, %v983_v53  }
 0x372   :  { %6566 = vset.pattern.permute.xlu1 %v8084_v12 }
 0x373   :  { %1044 = vperm.xlu1 %6566, %v913_v57  }
 0x374   :  { %6568 = vset.pattern.permute.xlu0 %v8107_v62 }
 0x375   :  { %1092 = vperm.xlu0 %6568, %v913_v57  }
 0x377   :  { %1080 = vperm.xlu1 %6566, %v6643_v61  }
 0x379   :  { %1136 = vperm.xlu0 %6568, %v6641_v60  }
 0x37b   :  { %1084 = vperm.xlu1 %6566, %v6641_v60  }
 0x37d   :  { %6571 = vset.pattern.permute.xlu0 %v8108_v63 }
 0x37e   :  { %1148 = vperm.xlu0 %6571, %v983_v53  }
 0x37f   :  { %6569 = vset.pattern.permute.xlu1 %v8107_v62 }
 0x380   :  { %1096 = vperm.xlu1 %6569, %v983_v53  }
 0x382   :  { %6572 = vset.pattern.permute.xlu0 %v8109_v17 }
 0x384   :  { %1132 = vperm.xlu1 %6569, %v6643_v61  }
 0x388   :  { %6570 = vset.pattern.permute.xlu1 %v8108_v63 }
 0x389   :  { %1144 = vperm.xlu1 %6570, %v913_v57  }
 0x38d   :  { %1184 = vperm.xlu1 %6570, %v6643_v61  }
 0x391   :  { %1188 = vperm.xlu1 %6570, %v6641_v60  }
 0x395   :  { %6573 = vset.pattern.permute.xlu1 %v8109_v17 }
 0x3d6   :  { %v997_v19 = vpop.permute.xlu1 %996 }
 0x3d7   :  { %v1000_v20 = vmul.f32 %v997_v19, %v988_v18 }
 0x3d9   :  { %v1004_v22 = vrot.slane %v1000_v20, 1  ;;  %v992_v23 = vpop.permute.xlu0 %991  ;;  %v1010_v26 = vrot.slane %v1000_v20, 2 }
 0x3da   :  { %v999_v24 = vmul.f32 %v992_v23, %v987_v21 }
 0x3db   :  { %v1008_v25 = vadd.f32 %v1004_v22, %v1000_v20 }
 0x3dc   :  { %v1003_v27 = vrot.slane %v999_v24, 1  ;;  %v1009_v30 = vrot.slane %v999_v24, 2 }
 0x3dd   :  { %v1014_v28 = vadd.f32 %v1010_v26, %v1008_v25 }
 0x3de   :  { %v1007_v29 = vadd.f32 %v1003_v27, %v999_v24 }
 0x3df   :  { %v1018_v31 = vrot.slane %v1014_v28, 1 }
 0x3e0   :  { %v1013_v32 = vadd.f32 %v1009_v30, %v1007_v29 }
 0x3e1   :  { %v1022_v35 = vsub.f32 %v7274_v50, %v1018_v31 }
 0x3e2   :  { %v1017_v36 = vrot.slane %v1013_v32, 1 }
 0x3e3   :  { %v1024_v43 = vadd.f32 1e-16, %v1022_v35 }
 0x3e4   :  { %v1021_v0 = vsub.f32 %v7276_v52, %v1017_v36 }
 0x3e6   :  { %v1037_v44 = vpop.permute.xlu0 %1036  ;;  %v1023_v46 = vadd.f32 1e-16, %v1021_v0 }
 0x3e7   :  { %v1040_v47 = vmul.f32 %v1037_v44, %v1024_v43 }
 0x3e9   :  { %1042 = vst [vmem:[#allocation3 + $0x4] sm:$0x1] %v1040_v47  ;;  %v1032_v15 = vpop.permute.xlu1 %1031 }
 0x3ea   :  { %v7288_v34 = vmul.f32 %v1032_v15, %v1023_v46 }
 0x3eb   :  { %v1049_v48 = vpop.permute.xlu0 %1048 }
 0x3ec   :  { %1041 = vst [vmem:[#allocation3] sm:$0x1] %v7288_v34  ;;  %v1054_v3 = vmul.f32 %v1049_v48, %v988_v18  ;;  %v1052_v5 = vmul.f32 %v1049_v48, %v1040_v47 }
 0x3ee   :  { %v1058_v6 = vrot.slane %v1054_v3, 2  ;;  %v1045_v8 = vpop.permute.xlu1 %1044  ;;  %v1064_v9 = vrot.slane %v1054_v3, 3 }
 0x3ef   :  { %v1053_v2 = vmul.f32 %v1045_v8, %v987_v21  ;;  %v1051_v14 = vmul.f32 %v1045_v8, %v7288_v34 }
 0x3f0   :  { %v1062_v7 = vadd.f32 %v1058_v6, %v1052_v5  ;;  %v1093_v10 = vpop.permute.xlu0 %1092 }
 0x3f1   :  { %v1057_v11 = vrot.slane %v1053_v2, 2  ;;  %v1063_v13 = vrot.slane %v1053_v2, 3  ;;  %v1111_v59 = vmul.f32 %v1093_v10, %v987_v21  ;;  %v1099_v23 = vmul.f32 %v1093_v10, %v7288_v34 }
 0x3f2   :  { %v1081_v45 = vpop.permute.xlu1 %1080  ;;  %v1068_v38 = vadd.f32 %v1064_v9, %v1062_v7 }
 0x3f3   :  { %v1061_v49 = vadd.f32 %v1057_v11, %v1051_v14  ;;  %v1115_v26 = vrot.slane %v1111_v59, 3  ;;  %v7350_v59 = vld [vmem:[#allocation5 + $0x48] sm:$0xff] }
 0x3f4   :  { %v1072_v40 = vrot.slane %v1068_v38, 7  ;;  %v1137_v61 = vpop.permute.xlu0 %1136 }
 0x3f5   :  { %v1067_v33 = vadd.f32 %v1063_v13, %v1061_v49 }
 0x3f6   :  { %v1076_v37 = vsub.f32 %v7274_v50, %v1072_v40  ;;  %v1085_v1 = vpop.permute.xlu1 %1084 }
 0x3f7   :  { %v1071_v41 = vrot.slane %v1067_v33, 7 }
 0x3f8   :  { %v1078_v42 = vadd.f32 1e-16, %v1076_v37 }
 0x3f9   :  { %v1075_v39 = vsub.f32 %v7276_v52, %v1071_v41  ;;  %v1149_v29 = vpop.permute.xlu0 %1148 }
 0x3fa   :  { %v1088_v4 = vmul.f32 %v1085_v1, %v1078_v42  ;;  %v1152_v15 = vmul.f32 %v1149_v29, %v1040_v47 }
 0x3fb   :  { %v1077_v51 = vadd.f32 1e-16, %v1075_v39  ;;  %v1097_v53 = vpop.permute.xlu1 %1096  ;;  %v7313_v39 = vld [vmem:[#allocation5 + $0x38] sm:$0xff] }
 0x3fc   :  { %1090 = vst [vmem:[#allocation3 + $0x4] sm:$0x2] %v1088_v4  ;;  %v1102_v54 = vmul.f32 %v1097_v53, %v1088_v4  ;;  %v1112_v55 = vmul.f32 %v1097_v53, %v988_v18  ;;  %v1100_v57 = vmul.f32 %v1097_v53, %v1040_v47  ;;  %v1154_v18 = vmul.f32 %v1149_v29, %v1088_v4  ;;  %v7318_v4 = vld [vmem:[#allocation5 + $0x68] sm:$0xff]  ;;  %v7326_v53 = vld [vmem:[#allocation5 + $0x60] sm:$0xff] }
 0x3fd   :  { %v1087_v56 = vmul.f32 %v1081_v45, %v1077_v51  ;;  %v7321_v51 = vld [vmem:[#allocation5 + $0x30] sm:$0xff] }
 0x3fe   :  { %v1106_v58 = vrot.slane %v1102_v54, 1  ;;  %v1116_v20 = vrot.slane %v1112_v55, 3  ;;  %v1158_v43 = vrot.slane %v1154_v18, 1  ;;  %v7329_v54 = vld [vmem:[#allocation5 + $0x28] sm:$0xff]  ;;  %v7334_v55 = vld [vmem:[#allocation5 + $0x58] sm:$0xff] }
 0x3ff   :  { %1089 = vst [vmem:[#allocation3] sm:$0x2] %v1087_v56  ;;  %v1101_v60 = vmul.f32 %v1093_v10, %v1087_v56  ;;  %v1133_v22 = vpop.permute.xlu1 %1132 }
 0x400   :  { %v1110_v19 = vadd.f32 %v1106_v58, %v1100_v57  ;;  %v1162_v6 = vadd.f32 %v1158_v43, %v1152_v15  ;;  %v7342_v57 = vld [vmem:[#allocation5 + $0x50] sm:$0xff]  ;;  %v7345_v58 = vld [vmem:[#allocation5 + $0x18] sm:$0xff] }
 0x401   :  { %v1105_v24 = vrot.slane %v1101_v60, 1  ;;  %v7353_v60 = vld [vmem:[#allocation5 + $0x10] sm:$0xff] }
 0x402   :  { %v1120_v25 = vadd.f32 %v1116_v20, %v1110_v19  ;;  %v7361_v19 = vld [vmem:[#allocation5 + $0x8] sm:$0xff]  ;;  %v7368_v20 = vld [vmem:[#allocation5] sm:$0xff] }
 0x403   :  { %v1109_v27 = vadd.f32 %v1105_v24, %v1099_v23 }
 0x404   :  { %v1124_v28 = vrot.slane %v1120_v25, 6  ;;  %v1145_v32 = vpop.permute.xlu1 %1144 }
 0x405   :  { %v1119_v30 = vadd.f32 %v1115_v26, %v1109_v27  ;;  %v1153_v0 = vmul.f32 %v1145_v32, %v1087_v56  ;;  %v1151_v2 = vmul.f32 %v1145_v32, %v7288_v34  ;;  %v7337_v56 = vld [vmem:[#allocation5 + $0x20] sm:$0xff] }
 0x406   :  { %v1128_v31 = vsub.f32 %v7274_v50, %v1124_v28 }
 0x407   :  { %v1123_v21 = vrot.slane %v1119_v30, 6  ;;  %v1157_v5 = vrot.slane %v1153_v0, 1  ;;  %v1477_v0 = vld [vmem:[#allocation2] sm:$0xf] }
 0x408   :  { %v1130_v35 = vadd.f32 1e-16, %v1128_v31  ;;  %v1185_v45 = vpop.permute.xlu1 %1184 }
 0x409   :  { %v1127_v36 = vsub.f32 %v7276_v52, %v1123_v21  ;;  %v1161_v14 = vadd.f32 %v1157_v5, %v1151_v2  ;;  %v1478_v21 = vld [vmem:[#allocation2 + $0x4] sm:$0xf] }
 0x40a   :  { %v1140_v44 = vmul.f32 %v1137_v61, %v1130_v35  ;;  %v7358_v61 = vld [vmem:[#allocation5 + $0x40] sm:$0xff] }
 0x40b   :  { %v1129_v46 = vadd.f32 1e-16, %v1127_v36 }
 0x40c   :  { %1142 = vst [vmem:[#allocation3 + $0x4] sm:$0x4] %v1140_v44  ;;  %v1164_v48 = vmul.f32 %v1149_v29, %v1140_v44  ;;  %v1189_v37 = vpop.permute.xlu1 %1188 }
 0x40d   :  { %v1139_v3 = vmul.f32 %v1133_v22, %v1129_v46 }
 0x40e   :  { %v1168_v8 = vrot.slane %v1164_v48, 2 }
 0x40f   :  { %1141 = vst [vmem:[#allocation3] sm:$0x4] %v1139_v3  ;;  %v1163_v7 = vmul.f32 %v1145_v32, %v1139_v3 }
 0x410   :  { %v1172_v9 = vadd.f32 %v1168_v8, %v1162_v6 }
 0x411   :  { %v1167_v11 = vrot.slane %v1163_v7, 2 }
 0x412   :  { %v1176_v38 = vrot.slane %v1172_v9, 5 }
 0x413   :  { %v1171_v49 = vadd.f32 %v1167_v11, %v1161_v14 }
 0x414   :  { %v1180_v13 = vsub.f32 %v7274_v50, %v1176_v38  ;;  %v7305_v50 = vld [vmem:[#allocation5 + $0x78] sm:$0xff] }
 0x415   :  { %v1175_v40 = vrot.slane %v1171_v49, 5 }
 0x416   :  { %v1182_v47 = vadd.f32 1e-16, %v1180_v13 }
 0x417   :  { %v1179_v33 = vsub.f32 %v7276_v52, %v1175_v40  ;;  %v7310_v52 = vld [vmem:[#allocation5 + $0x70] sm:$0xff] }
 0x418   :  { %v1192_v1 = vmul.f32 %v1189_v37, %v1182_v47 }
 0x419   :  { %v1181_v41 = vadd.f32 1e-16, %v1179_v33 }
 0x41a   :  { %1194 = vst [vmem:[#allocation3 + $0x4] sm:$0x8] %v1192_v1 }
 0x41b   :  { %v1191_v42 = vmul.f32 %v1185_v45, %v1181_v41 }
 0x41d   :  { %1193 = vst [vmem:[#allocation3] sm:$0x8] %v1191_v42 }
 0x421   :  { %v1196_v34 = vld [vmem:[#allocation3 + $0x4] sm:$0xf] }
 0x422   :  { %6072 = vmatmul.mubr.f32.vlgmr.msra.gmra.mxu1 %v1196_v34 }
 0x423   :  { %6080 = vmatpush3.xpose.msra.mxu1 %v1196_v34  ;;  %6081 = vmatprep.mubr.msk.f32.mxu1 %vm6864_vm0, %v8086_v16 }
 0x424   :  { %v1195_v10 = vld [vmem:[#allocation3] sm:$0xf]  ;;  %6103 = vmatprep.subr.mxu1 %v8086_v16 }
 0x425   :  { %6037 = vmatmul.mubr.f32.vlgmr.msra.gmra.mxu0 %v1195_v10 }
 0x426   :  { %6075 = vmatpush3.xpose.msra.mxu0 %v1195_v10  ;;  %6082 = vmatmul.mubr.f32.vlgmr.msra.gmra.mxu1 %v1196_v34 }
 0x427   :  { %6076 = vmatprep.mubr.msk.f32.mxu0 %vm6864_vm0, %v8086_v16  ;;  %6104 = vmatpush3.msra.mxu1 %v7305_v50 }
 0x428   :  { %6105 = vmatprep.subr.mxu1 %v8086_v16  ;;  %6084 = vmatprep.subr.mxu0 %v8086_v16 }
 0x429   :  { %6077 = vmatmul.mubr.f32.vlgmr.msra.gmra.mxu0 %v1195_v10  ;;  %6106 = vmatpush3.msra.mxu1 %v7310_v52 }
 0x42a   :  { %6085 = vmatpush3.msra.mxu0 %v7313_v39  ;;  %6107 = vmatprep.subr.mxu1 %v8086_v16 }
 0x42b   :  { %6086 = vmatprep.subr.mxu0 %v8086_v16  ;;  %6108 = vmatpush3.msra.mxu1 %v7318_v4 }
 0x42c   :  { %6087 = vmatpush3.msra.mxu0 %v7321_v51  ;;  %6109 = vmatprep.subr.mxu1 %v8086_v16 }
 0x42d   :  { %6088 = vmatprep.subr.mxu0 %v8086_v16  ;;  %6110 = vmatpush3.msra.mxu1 %v7326_v53 }
 0x42e   :  { %6089 = vmatpush3.msra.mxu0 %v7329_v54  ;;  %6111 = vmatprep.subr.mxu1 %v8086_v16 }
 0x42f   :  { %6090 = vmatprep.subr.mxu0 %v8086_v16  ;;  %6112 = vmatpush3.msra.mxu1 %v7334_v55 }
 0x430   :  { %6091 = vmatpush3.msra.mxu0 %v7337_v56  ;;  %6113 = vmatprep.subr.mxu1 %v8086_v16 }
 0x431   :  { %6092 = vmatprep.subr.mxu0 %v8086_v16  ;;  %6114 = vmatpush3.msra.mxu1 %v7342_v57 }
 0x432   :  { %6093 = vmatpush3.msra.mxu0 %v7345_v58  ;;  %6115 = vmatprep.subr.mxu1 %v8086_v16 }
 0x433   :  { %6094 = vmatprep.subr.mxu0 %v8086_v16  ;;  %6116 = vmatpush3.msra.mxu1 %v7350_v59 }
 0x434   :  { %6095 = vmatpush3.msra.mxu0 %v7353_v60  ;;  %6117 = vmatprep.subr.mxu1 %v8086_v16 }
 0x435   :  { %6096 = vmatprep.subr.mxu0 %v8086_v16  ;;  %6118 = vmatpush3.msra.mxu1 %v7358_v61 }
 0x436   :  { %6097 = vmatpush3.msra.mxu0 %v7361_v19  ;;  %6119 = vmatprep.mubr.msk.f32.mxu1 %vm6864_vm0, %v8086_v16 }
 0x437   :  { %6127 = vmatprep.subr.mxu1 %v8086_v16  ;;  %6098 = vmatprep.subr.mxu0 %v8086_v16 }
 0x438   :  { %6099 = vmatpush3.msra.mxu0 %v7368_v20  ;;  %6100 = vmatprep.mubr.msk.f32.mxu0 %vm6864_vm0, %v8086_v16 }
 0x439   :  { %6122 = vmatprep.subr.mxu0 %v8086_v16 }
 0x4e2   :  { %v7374_v22 = vpop.f32.mrf.mxu1 }
 0x4e4   :  { %v6073_v23 = vpop.f32.mrf.mxu1 }
 0x4e5   :  { %v7376_v24 = vpop.f32.mrf.mxu0 }
 0x4e6   :  { %v1473_v25 = vpop.f32.mrf.mxu1 }
 0x4e7   :  { %v1516_v26 = vadd.f32 1e-16, %v1473_v25  ;;  %1486 = vperm.xlu1 %6573, %v1473_v25   ;;  %v6038_v27 = vpop.f32.mrf.mxu0 }
 0x4e8   :  { %v6083_v28 = vpop.f32.mrf.mxu1 }
 0x4e9   :  { %6644 = vrcp.f32 %v1516_v26  ;;  %v1403_v29 = vpop.f32.mrf.mxu0 }
 0x4ea   :  { %v1515_v30 = vadd.f32 1e-16, %v1403_v29  ;;  %1481 = vperm.xlu0 %6572, %v1403_v29  }
 0x4eb   :  { %v6078_v18 = vpop.f32.mrf.mxu0 }
 0x4ec   :  { %6646 = vrcp.f32 %v1515_v30 }
 0x4f6   :  { %v6645_v31 = vpop.eup %6644 }
 0x4f7   :  { %1526 = vperm.xlu0 %6572, %v6645_v31  }
 0x4f9   :  { %v6647_v32 = vpop.eup %6646 }
 0x4fa   :  { %1521 = vperm.xlu1 %6573, %v6647_v32  }
 0x4fb   :  { %6575 = vset.pattern.permute.xlu0 %v8084_v12 }
 0x4fc   :  { %1538 = vperm.xlu0 %6575, %v1473_v25  }
 0x4fe   :  { %6574 = vset.pattern.permute.xlu1 %v8084_v12 }
 0x4ff   :  { %1534 = vperm.xlu1 %6574, %v1403_v29  }
 0x500   :  { %6576 = vset.pattern.permute.xlu0 %v8107_v62 }
 0x501   :  { %1582 = vperm.xlu0 %6576, %v1403_v29  }
 0x503   :  { %1570 = vperm.xlu1 %6574, %v6647_v32  }
 0x505   :  { %1626 = vperm.xlu0 %6576, %v6645_v31  }
 0x507   :  { %1574 = vperm.xlu1 %6574, %v6645_v31  }
 0x509   :  { %6579 = vset.pattern.permute.xlu0 %v8108_v63 }
 0x50a   :  { %1638 = vperm.xlu0 %6579, %v1473_v25  }
 0x50b   :  { %6577 = vset.pattern.permute.xlu1 %v8107_v62 }
 0x50c   :  { %1586 = vperm.xlu1 %6577, %v1473_v25  }
 0x50e   :  { %6580 = vset.pattern.permute.xlu0 %v8109_v17 }
 0x510   :  { %1622 = vperm.xlu1 %6577, %v6647_v32  }
 0x514   :  { %6578 = vset.pattern.permute.xlu1 %v8108_v63 }
 0x515   :  { %1634 = vperm.xlu1 %6578, %v1403_v29  }
 0x519   :  { %1674 = vperm.xlu1 %6578, %v6647_v32  }
 0x51d   :  { %1678 = vperm.xlu1 %6578, %v6645_v31  }
 0x521   :  { %6581 = vset.pattern.permute.xlu1 %v8109_v17 }
 0x562   :  { %v1487_v35 = vpop.permute.xlu1 %1486 }
 0x563   :  { %v1490_v36 = vmul.f32 %v1487_v35, %v1478_v21 }
 0x565   :  { %v1494_v43 = vrot.slane %v1490_v36, 1  ;;  %v1482_v44 = vpop.permute.xlu0 %1481  ;;  %v1500_v48 = vrot.slane %v1490_v36, 2 }
 0x566   :  { %v1489_v46 = vmul.f32 %v1482_v44, %v1477_v0 }
 0x567   :  { %v1498_v15 = vadd.f32 %v1494_v43, %v1490_v36 }
 0x568   :  { %v1493_v3 = vrot.slane %v1489_v46, 1  ;;  %v1499_v8 = vrot.slane %v1489_v46, 2 }
 0x569   :  { %v1504_v5 = vadd.f32 %v1500_v48, %v1498_v15 }
 0x56a   :  { %v1497_v6 = vadd.f32 %v1493_v3, %v1489_v46 }
 0x56b   :  { %v1508_v2 = vrot.slane %v1504_v5, 1 }
 0x56c   :  { %v1503_v7 = vadd.f32 %v1499_v8, %v1497_v6 }
 0x56d   :  { %v1512_v9 = vsub.f32 %v7374_v22, %v1508_v2 }
 0x56e   :  { %v1507_v14 = vrot.slane %v1503_v7, 1 }
 0x56f   :  { %v1514_v45 = vadd.f32 1e-16, %v1512_v9 }
 0x570   :  { %v1511_v11 = vsub.f32 %v7376_v24, %v1507_v14 }
 0x572   :  { %v1527_v38 = vpop.permute.xlu0 %1526  ;;  %v1513_v13 = vadd.f32 1e-16, %v1511_v11 }
 0x573   :  { %v1530_v49 = vmul.f32 %v1527_v38, %v1514_v45 }
 0x575   :  { %1532 = vst.msk [vmem:[#allocation2 + $0x4] sm:$0x1] %vm541_vm3, %v1530_v49  ;;  %v1522_v40 = vpop.permute.xlu1 %1521 }
 0x576   :  { %v7389_v47 = vmul.f32 %v1522_v40, %v1513_v13 }
 0x577   :  { %v1539_v33 = vpop.permute.xlu0 %1538 }
 0x578   :  { %1531 = vst.msk [vmem:[#allocation2] sm:$0x1] %vm541_vm3, %v7389_v47  ;;  %v1544_v37 = vmul.f32 %v1539_v33, %v1478_v21  ;;  %v1542_v1 = vmul.f32 %v1539_v33, %v1530_v49 }
 0x57a   :  { %v1548_v41 = vrot.slane %v1544_v37, 2  ;;  %v1535_v42 = vpop.permute.xlu1 %1534  ;;  %v1554_v23 = vrot.slane %v1544_v37, 3 }
 0x57b   :  { %v1543_v34 = vmul.f32 %v1535_v42, %v1477_v0  ;;  %v1541_v25 = vmul.f32 %v1535_v42, %v7389_v47 }
 0x57c   :  { %v1552_v10 = vadd.f32 %v1548_v41, %v1542_v1  ;;  %v1583_v44 = vpop.permute.xlu0 %1582 }
 0x57d   :  { %v1547_v26 = vrot.slane %v1543_v34, 2  ;;  %v1553_v30 = vrot.slane %v1543_v34, 3  ;;  %v1601_v9 = vmul.f32 %v1583_v44, %v1477_v0  ;;  %v1589_v40 = vmul.f32 %v1583_v44, %v7389_v47 }
 0x57e   :  { %v1558_v27 = vadd.f32 %v1554_v23, %v1552_v10  ;;  %v1571_v28 = vpop.permute.xlu1 %1570 }
 0x57f   :  { %v1551_v29 = vadd.f32 %v1547_v26, %v1541_v25  ;;  %v1605_v1 = vrot.slane %v1601_v9, 3 }
 0x580   :  { %v1562_v18 = vrot.slane %v1558_v27, 7  ;;  %v1627_v11 = vpop.permute.xlu0 %1626 }
 0x581   :  { %v1557_v31 = vadd.f32 %v1553_v30, %v1551_v29 }
 0x582   :  { %v1566_v32 = vsub.f32 %v7374_v22, %v1562_v18  ;;  %v1575_v35 = vpop.permute.xlu1 %1574 }
 0x583   :  { %v1561_v36 = vrot.slane %v1557_v31, 7 }
 0x584   :  { %v1568_v43 = vadd.f32 1e-16, %v1566_v32 }
 0x585   :  { %v1565_v46 = vsub.f32 %v7376_v24, %v1561_v36  ;;  %v1639_v34 = vpop.permute.xlu0 %1638 }
 0x586   :  { %v1578_v15 = vmul.f32 %v1575_v35, %v1568_v43  ;;  %v1642_v31 = vmul.f32 %v1639_v34, %v1530_v49 }
 0x587   :  { %v1567_v48 = vadd.f32 1e-16, %v1565_v46  ;;  %v1587_v3 = vpop.permute.xlu1 %1586 }
 0x588   :  { %1580 = vst.msk [vmem:[#allocation2 + $0x4] sm:$0x2] %vm590_vm4, %v1578_v15  ;;  %v1592_v5 = vmul.f32 %v1587_v3, %v1578_v15  ;;  %v1602_v6 = vmul.f32 %v1587_v3, %v1478_v21  ;;  %v1590_v2 = vmul.f32 %v1587_v3, %v1530_v49  ;;  %v1644_v10 = vmul.f32 %v1639_v34, %v1578_v15 }
 0x589   :  { %v1577_v8 = vmul.f32 %v1571_v28, %v1567_v48 }
 0x58a   :  { %v1596_v7 = vrot.slane %v1592_v5, 1  ;;  %v1606_v38 = vrot.slane %v1602_v6, 3  ;;  %v1648_v29 = vrot.slane %v1644_v10, 1  ;;  %v7456_v10 = vld [vmem:[#allocation4 + $0xd0] sm:$0xff] }
 0x58b   :  { %1579 = vst.msk [vmem:[#allocation2] sm:$0x2] %vm590_vm4, %v1577_v8  ;;  %v1591_v14 = vmul.f32 %v1583_v44, %v1577_v8  ;;  %v1623_v13 = vpop.permute.xlu1 %1622 }
 0x58c   :  { %v1600_v45 = vadd.f32 %v1596_v7, %v1590_v2  ;;  %v1652_v43 = vadd.f32 %v1648_v29, %v1642_v31  ;;  %v7483_v29 = vld [vmem:[#allocation4 + $0x40] sm:$0xff]  ;;  %v7496_v31 = vld [vmem:[#allocation4 + $0xa8] sm:$0xff] }
 0x58d   :  { %v1595_v33 = vrot.slane %v1591_v14, 1  ;;  %8113 = vst [vmem:[#allocation18_spill] sm:$0xff] %v7483_v29  ;;  %8116 = vst [vmem:[#allocation21_spill] sm:$0xff] %v7496_v31 }
 0x58e   :  { %v1610_v37 = vadd.f32 %v1606_v38, %v1600_v45 }
 0x58f   :  { %v1599_v41 = vadd.f32 %v1595_v33, %v1589_v40  ;;  %v7423_v40 = vld [vmem:[#allocation4 + $0xf0] sm:$0xff]  ;;  %v7427_v33 = vld [vmem:[#allocation4 + $0x78] sm:$0xff] }
 0x590   :  { %v1614_v42 = vrot.slane %v1610_v37, 6  ;;  %v1635_v0 = vpop.permute.xlu1 %1634  ;;  %v7432_v37 = vld [vmem:[#allocation4 + $0xe8] sm:$0xff] }
 0x591   :  { %v1609_v21 = vadd.f32 %v1605_v1, %v1599_v41  ;;  %v1643_v28 = vmul.f32 %v1635_v0, %v1577_v8  ;;  %v1641_v46 = vmul.f32 %v1635_v0, %v7389_v47  ;;  %v7435_v1 = vld [vmem:[#allocation4 + $0x70] sm:$0xff]  ;;  %v7440_v41 = vld [vmem:[#allocation4 + $0xe0] sm:$0xff] }
 0x592   :  { %v1618_v23 = vsub.f32 %v7374_v22, %v1614_v42  ;;  %v7443_v42 = vld [vmem:[#allocation4 + $0x68] sm:$0xff] }
 0x593   :  { %v1613_v25 = vrot.slane %v1609_v21, 6  ;;  %v1647_v36 = vrot.slane %v1643_v28, 1  ;;  %v7451_v21 = vld [vmem:[#allocation4 + $0x60] sm:$0xff]  ;;  %v7480_v28 = vld [vmem:[#allocation4 + $0xb8] sm:$0xff] }
 0x594   :  { %v1620_v26 = vadd.f32 1e-16, %v1618_v23  ;;  %v1675_v6 = vpop.permute.xlu1 %1674  ;;  %v7459_v23 = vld [vmem:[#allocation4 + $0x58] sm:$0xff]  ;;  %8112 = vst [vmem:[#allocation17_spill] sm:$0xff] %v7480_v28 }
 0x595   :  { %v1617_v27 = vsub.f32 %v7376_v24, %v1613_v25  ;;  %v1651_v3 = vadd.f32 %v1647_v36, %v1641_v46  ;;  %v7467_v25 = vld [vmem:[#allocation4 + $0x50] sm:$0xff]  ;;  %v7507_v36 = vld [vmem:[#allocation4 + $0x28] sm:$0xff] }
 0x596   :  { %v1630_v30 = vmul.f32 %v1627_v11, %v1620_v26  ;;  %v7472_v26 = vld [vmem:[#allocation4 + $0xc0] sm:$0xff]  ;;  %8119 = vst [vmem:[#allocation24_spill] sm:$0xff] %v7507_v36  ;;  %v7520_v46 = vld [vmem:[#allocation4 + $0x90] sm:$0xff] }
 0x597   :  { %v1619_v18 = vadd.f32 1e-16, %v1617_v27  ;;  %8110 = vst [vmem:[#allocation15_spill] sm:$0xff] %v7472_v26  ;;  %v7475_v27 = vld [vmem:[#allocation4 + $0x48] sm:$0xff]  ;;  %8122 = vst [vmem:[#allocation27_spill] sm:$0xff] %v7520_v46 }
 0x598   :  { %1632 = vst.msk [vmem:[#allocation2 + $0x4] sm:$0x4] %vm643_vm5, %v1630_v30  ;;  %v1654_v32 = vmul.f32 %v1639_v34, %v1630_v30  ;;  %v1679_v11 = vpop.permute.xlu1 %1678  ;;  %v7448_v34 = vld [vmem:[#allocation4 + $0xd8] sm:$0xff]  ;;  %8111 = vst [vmem:[#allocation16_spill] sm:$0xff] %v7475_v27  ;;  %v7488_v30 = vld [vmem:[#allocation4 + $0xb0] sm:$0xff] }
 0x599   :  { %v1629_v35 = vmul.f32 %v1623_v13, %v1619_v18  ;;  %8114 = vst [vmem:[#allocation19_spill] sm:$0xff] %v7488_v30  ;;  %v7491_v18 = vld [vmem:[#allocation4 + $0x38] sm:$0xff] }
 0x59a   :  { %v1658_v44 = vrot.slane %v1654_v32, 2  ;;  %8115 = vst [vmem:[#allocation20_spill] sm:$0xff] %v7491_v18  ;;  %v7499_v32 = vld [vmem:[#allocation4 + $0x30] sm:$0xff] }
 0x59b   :  { %1631 = vst.msk [vmem:[#allocation2] sm:$0x4] %vm643_vm5, %v1629_v35  ;;  %v1653_v15 = vmul.f32 %v1635_v0, %v1629_v35  ;;  %v7464_v0 = vld [vmem:[#allocation4 + $0xc8] sm:$0xff]  ;;  %8117 = vst [vmem:[#allocation22_spill] sm:$0xff] %v7499_v32  ;;  %v7504_v35 = vld [vmem:[#allocation4 + $0xa0] sm:$0xff] }
 0x59c   :  { %v1662_v48 = vadd.f32 %v1658_v44, %v1652_v43  ;;  %8118 = vst [vmem:[#allocation23_spill] sm:$0xff] %v7504_v35  ;;  %v7512_v43 = vld [vmem:[#allocation4 + $0x98] sm:$0xff]  ;;  %v7515_v44 = vld [vmem:[#allocation4 + $0x20] sm:$0xff] }
 0x59d   :  { %v1657_v5 = vrot.slane %v1653_v15, 2  ;;  %8120 = vst [vmem:[#allocation25_spill] sm:$0xff] %v7512_v43  ;;  %8121 = vst [vmem:[#allocation26_spill] sm:$0xff] %v7515_v44  ;;  %v7523_v15 = vld [vmem:[#allocation4 + $0x18] sm:$0xff] }
 0x59e   :  { %v1666_v8 = vrot.slane %v1662_v48, 5  ;;  %8123 = vst [vmem:[#allocation28_spill] sm:$0xff] %v7523_v15  ;;  %v7528_v48 = vld [vmem:[#allocation4 + $0x88] sm:$0xff] }
 0x59f   :  { %v1661_v2 = vadd.f32 %v1657_v5, %v1651_v3  ;;  %8124 = vst [vmem:[#allocation29_spill] sm:$0xff] %v7528_v48  ;;  %v7531_v3 = vld [vmem:[#allocation4 + $0x10] sm:$0xff]  ;;  %v7536_v5 = vld [vmem:[#allocation4 + $0x80] sm:$0xff] }
 0x5a0   :  { %v1670_v49 = vsub.f32 %v7374_v22, %v1666_v8  ;;  %8125 = vst [vmem:[#allocation30_spill] sm:$0xff] %v7531_v3  ;;  %8126 = vst [vmem:[#allocation31_spill] sm:$0xff] %v7536_v5  ;;  %v7546_v8 = vld [vmem:[#allocation4] sm:$0xff] }
 0x5a1   :  { %v1665_v7 = vrot.slane %v1661_v2, 5  ;;  %8128 = vst [vmem:[#allocation33_spill] sm:$0xff] %v7546_v8 }
 0x5a2   :  { %v1672_v9 = vadd.f32 1e-16, %v1670_v49 }
 0x5a3   :  { %v1669_v14 = vsub.f32 %v7376_v24, %v1665_v7  ;;  %v7416_v24 = vld [vmem:[#allocation4 + $0xf8] sm:$0xff] }
 0x5a4   :  { %v1682_v45 = vmul.f32 %v1679_v11, %v1672_v9 }
 0x5a5   :  { %v1671_v38 = vadd.f32 1e-16, %v1669_v14 }
 0x5a6   :  { %1684 = vst.msk [vmem:[#allocation2 + $0x4] sm:$0x8] %vm696_vm6, %v1682_v45 }
 0x5a7   :  { %v1681_v13 = vmul.f32 %v1675_v6, %v1671_v38  ;;  %v7539_v6 = vld [vmem:[#allocation4 + $0x8] sm:$0xff] }
 0x5a8   :  { %8127 = vst [vmem:[#allocation32_spill] sm:$0xff] %v7539_v6 }
 0x5a9   :  { %1683 = vst.msk [vmem:[#allocation2] sm:$0x8] %vm696_vm6, %v1681_v13 }
 0x5ad   :  { %v1686_v47 = vld [vmem:[#allocation2 + $0x4] sm:$0xf] }
 0x5ae   :  { %6120 = vmatmul.mubr.msk.f32.vlgmr.msra.gmra.mxu1 %vm100_vm1, %v1686_v47 }
 0x5af   :  { %6128 = vmatpush3.xpose.msk.msra.mxu1 %vm100_vm1, %v1686_v47  ;;  %6129 = vmatprep.mubr.msk.f32.mxu1 %vm6864_vm0, %v8086_v16 }
 0x5b0   :  { %v1685_v22 = vld [vmem:[#allocation2] sm:$0xf]  ;;  %6167 = vmatprep.subr.mxu1 %v8086_v16 }
 0x5b1   :  { %6101 = vmatmul.mubr.msk.f32.vlgmr.msra.gmra.mxu0 %vm100_vm1, %v1685_v22 }
 0x5b2   :  { %6123 = vmatpush3.xpose.msk.msra.mxu0 %vm100_vm1, %v1685_v22  ;;  %6130 = vmatmul.mubr.msk.f32.vlgmr.msra.gmra.mxu1 %vm100_vm1, %v1686_v47 }
 0x5b3   :  { %6168 = vmatpush3.msra.mxu1 %v7416_v24  ;;  %6124 = vmatprep.mubr.msk.f32.mxu0 %vm6864_vm0, %v8086_v16 }
 0x5b4   :  { %6169 = vmatprep.subr.mxu1 %v8086_v16  ;;  %6132 = vmatprep.subr.mxu0 %v8086_v16 }
 0x5b5   :  { %6170 = vmatpush3.msra.mxu1 %v7423_v40  ;;  %6125 = vmatmul.mubr.msk.f32.vlgmr.msra.gmra.mxu0 %vm100_vm1, %v1685_v22 }
 0x5b6   :  { %6133 = vmatpush3.msra.mxu0 %v7427_v33  ;;  %6171 = vmatprep.subr.mxu1 %v8086_v16 }
 0x5b7   :  { %6134 = vmatprep.subr.mxu0 %v8086_v16  ;;  %6172 = vmatpush3.msra.mxu1 %v7432_v37 }
 0x5b8   :  { %6135 = vmatpush3.msra.mxu0 %v7435_v1  ;;  %6173 = vmatprep.subr.mxu1 %v8086_v16 }
 0x5b9   :  { %6136 = vmatprep.subr.mxu0 %v8086_v16  ;;  %6174 = vmatpush3.msra.mxu1 %v7440_v41 }
 0x5ba   :  { %6137 = vmatpush3.msra.mxu0 %v7443_v42  ;;  %6175 = vmatprep.subr.mxu1 %v8086_v16 }
 0x5bb   :  { %6138 = vmatprep.subr.mxu0 %v8086_v16  ;;  %6176 = vmatpush3.msra.mxu1 %v7448_v34 }
 0x5bc   :  { %6139 = vmatpush3.msra.mxu0 %v7451_v21  ;;  %6177 = vmatprep.subr.mxu1 %v8086_v16 }
 0x5bd   :  { %6140 = vmatprep.subr.mxu0 %v8086_v16  ;;  %6178 = vmatpush3.msra.mxu1 %v7456_v10 }
 0x5be   :  { %6141 = vmatpush3.msra.mxu0 %v7459_v23  ;;  %6179 = vmatprep.subr.mxu1 %v8086_v16 }
 0x5bf   :  { %6142 = vmatprep.subr.mxu0 %v8086_v16  ;;  %6180 = vmatpush3.msra.mxu1 %v7464_v0 }
 0x5c0   :  { %6143 = vmatpush3.msra.mxu0 %v7467_v25  ;;  %6181 = vmatprep.subr.mxu1 %v8086_v16 }
 0x5c1   :  { %6144 = vmatprep.subr.mxu0 %v8086_v16  ;;  %6182 = vmatpush3.msra.mxu1 %v7472_v26 }
 0x5c2   :  { %6145 = vmatpush3.msra.mxu0 %v7475_v27  ;;  %6183 = vmatprep.subr.mxu1 %v8086_v16 }
 0x5c3   :  { %6146 = vmatprep.subr.mxu0 %v8086_v16  ;;  %6184 = vmatpush3.msra.mxu1 %v7480_v28 }
 0x5c4   :  { %6147 = vmatpush3.msra.mxu0 %v7483_v29  ;;  %6185 = vmatprep.subr.mxu1 %v8086_v16 }
 0x5c5   :  { %6148 = vmatprep.subr.mxu0 %v8086_v16  ;;  %6186 = vmatpush3.msra.mxu1 %v7488_v30 }
 0x5c6   :  { %6149 = vmatpush3.msra.mxu0 %v7491_v18  ;;  %6187 = vmatprep.subr.mxu1 %v8086_v16 }
 0x5c7   :  { %6150 = vmatprep.subr.mxu0 %v8086_v16  ;;  %6188 = vmatpush3.msra.mxu1 %v7496_v31 }
 0x5c8   :  { %6151 = vmatpush3.msra.mxu0 %v7499_v32  ;;  %6189 = vmatprep.subr.mxu1 %v8086_v16 }
 0x5c9   :  { %6152 = vmatprep.subr.mxu0 %v8086_v16  ;;  %6190 = vmatpush3.msra.mxu1 %v7504_v35 }
 0x5ca   :  { %6153 = vmatpush3.msra.mxu0 %v7507_v36  ;;  %6191 = vmatprep.subr.mxu1 %v8086_v16 }
 0x5cb   :  { %6154 = vmatprep.subr.mxu0 %v8086_v16  ;;  %6192 = vmatpush3.msra.mxu1 %v7512_v43 }
 0x5cc   :  { %6155 = vmatpush3.msra.mxu0 %v7515_v44  ;;  %6193 = vmatprep.subr.mxu1 %v8086_v16 }
 0x5cd   :  { %6156 = vmatprep.subr.mxu0 %v8086_v16  ;;  %6194 = vmatpush3.msra.mxu1 %v7520_v46 }
 0x5ce   :  { %6157 = vmatpush3.msra.mxu0 %v7523_v15  ;;  %6195 = vmatprep.subr.mxu1 %v8086_v16 }
 0x5cf   :  { %6158 = vmatprep.subr.mxu0 %v8086_v16  ;;  %6196 = vmatpush3.msra.mxu1 %v7528_v48 }
 0x5d0   :  { %6159 = vmatpush3.msra.mxu0 %v7531_v3  ;;  %6197 = vmatprep.subr.mxu1 %v8086_v16 }
 0x5d1   :  { %6160 = vmatprep.subr.mxu0 %v8086_v16  ;;  %6198 = vmatpush3.msra.mxu1 %v7536_v5 }
 0x5d2   :  { %6161 = vmatpush3.msra.mxu0 %v7539_v6  ;;  %6199 = vmatprep.mubr.msk.f32.mxu1 %vm6864_vm0, %v8086_v16 }
 0x5d3   :  { %6162 = vmatprep.subr.mxu0 %v8086_v16  ;;  %6207 = vmatprep.subr.mxu1 %v8086_v16 }
 0x5d4   :  { %6163 = vmatpush3.msra.mxu0 %v7546_v8  ;;  %6164 = vmatprep.mubr.msk.f32.mxu0 %vm6864_vm0, %v8086_v16 }
 0x5d5   :  { %6202 = vmatprep.subr.mxu0 %v8086_v16  ;;  %v8129_v16 = vmov 1  }
 0x66e   :  { %v7552_v2 = vpop.f32.mrf.mxu1 }
 0x670   :  { %v6121_v49 = vpop.f32.mrf.mxu1 }
 0x671   :  { %v7554_v7 = vpop.f32.mrf.mxu0  ;;  %v1974_v49 = vld [vmem:[#allocation3 + $0x4] sm:$0xf] }
 0x672   :  { %v1969_v9 = vpop.f32.mrf.mxu1 }
 0x673   :  { %v2012_v14 = vadd.f32 1e-16, %v1969_v9  ;;  %1982 = vperm.xlu1 %6581, %v1969_v9   ;;  %v6102_v11 = vpop.f32.mrf.mxu0 }
 0x674   :  { %v6131_v45 = vpop.f32.mrf.mxu1 }
 0x675   :  { %6648 = vrcp.f32 %v2012_v14  ;;  %v1899_v38 = vpop.f32.mrf.mxu0  ;;  %v1973_v45 = vld [vmem:[#allocation3] sm:$0xf] }
 0x676   :  { %v2011_v13 = vadd.f32 1e-16, %v1899_v38  ;;  %1977 = vperm.xlu0 %6580, %v1899_v38  }
 0x677   :  { %v6126_v47 = vpop.f32.mrf.mxu0 }
 0x678   :  { %6650 = vrcp.f32 %v2011_v13 }
 0x682   :  { %v6649_v22 = vpop.eup %6648 }
 0x683   :  { %2022 = vperm.xlu0 %6580, %v6649_v22  }
 0x685   :  { %v6651_v12 = vpop.eup %6650 }
 0x686   :  { %2017 = vperm.xlu1 %6581, %v6651_v12  }
 0x687   :  { %6583 = vset.pattern.permute.xlu0 %v8129_v16 }
 0x688   :  { %2034 = vperm.xlu0 %6583, %v1969_v9  }
 0x68a   :  { %6582 = vset.pattern.permute.xlu1 %v8129_v16 }
 0x68b   :  { %2030 = vperm.xlu1 %6582, %v1899_v38  }
 0x68c   :  { %6584 = vset.pattern.permute.xlu0 %v8107_v62 }
 0x68d   :  { %2078 = vperm.xlu0 %6584, %v1899_v38  }
 0x68f   :  { %2066 = vperm.xlu1 %6582, %v6651_v12  }
 0x691   :  { %2122 = vperm.xlu0 %6584, %v6649_v22  }
 0x693   :  { %2070 = vperm.xlu1 %6582, %v6649_v22  }
 0x695   :  { %6587 = vset.pattern.permute.xlu0 %v8108_v63 }
 0x696   :  { %2134 = vperm.xlu0 %6587, %v1969_v9  }
 0x697   :  { %6585 = vset.pattern.permute.xlu1 %v8107_v62 }
 0x698   :  { %2082 = vperm.xlu1 %6585, %v1969_v9  }
 0x69a   :  { %6588 = vset.pattern.permute.xlu0 %v8109_v17 }
 0x69c   :  { %2118 = vperm.xlu1 %6585, %v6651_v12  }
 0x6a0   :  { %6586 = vset.pattern.permute.xlu1 %v8108_v63 }
 0x6a1   :  { %2130 = vperm.xlu1 %6586, %v1899_v38  }
 0x6a5   :  { %2170 = vperm.xlu1 %6586, %v6651_v12  }
 0x6a9   :  { %2174 = vperm.xlu1 %6586, %v6649_v22  }
 0x6ad   :  { %6589 = vset.pattern.permute.xlu1 %v8109_v17 }
 0x6ee   :  { %v1983_v14 = vpop.permute.xlu1 %1982 }
 0x6ef   :  { %v1986_v11 = vmul.f32 %v1983_v14, %v1974_v49 }
 0x6f1   :  { %v1990_v13 = vrot.slane %v1986_v11, 1  ;;  %v1978_v47 = vpop.permute.xlu0 %1977  ;;  %v1996_v5 = vrot.slane %v1986_v11, 2 }
 0x6f2   :  { %v1985_v8 = vmul.f32 %v1978_v47, %v1973_v45 }
 0x6f3   :  { %v1994_v6 = vadd.f32 %v1990_v13, %v1986_v11 }
 0x6f4   :  { %v1989_v9 = vrot.slane %v1985_v8, 1  ;;  %v1995_v15 = vrot.slane %v1985_v8, 2 }
 0x6f5   :  { %v2000_v3 = vadd.f32 %v1996_v5, %v1994_v6 }
 0x6f6   :  { %v1993_v48 = vadd.f32 %v1989_v9, %v1985_v8 }
 0x6f7   :  { %v2004_v46 = vrot.slane %v2000_v3, 1 }
 0x6f8   :  { %v1999_v44 = vadd.f32 %v1995_v15, %v1993_v48 }
 0x6f9   :  { %v2008_v12 = vsub.f32 %v7552_v2, %v2004_v46 }
 0x6fa   :  { %v2003_v38 = vrot.slane %v1999_v44, 1 }
 0x6fb   :  { %v2010_v43 = vadd.f32 1e-16, %v2008_v12 }
 0x6fc   :  { %v2007_v22 = vsub.f32 %v7554_v7, %v2003_v38 }
 0x6fe   :  { %v2023_v36 = vpop.permute.xlu0 %2022  ;;  %v2009_v35 = vadd.f32 1e-16, %v2007_v22 }
 0x6ff   :  { %v2026_v14 = vmul.f32 %v2023_v36, %v2010_v43 }
 0x701   :  { %2028 = vst [vmem:[#allocation3 + $0x4] sm:$0x1] %v2026_v14  ;;  %v2018_v32 = vpop.permute.xlu1 %2017 }
 0x702   :  { %v7566_v47 = vmul.f32 %v2018_v32, %v2009_v35 }
 0x703   :  { %v2035_v11 = vpop.permute.xlu0 %2034 }
 0x704   :  { %2027 = vst [vmem:[#allocation3] sm:$0x1] %v7566_v47  ;;  %v2040_v5 = vmul.f32 %v2035_v11, %v1974_v49  ;;  %v2038_v6 = vmul.f32 %v2035_v11, %v2026_v14 }
 0x706   :  { %v2044_v3 = vrot.slane %v2040_v5, 2  ;;  %v2031_v15 = vpop.permute.xlu1 %2030  ;;  %v2050_v44 = vrot.slane %v2040_v5, 3 }
 0x707   :  { %v2039_v48 = vmul.f32 %v2031_v15, %v1973_v45  ;;  %v2037_v8 = vmul.f32 %v2031_v15, %v7566_v47 }
 0x708   :  { %v2048_v46 = vadd.f32 %v2044_v3, %v2038_v6  ;;  %v2079_v11 = vpop.permute.xlu0 %2078 }
 0x709   :  { %v2043_v13 = vrot.slane %v2039_v48, 2  ;;  %v2049_v12 = vrot.slane %v2039_v48, 3  ;;  %v2097_v48 = vmul.f32 %v2079_v11, %v1973_v45 }
 0x70a   :  { %v2054_v9 = vadd.f32 %v2050_v44, %v2048_v46  ;;  %v2067_v36 = vpop.permute.xlu1 %2066 }
 0x70b   :  { %v2047_v43 = vadd.f32 %v2043_v13, %v2037_v8 }
 0x70c   :  { %v2058_v38 = vrot.slane %v2054_v9, 7  ;;  %v2123_v9 = vpop.permute.xlu0 %2122 }
 0x70d   :  { %v2053_v32 = vadd.f32 %v2049_v12, %v2047_v43 }
 0x70e   :  { %v2062_v35 = vsub.f32 %v7552_v2, %v2058_v38  ;;  %v2071_v22 = vpop.permute.xlu1 %2070 }
 0x70f   :  { %v2057_v31 = vrot.slane %v2053_v32, 7  ;;  %v2085_v32 = vmul.f32 %v2079_v11, %v7566_v47 }
 0x710   :  { %v2064_v18 = vadd.f32 1e-16, %v2062_v35 }
 0x711   :  { %v2061_v30 = vsub.f32 %v7554_v7, %v2057_v31  ;;  %v2135_v28 = vpop.permute.xlu0 %2134 }
 0x712   :  { %v2074_v29 = vmul.f32 %v2071_v22, %v2064_v18  ;;  %v2101_v18 = vrot.slane %v2097_v48, 3 }
 0x713   :  { %v2063_v6 = vadd.f32 1e-16, %v2061_v30  ;;  %v2083_v5 = vpop.permute.xlu1 %2082 }
 0x714   :  { %2076 = vst [vmem:[#allocation3 + $0x4] sm:$0x2] %v2074_v29  ;;  %v2088_v3 = vmul.f32 %v2083_v5, %v2074_v29  ;;  %v2098_v15 = vmul.f32 %v2083_v5, %v1974_v49  ;;  %v2086_v44 = vmul.f32 %v2083_v5, %v2026_v14  ;;  %v2140_v49 = vmul.f32 %v2135_v28, %v2074_v29 }
 0x715   :  { %v2073_v46 = vmul.f32 %v2067_v36, %v2063_v6 }
 0x716   :  { %v2092_v8 = vrot.slane %v2088_v3, 1  ;;  %v2102_v12 = vrot.slane %v2098_v15, 3  ;;  %v2144_v15 = vrot.slane %v2140_v49, 1 }
 0x717   :  { %2075 = vst [vmem:[#allocation3] sm:$0x2] %v2073_v46  ;;  %v2087_v13 = vmul.f32 %v2079_v11, %v2073_v46  ;;  %v2119_v38 = vpop.permute.xlu1 %2118  ;;  %v2138_v11 = vmul.f32 %v2135_v28, %v2026_v14 }
 0x718   :  { %v2096_v43 = vadd.f32 %v2092_v8, %v2086_v44 }
 0x719   :  { %v2091_v35 = vrot.slane %v2087_v13, 1 }
 0x71a   :  { %v2106_v31 = vadd.f32 %v2102_v12, %v2096_v43  ;;  %v2148_v12 = vadd.f32 %v2144_v15, %v2138_v11 }
 0x71b   :  { %v2095_v30 = vadd.f32 %v2091_v35, %v2085_v32 }
 0x71c   :  { %v2110_v22 = vrot.slane %v2106_v31, 6  ;;  %v2131_v6 = vpop.permute.xlu1 %2130 }
 0x71d   :  { %v2105_v27 = vadd.f32 %v2101_v18, %v2095_v30  ;;  %v2139_v44 = vmul.f32 %v2131_v6, %v2073_v46  ;;  %v2137_v29 = vmul.f32 %v2131_v6, %v7566_v47 }
 0x71e   :  { %v2114_v36 = vsub.f32 %v7552_v2, %v2110_v22 }
 0x71f   :  { %v2109_v45 = vrot.slane %v2105_v27, 6  ;;  %v2143_v43 = vrot.slane %v2139_v44, 1 }
 0x720   :  { %v2116_v5 = vadd.f32 1e-16, %v2114_v36  ;;  %v2171_v30 = vpop.permute.xlu1 %2170 }
 0x721   :  { %v2113_v3 = vsub.f32 %v7554_v7, %v2109_v45  ;;  %v2147_v27 = vadd.f32 %v2143_v43, %v2137_v29 }
 0x722   :  { %v2126_v8 = vmul.f32 %v2123_v9, %v2116_v5 }
 0x723   :  { %v2115_v26 = vadd.f32 1e-16, %v2113_v3 }
 0x724   :  { %2128 = vst [vmem:[#allocation3 + $0x4] sm:$0x4] %v2126_v8  ;;  %v2150_v13 = vmul.f32 %v2135_v28, %v2126_v8 }
 0x725   :  { %v2125_v48 = vmul.f32 %v2119_v38, %v2115_v26  ;;  %v2175_v26 = vpop.permute.xlu1 %2174 }
 0x726   :  { %v2154_v32 = vrot.slane %v2150_v13, 2 }
 0x727   :  { %2127 = vst [vmem:[#allocation3] sm:$0x4] %v2125_v48  ;;  %v2149_v35 = vmul.f32 %v2131_v6, %v2125_v48  ;;  %v8130_v6 = vmov 0.0  }
 0x728   :  { %v2158_v31 = vadd.f32 %v2154_v32, %v2148_v12 }
 0x729   :  { %v2153_v18 = vrot.slane %v2149_v35, 2 }
 0x72a   :  { %v2162_v22 = vrot.slane %v2158_v31, 5 }
 0x72b   :  { %v2157_v46 = vadd.f32 %v2153_v18, %v2147_v27 }
 0x72c   :  { %v2166_v9 = vsub.f32 %v7552_v2, %v2162_v22  ;;  %v2463_v2 = vld [vmem:[#allocation2] sm:$0xf] }
 0x72d   :  { %v2161_v49 = vrot.slane %v2157_v46, 5 }
 0x72e   :  { %v2168_v14 = vadd.f32 1e-16, %v2166_v9 }
 0x72f   :  { %v2165_v28 = vsub.f32 %v7554_v7, %v2161_v49 }
 0x730   :  { %v2178_v38 = vmul.f32 %v2175_v26, %v2168_v14 }
 0x731   :  { %v2167_v36 = vadd.f32 1e-16, %v2165_v28 }
 0x732   :  { %2180 = vst [vmem:[#allocation3 + $0x4] sm:$0x8] %v2178_v38 }
 0x733   :  { %v2177_v45 = vmul.f32 %v2171_v30, %v2167_v36 }
 0x735   :  { %2179 = vst [vmem:[#allocation3] sm:$0x8] %v2177_v45 }
 0x739   :  { %v2182_v47 = vld [vmem:[#allocation3 + $0x4] sm:$0xf] }
 0x73a   :  { %6200 = vmatmul.mubr.f32.vlgmr.msra.gmra.mxu1 %v2182_v47 }
 0x73b   :  { %6208 = vmatpush3.xpose.msra.mxu1 %v2182_v47  ;;  %6209 = vmatprep.mubr.msk.f32.mxu1 %vm6864_vm0, %v8130_v6 }
 0x73c   :  { %v2181_v5 = vld [vmem:[#allocation3] sm:$0xf]  ;;  %6231 = vmatprep.subr.mxu1 %v8130_v6 }
 0x73d   :  { %6165 = vmatmul.mubr.f32.vlgmr.msra.gmra.mxu0 %v2181_v5 }
 0x73e   :  { %6203 = vmatpush3.xpose.msra.mxu0 %v2181_v5  ;;  %6210 = vmatmul.mubr.f32.vlgmr.msra.gmra.mxu1 %v2182_v47 }
 0x73f   :  { %6204 = vmatprep.mubr.msk.f32.mxu0 %vm6864_vm0, %v8130_v6  ;;  %6232 = vmatpush3.msra.mxu1 %v7305_v50 }
 0x740   :  { %6233 = vmatprep.subr.mxu1 %v8130_v6  ;;  %6212 = vmatprep.subr.mxu0 %v8130_v6 }
 0x741   :  { %6205 = vmatmul.mubr.f32.vlgmr.msra.gmra.mxu0 %v2181_v5  ;;  %6234 = vmatpush3.msra.mxu1 %v7310_v52 }
 0x742   :  { %6213 = vmatpush3.msra.mxu0 %v7313_v39  ;;  %6235 = vmatprep.subr.mxu1 %v8130_v6 }
 0x743   :  { %6214 = vmatprep.subr.mxu0 %v8130_v6  ;;  %6236 = vmatpush3.msra.mxu1 %v7318_v4 }
 0x744   :  { %6215 = vmatpush3.msra.mxu0 %v7321_v51  ;;  %6237 = vmatprep.subr.mxu1 %v8130_v6 }
 0x745   :  { %6216 = vmatprep.subr.mxu0 %v8130_v6  ;;  %6238 = vmatpush3.msra.mxu1 %v7326_v53 }
 0x746   :  { %6217 = vmatpush3.msra.mxu0 %v7329_v54  ;;  %6239 = vmatprep.subr.mxu1 %v8130_v6 }
 0x747   :  { %6218 = vmatprep.subr.mxu0 %v8130_v6  ;;  %6240 = vmatpush3.msra.mxu1 %v7334_v55 }
 0x748   :  { %6219 = vmatpush3.msra.mxu0 %v7337_v56  ;;  %6241 = vmatprep.subr.mxu1 %v8130_v6 }
 0x749   :  { %6220 = vmatprep.subr.mxu0 %v8130_v6  ;;  %6242 = vmatpush3.msra.mxu1 %v7342_v57 }
 0x74a   :  { %6221 = vmatpush3.msra.mxu0 %v7345_v58  ;;  %6243 = vmatprep.subr.mxu1 %v8130_v6 }
 0x74b   :  { %6222 = vmatprep.subr.mxu0 %v8130_v6  ;;  %6244 = vmatpush3.msra.mxu1 %v7350_v59 }
 0x74c   :  { %6223 = vmatpush3.msra.mxu0 %v7353_v60  ;;  %6245 = vmatprep.subr.mxu1 %v8130_v6  ;;  %v2464_v60 = vld [vmem:[#allocation2 + $0x4] sm:$0xf] }
 0x74d   :  { %6224 = vmatprep.subr.mxu0 %v8130_v6  ;;  %6246 = vmatpush3.msra.mxu1 %v7358_v61 }
 0x74e   :  { %6225 = vmatpush3.msra.mxu0 %v7361_v19  ;;  %6247 = vmatprep.mubr.msk.f32.mxu1 %vm6864_vm0, %v8130_v6 }
 0x74f   :  { %6255 = vmatprep.subr.mxu1 %v8130_v6  ;;  %6226 = vmatprep.subr.mxu0 %v8130_v6 }
 0x750   :  { %6227 = vmatpush3.msra.mxu0 %v7368_v20  ;;  %6228 = vmatprep.mubr.msk.f32.mxu0 %vm6864_vm0, %v8130_v6 }
 0x751   :  { %6250 = vmatprep.subr.mxu0 %v8130_v6 }
 0x7fa   :  { %v7620_v50 = vpop.f32.mrf.mxu1 }
 0x7fc   :  { %v6201_v52 = vpop.f32.mrf.mxu1 }
 0x7fd   :  { %v7622_v39 = vpop.f32.mrf.mxu0 }
 0x7fe   :  { %v2459_v4 = vpop.f32.mrf.mxu1 }
 0x7ff   :  { %v2502_v51 = vadd.f32 1e-16, %v2459_v4  ;;  %2472 = vperm.xlu1 %6589, %v2459_v4   ;;  %v6166_v53 = vpop.f32.mrf.mxu0 }
 0x800   :  { %v6211_v54 = vpop.f32.mrf.mxu1 }
 0x801   :  { %6652 = vrcp.f32 %v2502_v51  ;;  %v2389_v55 = vpop.f32.mrf.mxu0 }
 0x802   :  { %v2501_v56 = vadd.f32 1e-16, %v2389_v55  ;;  %2467 = vperm.xlu0 %6588, %v2389_v55  }
 0x803   :  { %v6206_v57 = vpop.f32.mrf.mxu0 }
 0x804   :  { %6654 = vrcp.f32 %v2501_v56 }
 0x80e   :  { %v6653_v58 = vpop.eup %6652 }
 0x80f   :  { %2512 = vperm.xlu0 %6588, %v6653_v58  }
 0x811   :  { %v6655_v59 = vpop.eup %6654 }
 0x812   :  { %2507 = vperm.xlu1 %6589, %v6655_v59  }
 0x813   :  { %6591 = vset.pattern.permute.xlu0 %v8129_v16 }
 0x814   :  { %2524 = vperm.xlu0 %6591, %v2459_v4  }
 0x816   :  { %6590 = vset.pattern.permute.xlu1 %v8129_v16 }
 0x817   :  { %2520 = vperm.xlu1 %6590, %v2389_v55  }
 0x818   :  { %6592 = vset.pattern.permute.xlu0 %v8107_v62 }
 0x819   :  { %2568 = vperm.xlu0 %6592, %v2389_v55  }
 0x81b   :  { %2556 = vperm.xlu1 %6590, %v6655_v59  }
 0x81d   :  { %2612 = vperm.xlu0 %6592, %v6653_v58  }
 0x81f   :  { %2560 = vperm.xlu1 %6590, %v6653_v58  }
 0x821   :  { %6595 = vset.pattern.permute.xlu0 %v8108_v63 }
 0x822   :  { %2624 = vperm.xlu0 %6595, %v2459_v4  }
 0x823   :  { %6593 = vset.pattern.permute.xlu1 %v8107_v62 }
 0x824   :  { %2572 = vperm.xlu1 %6593, %v2459_v4  }
 0x826   :  { %6596 = vset.pattern.permute.xlu0 %v8109_v17 }
 0x828   :  { %2608 = vperm.xlu1 %6593, %v6655_v59  }
 0x82c   :  { %6594 = vset.pattern.permute.xlu1 %v8108_v63 }
 0x82d   :  { %2620 = vperm.xlu1 %6594, %v2389_v55  }
 0x831   :  { %2660 = vperm.xlu1 %6594, %v6655_v59  }
 0x835   :  { %2664 = vperm.xlu1 %6594, %v6653_v58  }
 0x839   :  { %6597 = vset.pattern.permute.xlu1 %v8109_v17 }
 0x87a   :  { %v2473_v61 = vpop.permute.xlu1 %2472 }
 0x87b   :  { %v2476_v19 = vmul.f32 %v2473_v61, %v2464_v60 }
 0x87d   :  { %v2480_v20 = vrot.slane %v2476_v19, 1  ;;  %v2468_v7 = vpop.permute.xlu0 %2467  ;;  %v2486_v15 = vrot.slane %v2476_v19, 2 }
 0x87e   :  { %v2475_v3 = vmul.f32 %v2468_v7, %v2463_v2 }
 0x87f   :  { %v2484_v44 = vadd.f32 %v2480_v20, %v2476_v19 }
 0x880   :  { %v2479_v8 = vrot.slane %v2475_v3, 1  ;;  %v2485_v48 = vrot.slane %v2475_v3, 2 }
 0x881   :  { %v2490_v11 = vadd.f32 %v2486_v15, %v2484_v44 }
 0x882   :  { %v2483_v13 = vadd.f32 %v2479_v8, %v2475_v3 }
 0x883   :  { %v2494_v43 = vrot.slane %v2490_v11, 1 }
 0x884   :  { %v2489_v12 = vadd.f32 %v2485_v48, %v2483_v13 }
 0x885   :  { %v2498_v32 = vsub.f32 %v7620_v50, %v2494_v43 }
 0x886   :  { %v2493_v29 = vrot.slane %v2489_v12, 1 }
 0x887   :  { %v2500_v31 = vadd.f32 1e-16, %v2498_v32 }
 0x888   :  { %v2497_v35 = vsub.f32 %v7622_v39, %v2493_v29 }
 0x88a   :  { %v2513_v27 = vpop.permute.xlu0 %2512  ;;  %v2499_v30 = vadd.f32 1e-16, %v2497_v35 }
 0x88b   :  { %v2516_v18 = vmul.f32 %v2513_v27, %v2500_v31 }
 0x88d   :  { %2518 = vst.msk [vmem:[#allocation2 + $0x4] sm:$0x1] %vm541_vm3, %v2516_v18  ;;  %v2508_v22 = vpop.permute.xlu1 %2507 }
 0x88e   :  { %v7635_v46 = vmul.f32 %v2508_v22, %v2499_v30 }
 0x88f   :  { %v2525_v9 = vpop.permute.xlu0 %2524 }
 0x890   :  { %2517 = vst.msk [vmem:[#allocation2] sm:$0x1] %vm541_vm3, %v7635_v46  ;;  %v2530_v49 = vmul.f32 %v2525_v9, %v2464_v60  ;;  %v2528_v14 = vmul.f32 %v2525_v9, %v2516_v18 }
 0x892   :  { %v2534_v28 = vrot.slane %v2530_v49, 2  ;;  %v2521_v26 = vpop.permute.xlu1 %2520  ;;  %v2540_v45 = vrot.slane %v2530_v49, 3 }
 0x893   :  { %v2529_v38 = vmul.f32 %v2521_v26, %v2463_v2  ;;  %v2527_v47 = vmul.f32 %v2521_v26, %v7635_v46 }
 0x894   :  { %v2538_v36 = vadd.f32 %v2534_v28, %v2528_v14  ;;  %v2569_v61 = vpop.permute.xlu0 %2568 }
 0x895   :  { %v2533_v5 = vrot.slane %v2529_v38, 2  ;;  %v2539_v53 = vrot.slane %v2529_v38, 3  ;;  %v2587_v48 = vmul.f32 %v2569_v61, %v2463_v2  ;;  %v2575_v31 = vmul.f32 %v2569_v61, %v7635_v46 }
 0x896   :  { %v2544_v52 = vadd.f32 %v2540_v45, %v2538_v36  ;;  %v2557_v4 = vpop.permute.xlu1 %2556 }
 0x897   :  { %v2537_v51 = vadd.f32 %v2533_v5, %v2527_v47  ;;  %v2591_v22 = vrot.slane %v2587_v48, 3 }
 0x898   :  { %v2548_v54 = vrot.slane %v2544_v52, 7  ;;  %v2613_v12 = vpop.permute.xlu0 %2612 }
 0x899   :  { %v2543_v55 = vadd.f32 %v2539_v53, %v2537_v51 }
 0x89a   :  { %v2552_v56 = vsub.f32 %v7620_v50, %v2548_v54  ;;  %v2561_v57 = vpop.permute.xlu1 %2560 }
 0x89b   :  { %v2547_v58 = vrot.slane %v2543_v55, 7 }
 0x89c   :  { %v2554_v59 = vadd.f32 1e-16, %v2552_v56 }
 0x89d   :  { %v2551_v19 = vsub.f32 %v7622_v39, %v2547_v58  ;;  %v2625_v14 = vpop.permute.xlu0 %2624 }
 0x89e   :  { %v2564_v20 = vmul.f32 %v2561_v57, %v2554_v59  ;;  %v2628_v51 = vmul.f32 %v2625_v14, %v2516_v18 }
 0x89f   :  { %v2553_v7 = vadd.f32 1e-16, %v2551_v19  ;;  %v2573_v3 = vpop.permute.xlu1 %2572 }
 0x8a0   :  { %2566 = vst.msk [vmem:[#allocation2 + $0x4] sm:$0x2] %vm590_vm4, %v2564_v20  ;;  %v2578_v44 = vmul.f32 %v2573_v3, %v2564_v20  ;;  %v2588_v15 = vmul.f32 %v2573_v3, %v2464_v60  ;;  %v2576_v11 = vmul.f32 %v2573_v3, %v2516_v18  ;;  %v2630_v28 = vmul.f32 %v2625_v14, %v2564_v20 }
 0x8a1   :  { %v2563_v8 = vmul.f32 %v2557_v4, %v2553_v7 }
 0x8a2   :  { %v2582_v13 = vrot.slane %v2578_v44, 1  ;;  %v2592_v29 = vrot.slane %v2588_v15, 3  ;;  %v2634_v5 = vrot.slane %v2630_v28, 1 }
 0x8a3   :  { %2565 = vst.msk [vmem:[#allocation2] sm:$0x2] %vm590_vm4, %v2563_v8  ;;  %v2577_v43 = vmul.f32 %v2569_v61, %v2563_v8  ;;  %v2609_v35 = vpop.permute.xlu1 %2608 }
 0x8a4   :  { %v2586_v32 = vadd.f32 %v2582_v13, %v2576_v11  ;;  %v2638_v56 = vadd.f32 %v2634_v5, %v2628_v51  ;;  %v2959_v51 = vld [vmem:[#allocation3] sm:$0xf] }
 0x8a5   :  { %v2581_v27 = vrot.slane %v2577_v43, 1 }
 0x8a6   :  { %v2596_v30 = vadd.f32 %v2592_v29, %v2586_v32  ;;  %v8145_v32 = vld [vmem:[#allocation29_spill] sm:$0xff]  ;;  %v8146_v29 = vld [vmem:[#allocation30_spill] sm:$0xff] }
 0x8a7   :  { %v2585_v9 = vadd.f32 %v2581_v27, %v2575_v31  ;;  %v8148_v31 = vld [vmem:[#allocation32_spill] sm:$0xff]  ;;  %v8149_v27 = vld [vmem:[#allocation33_spill] sm:$0xff] }
 0x8a8   :  { %v2600_v49 = vrot.slane %v2596_v30, 6  ;;  %v2621_v2 = vpop.permute.xlu1 %2620 }
 0x8a9   :  { %v2595_v60 = vadd.f32 %v2591_v22, %v2585_v9  ;;  %v2629_v47 = vmul.f32 %v2621_v2, %v2563_v8  ;;  %v2627_v58 = vmul.f32 %v2621_v2, %v7635_v46 }
 0x8aa   :  { %v2604_v26 = vsub.f32 %v7620_v50, %v2600_v49 }
 0x8ab   :  { %v2599_v38 = vrot.slane %v2595_v60, 6  ;;  %v2633_v55 = vrot.slane %v2629_v47, 1  ;;  %v2960_v47 = vld [vmem:[#allocation3 + $0x4] sm:$0xf] }
 0x8ac   :  { %v2606_v36 = vadd.f32 1e-16, %v2604_v26  ;;  %v2661_v7 = vpop.permute.xlu1 %2660 }
 0x8ad   :  { %v2603_v45 = vsub.f32 %v7622_v39, %v2599_v38  ;;  %v2637_v19 = vadd.f32 %v2633_v55, %v2627_v58 }
 0x8ae   :  { %v2616_v52 = vmul.f32 %v2613_v12, %v2606_v36 }
 0x8af   :  { %v2605_v4 = vadd.f32 1e-16, %v2603_v45 }
 0x8b0   :  { %2618 = vst.msk [vmem:[#allocation2 + $0x4] sm:$0x4] %vm643_vm5, %v2616_v52  ;;  %v2640_v53 = vmul.f32 %v2625_v14, %v2616_v52  ;;  %v2665_v13 = vpop.permute.xlu1 %2664 }
 0x8b1   :  { %v2615_v54 = vmul.f32 %v2609_v35, %v2605_v4  ;;  %v8147_v35 = vld [vmem:[#allocation31_spill] sm:$0xff] }
 0x8b2   :  { %v2644_v57 = vrot.slane %v2640_v53, 2 }
 0x8b3   :  { %2617 = vst.msk [vmem:[#allocation2] sm:$0x4] %vm643_vm5, %v2615_v54  ;;  %v2639_v59 = vmul.f32 %v2621_v2, %v2615_v54 }
 0x8b4   :  { %v2648_v61 = vadd.f32 %v2644_v57, %v2638_v56 }
 0x8b5   :  { %v2643_v20 = vrot.slane %v2639_v59, 2 }
 0x8b6   :  { %v2652_v3 = vrot.slane %v2648_v61, 5 }
 0x8b7   :  { %v2647_v44 = vadd.f32 %v2643_v20, %v2637_v19 }
 0x8b8   :  { %v2656_v18 = vsub.f32 %v7620_v50, %v2652_v3 }
 0x8b9   :  { %v2651_v15 = vrot.slane %v2647_v44, 5 }
 0x8ba   :  { %v2658_v8 = vadd.f32 1e-16, %v2656_v18 }
 0x8bb   :  { %v2655_v11 = vsub.f32 %v7622_v39, %v2651_v15  ;;  %v8144_v39 = vld [vmem:[#allocation28_spill] sm:$0xff] }
 0x8bc   :  { %v2668_v48 = vmul.f32 %v2665_v13, %v2658_v8 }
 0x8bd   :  { %v2657_v43 = vadd.f32 1e-16, %v2655_v11 }
 0x8be   :  { %2670 = vst.msk [vmem:[#allocation2 + $0x4] sm:$0x8] %vm696_vm6, %v2668_v48 }
 0x8bf   :  { %v2667_v12 = vmul.f32 %v2661_v7, %v2657_v43 }
 0x8c1   :  { %2669 = vst.msk [vmem:[#allocation2] sm:$0x8] %vm696_vm6, %v2667_v12 }
 0x8c5   :  { %v2672_v46 = vld [vmem:[#allocation2 + $0x4] sm:$0xf] }
 0x8c6   :  { %6248 = vmatmul.mubr.msk.f32.vlgmr.msra.gmra.mxu1 %vm100_vm1, %v2672_v46 }
 0x8c7   :  { %6256 = vmatpush3.xpose.msk.msra.mxu1 %vm100_vm1, %v2672_v46  ;;  %6257 = vmatprep.mubr.msk.f32.mxu1 %vm6864_vm0, %v8130_v6 }
 0x8c8   :  { %v2671_v50 = vld [vmem:[#allocation2] sm:$0xf]  ;;  %6295 = vmatprep.subr.mxu1 %v8130_v6 }
 0x8c9   :  { %6229 = vmatmul.mubr.msk.f32.vlgmr.msra.gmra.mxu0 %vm100_vm1, %v2671_v50 }
 0x8ca   :  { %6251 = vmatpush3.xpose.msk.msra.mxu0 %vm100_vm1, %v2671_v50  ;;  %6258 = vmatmul.mubr.msk.f32.vlgmr.msra.gmra.mxu1 %vm100_vm1, %v2672_v46 }
 0x8cb   :  { %6296 = vmatpush3.msra.mxu1 %v7416_v24  ;;  %6252 = vmatprep.mubr.msk.f32.mxu0 %vm6864_vm0, %v8130_v6  ;;  %v8131_v24 = vld [vmem:[#allocation15_spill] sm:$0xff] }
 0x8cc   :  { %6297 = vmatprep.subr.mxu1 %v8130_v6  ;;  %6260 = vmatprep.subr.mxu0 %v8130_v6 }
 0x8cd   :  { %6298 = vmatpush3.msra.mxu1 %v7423_v40  ;;  %6253 = vmatmul.mubr.msk.f32.vlgmr.msra.gmra.mxu0 %vm100_vm1, %v2671_v50  ;;  %v8132_v40 = vld [vmem:[#allocation16_spill] sm:$0xff] }
 0x8ce   :  { %6261 = vmatpush3.msra.mxu0 %v7427_v33  ;;  %6299 = vmatprep.subr.mxu1 %v8130_v6  ;;  %v8133_v33 = vld [vmem:[#allocation17_spill] sm:$0xff] }
 0x8cf   :  { %6262 = vmatprep.subr.mxu0 %v8130_v6  ;;  %6300 = vmatpush3.msra.mxu1 %v7432_v37  ;;  %v8134_v37 = vld [vmem:[#allocation18_spill] sm:$0xff] }
 0x8d0   :  { %6263 = vmatpush3.msra.mxu0 %v7435_v1  ;;  %6301 = vmatprep.subr.mxu1 %v8130_v6  ;;  %v8135_v1 = vld [vmem:[#allocation19_spill] sm:$0xff] }
 0x8d1   :  { %6264 = vmatprep.subr.mxu0 %v8130_v6  ;;  %6302 = vmatpush3.msra.mxu1 %v7440_v41  ;;  %v8136_v41 = vld [vmem:[#allocation20_spill] sm:$0xff] }
 0x8d2   :  { %6265 = vmatpush3.msra.mxu0 %v7443_v42  ;;  %6303 = vmatprep.subr.mxu1 %v8130_v6  ;;  %v8137_v42 = vld [vmem:[#allocation21_spill] sm:$0xff] }
 0x8d3   :  { %6266 = vmatprep.subr.mxu0 %v8130_v6  ;;  %6304 = vmatpush3.msra.mxu1 %v7448_v34  ;;  %v8138_v34 = vld [vmem:[#allocation22_spill] sm:$0xff] }
 0x8d4   :  { %6267 = vmatpush3.msra.mxu0 %v7451_v21  ;;  %6305 = vmatprep.subr.mxu1 %v8130_v6  ;;  %v8139_v21 = vld [vmem:[#allocation23_spill] sm:$0xff] }
 0x8d5   :  { %6268 = vmatprep.subr.mxu0 %v8130_v6  ;;  %6306 = vmatpush3.msra.mxu1 %v7456_v10  ;;  %v8140_v10 = vld [vmem:[#allocation24_spill] sm:$0xff] }
 0x8d6   :  { %6269 = vmatpush3.msra.mxu0 %v7459_v23  ;;  %6307 = vmatprep.subr.mxu1 %v8130_v6  ;;  %v8141_v23 = vld [vmem:[#allocation25_spill] sm:$0xff] }
 0x8d7   :  { %6270 = vmatprep.subr.mxu0 %v8130_v6  ;;  %6308 = vmatpush3.msra.mxu1 %v7464_v0  ;;  %v8142_v0 = vld [vmem:[#allocation26_spill] sm:$0xff] }
 0x8d8   :  { %6271 = vmatpush3.msra.mxu0 %v7467_v25  ;;  %6309 = vmatprep.subr.mxu1 %v8130_v6  ;;  %v8143_v25 = vld [vmem:[#allocation27_spill] sm:$0xff] }
 0x8d9   :  { %6272 = vmatprep.subr.mxu0 %v8130_v6  ;;  %6310 = vmatpush3.msra.mxu1 %v8131_v24 }
 0x8da   :  { %6273 = vmatpush3.msra.mxu0 %v8132_v40  ;;  %6311 = vmatprep.subr.mxu1 %v8130_v6 }
 0x8db   :  { %6274 = vmatprep.subr.mxu0 %v8130_v6  ;;  %6312 = vmatpush3.msra.mxu1 %v8133_v33 }
 0x8dc   :  { %6275 = vmatpush3.msra.mxu0 %v8134_v37  ;;  %6313 = vmatprep.subr.mxu1 %v8130_v6 }
 0x8dd   :  { %6276 = vmatprep.subr.mxu0 %v8130_v6  ;;  %6314 = vmatpush3.msra.mxu1 %v8135_v1 }
 0x8de   :  { %6277 = vmatpush3.msra.mxu0 %v8136_v41  ;;  %6315 = vmatprep.subr.mxu1 %v8130_v6 }
 0x8df   :  { %6278 = vmatprep.subr.mxu0 %v8130_v6  ;;  %6316 = vmatpush3.msra.mxu1 %v8137_v42 }
 0x8e0   :  { %6279 = vmatpush3.msra.mxu0 %v8138_v34  ;;  %6317 = vmatprep.subr.mxu1 %v8130_v6 }
 0x8e1   :  { %6280 = vmatprep.subr.mxu0 %v8130_v6  ;;  %6318 = vmatpush3.msra.mxu1 %v8139_v21 }
 0x8e2   :  { %6281 = vmatpush3.msra.mxu0 %v8140_v10  ;;  %6319 = vmatprep.subr.mxu1 %v8130_v6 }
 0x8e3   :  { %6282 = vmatprep.subr.mxu0 %v8130_v6  ;;  %6320 = vmatpush3.msra.mxu1 %v8141_v23 }
 0x8e4   :  { %6283 = vmatpush3.msra.mxu0 %v8142_v0  ;;  %6321 = vmatprep.subr.mxu1 %v8130_v6 }
 0x8e5   :  { %6284 = vmatprep.subr.mxu0 %v8130_v6  ;;  %6322 = vmatpush3.msra.mxu1 %v8143_v25 }
 0x8e6   :  { %6285 = vmatpush3.msra.mxu0 %v8144_v39  ;;  %6323 = vmatprep.subr.mxu1 %v8130_v6 }
 0x8e7   :  { %6286 = vmatprep.subr.mxu0 %v8130_v6  ;;  %6324 = vmatpush3.msra.mxu1 %v8145_v32 }
 0x8e8   :  { %6287 = vmatpush3.msra.mxu0 %v8146_v29  ;;  %6325 = vmatprep.subr.mxu1 %v8130_v6 }
 0x8e9   :  { %6288 = vmatprep.subr.mxu0 %v8130_v6  ;;  %6326 = vmatpush3.msra.mxu1 %v8147_v35 }
 0x8ea   :  { %6289 = vmatpush3.msra.mxu0 %v8148_v31  ;;  %6327 = vmatprep.mubr.msk.f32.mxu1 %vm6864_vm0, %v8130_v6 }
 0x8eb   :  { %6290 = vmatprep.subr.mxu0 %v8130_v6  ;;  %6335 = vmatprep.subr.mxu1 %v8130_v6 }
 0x8ec   :  { %6291 = vmatpush3.msra.mxu0 %v8149_v27  ;;  %6292 = vmatprep.mubr.msk.f32.mxu0 %vm6864_vm0, %v8130_v6 }
 0x8ed   :  { %6330 = vmatprep.subr.mxu0 %v8130_v6 }
 0x986   :  { %v7734_v30 = vpop.f32.mrf.mxu1 }
 0x988   :  { %v6249_v22 = vpop.f32.mrf.mxu1 }
 0x989   :  { %v7736_v9 = vpop.f32.mrf.mxu0 }
 0x98a   :  { %v2955_v49 = vpop.f32.mrf.mxu1 }
 0x98b   :  { %v2998_v14 = vadd.f32 1e-16, %v2955_v49  ;;  %2968 = vperm.xlu1 %6597, %v2955_v49   ;;  %v6230_v60 = vpop.f32.mrf.mxu0 }
 0x98c   :  { %v6259_v28 = vpop.f32.mrf.mxu1 }
 0x98d   :  { %6656 = vrcp.f32 %v2998_v14  ;;  %v2885_v26 = vpop.f32.mrf.mxu0 }
 0x98e   :  { %v2997_v2 = vadd.f32 1e-16, %v2885_v26  ;;  %2963 = vperm.xlu0 %6596, %v2885_v26  }
 0x98f   :  { %v6254_v38 = vpop.f32.mrf.mxu0 }
 0x990   :  { %6658 = vrcp.f32 %v2997_v2 }
 0x99a   :  { %v6657_v36 = vpop.eup %6656 }
 0x99b   :  { %3008 = vperm.xlu0 %6596, %v6657_v36  }
 0x99d   :  { %v6659_v45 = vpop.eup %6658 }
 0x99e   :  { %3003 = vperm.xlu1 %6597, %v6659_v45  }
 0x99f   :  { %6599 = vset.pattern.permute.xlu0 %v8129_v16 }
 0x9a0   :  { %3020 = vperm.xlu0 %6599, %v2955_v49  }
 0x9a2   :  { %6598 = vset.pattern.permute.xlu1 %v8129_v16 }
 0x9a3   :  { %3016 = vperm.xlu1 %6598, %v2885_v26  }
 0x9a4   :  { %6600 = vset.pattern.permute.xlu0 %v8107_v62 }
 0x9a5   :  { %3064 = vperm.xlu0 %6600, %v2885_v26  }
 0x9a7   :  { %3052 = vperm.xlu1 %6598, %v6659_v45  }
 0x9a9   :  { %3108 = vperm.xlu0 %6600, %v6657_v36  }
 0x9ab   :  { %3056 = vperm.xlu1 %6598, %v6657_v36  }
 0x9ad   :  { %6603 = vset.pattern.permute.xlu0 %v8108_v63 }
 0x9ae   :  { %3120 = vperm.xlu0 %6603, %v2955_v49  }
 0x9af   :  { %6601 = vset.pattern.permute.xlu1 %v8107_v62 }
 0x9b0   :  { %3068 = vperm.xlu1 %6601, %v2955_v49  }
 0x9b2   :  { %6604 = vset.pattern.permute.xlu0 %v8109_v17 }
 0x9b4   :  { %3104 = vperm.xlu1 %6601, %v6659_v45  }
 0x9b8   :  { %6602 = vset.pattern.permute.xlu1 %v8108_v63 }
 0x9b9   :  { %3116 = vperm.xlu1 %6602, %v2885_v26  }
 0x9bd   :  { %3156 = vperm.xlu1 %6602, %v6659_v45  }
 0x9c1   :  { %3160 = vperm.xlu1 %6602, %v6657_v36  }
 0x9c5   :  { %6605 = vset.pattern.permute.xlu1 %v8109_v17 }
 0xa06   :  { %v2969_v5 = vpop.permute.xlu1 %2968 }
 0xa07   :  { %v2972_v52 = vmul.f32 %v2969_v5, %v2960_v47 }
 0xa09   :  { %v2976_v4 = vrot.slane %v2972_v52, 1  ;;  %v2964_v53 = vpop.permute.xlu0 %2963  ;;  %v2982_v56 = vrot.slane %v2972_v52, 2 }
 0xa0a   :  { %v2971_v54 = vmul.f32 %v2964_v53, %v2959_v51 }
 0xa0b   :  { %v2980_v55 = vadd.f32 %v2976_v4, %v2972_v52 }
 0xa0c   :  { %v2975_v57 = vrot.slane %v2971_v54, 1  ;;  %v2981_v61 = vrot.slane %v2971_v54, 2 }
 0xa0d   :  { %v2986_v58 = vadd.f32 %v2982_v56, %v2980_v55 }
 0xa0e   :  { %v2979_v59 = vadd.f32 %v2975_v57, %v2971_v54 }
 0xa0f   :  { %v2990_v19 = vrot.slane %v2986_v58, 1 }
 0xa10   :  { %v2985_v20 = vadd.f32 %v2981_v61, %v2979_v59 }
 0xa11   :  { %v2994_v7 = vsub.f32 %v7734_v30, %v2990_v19 }
 0xa12   :  { %v2989_v3 = vrot.slane %v2985_v20, 1 }
 0xa13   :  { %v2996_v18 = vadd.f32 1e-16, %v2994_v7 }
 0xa14   :  { %v2993_v44 = vsub.f32 %v7736_v9, %v2989_v3 }
 0xa16   :  { %v3009_v15 = vpop.permute.xlu0 %3008  ;;  %v2995_v11 = vadd.f32 1e-16, %v2993_v44 }
 0xa17   :  { %v3012_v8 = vmul.f32 %v3009_v15, %v2996_v18 }
 0xa19   :  { %3014 = vst [vmem:[#allocation3 + $0x4] sm:$0x1] %v3012_v8  ;;  %v3004_v13 = vpop.permute.xlu1 %3003 }
 0xa1a   :  { %v7748_v48 = vmul.f32 %v3004_v13, %v2995_v11 }
 0xa1b   :  { %v3021_v43 = vpop.permute.xlu0 %3020 }
 0xa1c   :  { %3013 = vst [vmem:[#allocation3] sm:$0x1] %v7748_v48  ;;  %v3026_v12 = vmul.f32 %v3021_v43, %v2960_v47  ;;  %v3024_v46 = vmul.f32 %v3021_v43, %v3012_v8 }
 0xa1e   :  { %v3030_v50 = vrot.slane %v3026_v12, 2  ;;  %v3017_v24 = vpop.permute.xlu1 %3016  ;;  %v3036_v37 = vrot.slane %v3026_v12, 3 }
 0xa1f   :  { %v3025_v40 = vmul.f32 %v3017_v24, %v2959_v51  ;;  %v3023_v1 = vmul.f32 %v3017_v24, %v7748_v48 }
 0xa20   :  { %v3034_v33 = vadd.f32 %v3030_v50, %v3024_v46  ;;  %v3065_v35 = vpop.permute.xlu0 %3064 }
 0xa21   :  { %v3029_v41 = vrot.slane %v3025_v40, 2  ;;  %v3035_v10 = vrot.slane %v3025_v40, 3  ;;  %v3083_v38 = vmul.f32 %v3065_v35, %v2959_v51  ;;  %v3071_v53 = vmul.f32 %v3065_v35, %v7748_v48 }
 0xa22   :  { %v3053_v42 = vpop.permute.xlu1 %3052  ;;  %v3040_v34 = vadd.f32 %v3036_v37, %v3034_v33 }
 0xa23   :  { %v3033_v21 = vadd.f32 %v3029_v41, %v3023_v1  ;;  %v3087_v56 = vrot.slane %v3083_v38, 3  ;;  %v7810_v38 = vld [vmem:[#allocation5 + $0x48] sm:$0xff] }
 0xa24   :  { %v3044_v23 = vrot.slane %v3040_v34, 7  ;;  %v3109_v45 = vpop.permute.xlu0 %3108 }
 0xa25   :  { %v3039_v0 = vadd.f32 %v3035_v10, %v3033_v21 }
 0xa26   :  { %v3048_v25 = vsub.f32 %v7734_v30, %v3044_v23  ;;  %v3057_v39 = vpop.permute.xlu1 %3056 }
 0xa27   :  { %v3043_v32 = vrot.slane %v3039_v0, 7 }
 0xa28   :  { %v3050_v29 = vadd.f32 1e-16, %v3048_v25 }
 0xa29   :  { %v3047_v31 = vsub.f32 %v7736_v9, %v3043_v32  ;;  %v3121_v59 = vpop.permute.xlu0 %3120 }
 0xa2a   :  { %v3060_v27 = vmul.f32 %v3057_v39, %v3050_v29  ;;  %v3124_v13 = vmul.f32 %v3121_v59, %v3012_v8 }
 0xa2b   :  { %v3049_v22 = vadd.f32 1e-16, %v3047_v31  ;;  %v3069_v49 = vpop.permute.xlu1 %3068  ;;  %v7773_v31 = vld [vmem:[#allocation5 + $0x38] sm:$0xff] }
 0xa2c   :  { %3062 = vst [vmem:[#allocation3 + $0x4] sm:$0x2] %v3060_v27  ;;  %v3074_v14 = vmul.f32 %v3069_v49, %v3060_v27  ;;  %v3084_v60 = vmul.f32 %v3069_v49, %v2960_v47  ;;  %v3072_v26 = vmul.f32 %v3069_v49, %v3012_v8  ;;  %v3126_v47 = vmul.f32 %v3121_v59, %v3060_v27  ;;  %v7778_v27 = vld [vmem:[#allocation5 + $0x68] sm:$0xff]  ;;  %v7786_v49 = vld [vmem:[#allocation5 + $0x60] sm:$0xff] }
 0xa2d   :  { %v3059_v28 = vmul.f32 %v3053_v42, %v3049_v22  ;;  %v7781_v22 = vld [vmem:[#allocation5 + $0x30] sm:$0xff] }
 0xa2e   :  { %v3078_v2 = vrot.slane %v3074_v14, 1  ;;  %v3088_v52 = vrot.slane %v3084_v60, 3  ;;  %v3130_v18 = vrot.slane %v3126_v47, 1  ;;  %v7789_v14 = vld [vmem:[#allocation5 + $0x28] sm:$0xff]  ;;  %v7794_v60 = vld [vmem:[#allocation5 + $0x58] sm:$0xff] }
 0xa2f   :  { %3061 = vst [vmem:[#allocation3] sm:$0x2] %v3059_v28  ;;  %v3073_v36 = vmul.f32 %v3065_v35, %v3059_v28  ;;  %v3105_v4 = vpop.permute.xlu1 %3104 }
 0xa30   :  { %v3082_v5 = vadd.f32 %v3078_v2, %v3072_v26  ;;  %v3134_v50 = vadd.f32 %v3130_v18, %v3124_v13  ;;  %v7802_v26 = vld [vmem:[#allocation5 + $0x50] sm:$0xff]  ;;  %v7805_v2 = vld [vmem:[#allocation5 + $0x18] sm:$0xff] }
 0xa31   :  { %v3077_v54 = vrot.slane %v3073_v36, 1  ;;  %v7813_v36 = vld [vmem:[#allocation5 + $0x10] sm:$0xff] }
 0xa32   :  { %v3092_v55 = vadd.f32 %v3088_v52, %v3082_v5  ;;  %v7821_v5 = vld [vmem:[#allocation5 + $0x8] sm:$0xff]  ;;  %v7828_v52 = vld [vmem:[#allocation5] sm:$0xff]  ;;  %v3449_v18 = vld [vmem:[#allocation2] sm:$0xf] }
 0xa33   :  { %v3081_v57 = vadd.f32 %v3077_v54, %v3071_v53 }
 0xa34   :  { %v3096_v58 = vrot.slane %v3092_v55, 6  ;;  %v3117_v20 = vpop.permute.xlu1 %3116 }
 0xa35   :  { %v3091_v61 = vadd.f32 %v3087_v56, %v3081_v57  ;;  %v3125_v44 = vmul.f32 %v3117_v20, %v3059_v28  ;;  %v3123_v40 = vmul.f32 %v3117_v20, %v7748_v48  ;;  %v7797_v28 = vld [vmem:[#allocation5 + $0x20] sm:$0xff] }
 0xa36   :  { %v3100_v19 = vsub.f32 %v7734_v30, %v3096_v58 }
 0xa37   :  { %v3095_v51 = vrot.slane %v3091_v61, 6  ;;  %v3129_v46 = vrot.slane %v3125_v44, 1 }
 0xa38   :  { %v3102_v7 = vadd.f32 1e-16, %v3100_v19  ;;  %v3157_v42 = vpop.permute.xlu1 %3156 }
 0xa39   :  { %v3099_v3 = vsub.f32 %v7736_v9, %v3095_v51  ;;  %v3133_v1 = vadd.f32 %v3129_v46, %v3123_v40  ;;  %v3450_v51 = vld [vmem:[#allocation2 + $0x4] sm:$0xf] }
 0xa3a   :  { %v3112_v15 = vmul.f32 %v3109_v45, %v3102_v7  ;;  %v7818_v45 = vld [vmem:[#allocation5 + $0x40] sm:$0xff] }
 0xa3b   :  { %v3101_v11 = vadd.f32 1e-16, %v3099_v3 }
 0xa3c   :  { %3114 = vst [vmem:[#allocation3 + $0x4] sm:$0x4] %v3112_v15  ;;  %v3136_v43 = vmul.f32 %v3121_v59, %v3112_v15  ;;  %v3161_v25 = vpop.permute.xlu1 %3160 }
 0xa3d   :  { %v3111_v12 = vmul.f32 %v3105_v4, %v3101_v11 }
 0xa3e   :  { %v3140_v24 = vrot.slane %v3136_v43, 2 }
 0xa3f   :  { %3113 = vst [vmem:[#allocation3] sm:$0x4] %v3111_v12  ;;  %v3135_v33 = vmul.f32 %v3117_v20, %v3111_v12 }
 0xa40   :  { %v3144_v37 = vadd.f32 %v3140_v24, %v3134_v50 }
 0xa41   :  { %v3139_v41 = vrot.slane %v3135_v33, 2 }
 0xa42   :  { %v3148_v34 = vrot.slane %v3144_v37, 5 }
 0xa43   :  { %v3143_v21 = vadd.f32 %v3139_v41, %v3133_v1 }
 0xa44   :  { %v3152_v10 = vsub.f32 %v7734_v30, %v3148_v34  ;;  %v7765_v30 = vld [vmem:[#allocation5 + $0x78] sm:$0xff] }
 0xa45   :  { %v3147_v23 = vrot.slane %v3143_v21, 5 }
 0xa46   :  { %v3154_v8 = vadd.f32 1e-16, %v3152_v10 }
 0xa47   :  { %v3151_v0 = vsub.f32 %v7736_v9, %v3147_v23  ;;  %v7770_v9 = vld [vmem:[#allocation5 + $0x70] sm:$0xff] }
 0xa48   :  { %v3164_v39 = vmul.f32 %v3161_v25, %v3154_v8 }
 0xa49   :  { %v3153_v32 = vadd.f32 1e-16, %v3151_v0 }
 0xa4a   :  { %3166 = vst [vmem:[#allocation3 + $0x4] sm:$0x8] %v3164_v39 }
 0xa4b   :  { %v3163_v29 = vmul.f32 %v3157_v42, %v3153_v32 }
 0xa4d   :  { %3165 = vst [vmem:[#allocation3] sm:$0x8] %v3163_v29 }
 0xa51   :  { %v3168_v48 = vld [vmem:[#allocation3 + $0x4] sm:$0xf] }
 0xa52   :  { %6328 = vmatmul.mubr.f32.vlgmr.msra.gmra.mxu1 %v3168_v48 }
 0xa53   :  { %6336 = vmatpush3.xpose.msra.mxu1 %v3168_v48  ;;  %6337 = vmatprep.mubr.msk.f32.mxu1 %vm6864_vm0, %v8130_v6 }
 0xa54   :  { %v3167_v35 = vld [vmem:[#allocation3] sm:$0xf]  ;;  %6359 = vmatprep.subr.mxu1 %v8130_v6 }
 0xa55   :  { %6293 = vmatmul.mubr.f32.vlgmr.msra.gmra.mxu0 %v3167_v35 }
 0xa56   :  { %6331 = vmatpush3.xpose.msra.mxu0 %v3167_v35  ;;  %6338 = vmatmul.mubr.f32.vlgmr.msra.gmra.mxu1 %v3168_v48 }
 0xa57   :  { %6332 = vmatprep.mubr.msk.f32.mxu0 %vm6864_vm0, %v8130_v6  ;;  %6360 = vmatpush3.msra.mxu1 %v7765_v30 }
 0xa58   :  { %6361 = vmatprep.subr.mxu1 %v8130_v6  ;;  %6340 = vmatprep.subr.mxu0 %v8130_v6 }
 0xa59   :  { %6333 = vmatmul.mubr.f32.vlgmr.msra.gmra.mxu0 %v3167_v35  ;;  %6362 = vmatpush3.msra.mxu1 %v7770_v9 }
 0xa5a   :  { %6341 = vmatpush3.msra.mxu0 %v7773_v31  ;;  %6363 = vmatprep.subr.mxu1 %v8130_v6 }
 0xa5b   :  { %6342 = vmatprep.subr.mxu0 %v8130_v6  ;;  %6364 = vmatpush3.msra.mxu1 %v7778_v27 }
 0xa5c   :  { %6343 = vmatpush3.msra.mxu0 %v7781_v22  ;;  %6365 = vmatprep.subr.mxu1 %v8130_v6 }
 0xa5d   :  { %6344 = vmatprep.subr.mxu0 %v8130_v6  ;;  %6366 = vmatpush3.msra.mxu1 %v7786_v49 }
 0xa5e   :  { %6345 = vmatpush3.msra.mxu0 %v7789_v14  ;;  %6367 = vmatprep.subr.mxu1 %v8130_v6 }
 0xa5f   :  { %6346 = vmatprep.subr.mxu0 %v8130_v6  ;;  %6368 = vmatpush3.msra.mxu1 %v7794_v60 }
 0xa60   :  { %6347 = vmatpush3.msra.mxu0 %v7797_v28  ;;  %6369 = vmatprep.subr.mxu1 %v8130_v6 }
 0xa61   :  { %6348 = vmatprep.subr.mxu0 %v8130_v6  ;;  %6370 = vmatpush3.msra.mxu1 %v7802_v26 }
 0xa62   :  { %6349 = vmatpush3.msra.mxu0 %v7805_v2  ;;  %6371 = vmatprep.subr.mxu1 %v8130_v6 }
 0xa63   :  { %6350 = vmatprep.subr.mxu0 %v8130_v6  ;;  %6372 = vmatpush3.msra.mxu1 %v7810_v38 }
 0xa64   :  { %6351 = vmatpush3.msra.mxu0 %v7813_v36  ;;  %6373 = vmatprep.subr.mxu1 %v8130_v6 }
 0xa65   :  { %6352 = vmatprep.subr.mxu0 %v8130_v6  ;;  %6374 = vmatpush3.msra.mxu1 %v7818_v45 }
 0xa66   :  { %6353 = vmatpush3.msra.mxu0 %v7821_v5  ;;  %6375 = vmatprep.mubr.msk.f32.mxu1 %vm6864_vm0, %v8130_v6 }
 0xa67   :  { %6383 = vmatprep.subr.mxu1 %v8130_v6  ;;  %6354 = vmatprep.subr.mxu0 %v8130_v6 }
 0xa68   :  { %6355 = vmatpush3.msra.mxu0 %v7828_v52  ;;  %6356 = vmatprep.mubr.msk.f32.mxu0 %vm6864_vm0, %v8130_v6 }
 0xa69   :  { %6378 = vmatprep.subr.mxu0 %v8130_v6 }
 0xb12   :  { %v7834_v4 = vpop.f32.mrf.mxu1 }
 0xb14   :  { %v6329_v53 = vpop.f32.mrf.mxu1 }
 0xb15   :  { %v7836_v54 = vpop.f32.mrf.mxu0 }
 0xb16   :  { %v3445_v55 = vpop.f32.mrf.mxu1 }
 0xb17   :  { %v3488_v56 = vadd.f32 1e-16, %v3445_v55  ;;  %3458 = vperm.xlu1 %6605, %v3445_v55   ;;  %v6294_v57 = vpop.f32.mrf.mxu0 }
 0xb18   :  { %v6339_v58 = vpop.f32.mrf.mxu1 }
 0xb19   :  { %6660 = vrcp.f32 %v3488_v56  ;;  %v3375_v59 = vpop.f32.mrf.mxu0 }
 0xb1a   :  { %v3487_v61 = vadd.f32 1e-16, %v3375_v59  ;;  %3453 = vperm.xlu0 %6604, %v3375_v59  }
 0xb1b   :  { %v6334_v47 = vpop.f32.mrf.mxu0 }
 0xb1c   :  { %6662 = vrcp.f32 %v3487_v61 }
 0xb26   :  { %v6661_v19 = vpop.eup %6660 }
 0xb27   :  { %3498 = vperm.xlu0 %6604, %v6661_v19  }
 0xb29   :  { %v6663_v20 = vpop.eup %6662 }
 0xb2a   :  { %3493 = vperm.xlu1 %6605, %v6663_v20  }
 0xb2b   :  { %6607 = vset.pattern.permute.xlu0 %v8129_v16 }
 0xb2c   :  { %3510 = vperm.xlu0 %6607, %v3445_v55  }
 0xb2e   :  { %6606 = vset.pattern.permute.xlu1 %v8129_v16 }
 0xb2f   :  { %3506 = vperm.xlu1 %6606, %v3375_v59  }
 0xb30   :  { %6608 = vset.pattern.permute.xlu0 %v8107_v62 }
 0xb31   :  { %3554 = vperm.xlu0 %6608, %v3375_v59  }
 0xb33   :  { %3542 = vperm.xlu1 %6606, %v6663_v20  }
 0xb35   :  { %3598 = vperm.xlu0 %6608, %v6661_v19  }
 0xb37   :  { %3546 = vperm.xlu1 %6606, %v6661_v19  }
 0xb39   :  { %6611 = vset.pattern.permute.xlu0 %v8108_v63 }
 0xb3a   :  { %3610 = vperm.xlu0 %6611, %v3445_v55  }
 0xb3b   :  { %6609 = vset.pattern.permute.xlu1 %v8107_v62 }
 0xb3c   :  { %3558 = vperm.xlu1 %6609, %v3445_v55  }
 0xb3e   :  { %6612 = vset.pattern.permute.xlu0 %v8109_v17 }
 0xb40   :  { %3594 = vperm.xlu1 %6609, %v6663_v20  }
 0xb44   :  { %6610 = vset.pattern.permute.xlu1 %v8108_v63 }
 0xb45   :  { %3606 = vperm.xlu1 %6610, %v3375_v59  }
 0xb49   :  { %3646 = vperm.xlu1 %6610, %v6663_v20  }
 0xb4d   :  { %3650 = vperm.xlu1 %6610, %v6661_v19  }
 0xb51   :  { %6613 = vset.pattern.permute.xlu1 %v8109_v17 }
 0xb92   :  { %v3459_v7 = vpop.permute.xlu1 %3458 }
 0xb93   :  { %v3462_v3 = vmul.f32 %v3459_v7, %v3450_v51 }
 0xb95   :  { %v3466_v44 = vrot.slane %v3462_v3, 1  ;;  %v3454_v15 = vpop.permute.xlu0 %3453  ;;  %v3472_v43 = vrot.slane %v3462_v3, 2 }
 0xb96   :  { %v3461_v11 = vmul.f32 %v3454_v15, %v3449_v18 }
 0xb97   :  { %v3470_v13 = vadd.f32 %v3466_v44, %v3462_v3 }
 0xb98   :  { %v3465_v12 = vrot.slane %v3461_v11, 1  ;;  %v3471_v24 = vrot.slane %v3461_v11, 2 }
 0xb99   :  { %v3476_v46 = vadd.f32 %v3472_v43, %v3470_v13 }
 0xb9a   :  { %v3469_v50 = vadd.f32 %v3465_v12, %v3461_v11 }
 0xb9b   :  { %v3480_v40 = vrot.slane %v3476_v46, 1 }
 0xb9c   :  { %v3475_v33 = vadd.f32 %v3471_v24, %v3469_v50 }
 0xb9d   :  { %v3484_v37 = vsub.f32 %v7834_v4, %v3480_v40 }
 0xb9e   :  { %v3479_v1 = vrot.slane %v3475_v33, 1 }
 0xb9f   :  { %v3486_v42 = vadd.f32 1e-16, %v3484_v37 }
 0xba0   :  { %v3483_v41 = vsub.f32 %v7836_v54, %v3479_v1 }
 0xba2   :  { %v3499_v34 = vpop.permute.xlu0 %3498  ;;  %v3485_v10 = vadd.f32 1e-16, %v3483_v41 }
 0xba3   :  { %v3502_v21 = vmul.f32 %v3499_v34, %v3486_v42 }
 0xba5   :  { %3504 = vst.msk [vmem:[#allocation2 + $0x4] sm:$0x1] %vm541_vm3, %v3502_v21  ;;  %v3494_v23 = vpop.permute.xlu1 %3493 }
 0xba6   :  { %v7849_v8 = vmul.f32 %v3494_v23, %v3485_v10 }
 0xba7   :  { %v3511_v0 = vpop.permute.xlu0 %3510 }
 0xba8   :  { %3503 = vst.msk [vmem:[#allocation2] sm:$0x1] %vm541_vm3, %v7849_v8  ;;  %v3516_v25 = vmul.f32 %v3511_v0, %v3450_v51  ;;  %v3514_v39 = vmul.f32 %v3511_v0, %v3502_v21 }
 0xbaa   :  { %v3520_v32 = vrot.slane %v3516_v25, 2  ;;  %v3507_v29 = vpop.permute.xlu1 %3506  ;;  %v3526_v53 = vrot.slane %v3516_v25, 3 }
 0xbab   :  { %v3515_v48 = vmul.f32 %v3507_v29, %v3449_v18  ;;  %v3513_v55 = vmul.f32 %v3507_v29, %v7849_v8 }
 0xbac   :  { %v3524_v35 = vadd.f32 %v3520_v32, %v3514_v39  ;;  %v3555_v15 = vpop.permute.xlu0 %3554 }
 0xbad   :  { %v3519_v56 = vrot.slane %v3515_v48, 2  ;;  %v3525_v61 = vrot.slane %v3515_v48, 3  ;;  %v3573_v37 = vmul.f32 %v3555_v15, %v3449_v18  ;;  %v3561_v23 = vmul.f32 %v3555_v15, %v7849_v8 }
 0xbae   :  { %v3543_v57 = vpop.permute.xlu1 %3542  ;;  %v3530_v58 = vadd.f32 %v3526_v53, %v3524_v35 }
 0xbaf   :  { %v3523_v59 = vadd.f32 %v3519_v56, %v3513_v55  ;;  %v3577_v39 = vrot.slane %v3573_v37, 3 }
 0xbb0   :  { %v3534_v47 = vrot.slane %v3530_v58, 7  ;;  %v3599_v41 = vpop.permute.xlu0 %3598 }
 0xbb1   :  { %v3529_v19 = vadd.f32 %v3525_v61, %v3523_v59 }
 0xbb2   :  { %v3538_v20 = vsub.f32 %v7834_v4, %v3534_v47  ;;  %v3547_v7 = vpop.permute.xlu1 %3546 }
 0xbb3   :  { %v3533_v3 = vrot.slane %v3529_v19, 7 }
 0xbb4   :  { %v3540_v44 = vadd.f32 1e-16, %v3538_v20 }
 0xbb5   :  { %v3537_v11 = vsub.f32 %v7836_v54, %v3533_v3  ;;  %v3611_v48 = vpop.permute.xlu0 %3610 }
 0xbb6   :  { %v3550_v13 = vmul.f32 %v3547_v7, %v3540_v44  ;;  %v3614_v19 = vmul.f32 %v3611_v48, %v3502_v21 }
 0xbb7   :  { %v3539_v43 = vadd.f32 1e-16, %v3537_v11  ;;  %v3559_v12 = vpop.permute.xlu1 %3558 }
 0xbb8   :  { %3552 = vst.msk [vmem:[#allocation2 + $0x4] sm:$0x2] %vm590_vm4, %v3550_v13  ;;  %v3564_v46 = vmul.f32 %v3559_v12, %v3550_v13  ;;  %v3574_v50 = vmul.f32 %v3559_v12, %v3450_v51  ;;  %v3562_v40 = vmul.f32 %v3559_v12, %v3502_v21  ;;  %v3616_v35 = vmul.f32 %v3611_v48, %v3550_v13 }
 0xbb9   :  { %v3549_v24 = vmul.f32 %v3543_v57, %v3539_v43 }
 0xbba   :  { %v3568_v33 = vrot.slane %v3564_v46, 1  ;;  %v3578_v34 = vrot.slane %v3574_v50, 3  ;;  %v3620_v59 = vrot.slane %v3616_v35, 1  ;;  %v6749_v35 = vld [vmem:[#allocation4 + $0xd0] sm:$0xff] }
 0xbbb   :  { %v3563_v1 = vmul.f32 %v3555_v15, %v3549_v24  ;;  %3551 = vst.msk [vmem:[#allocation2] sm:$0x2] %vm590_vm4, %v3549_v24  ;;  %v3595_v10 = vpop.permute.xlu1 %3594 }
 0xbbc   :  { %v3572_v42 = vadd.f32 %v3568_v33, %v3562_v40  ;;  %v3624_v44 = vadd.f32 %v3620_v59, %v3614_v19  ;;  %v6756_v59 = vld [vmem:[#allocation4 + $0x40] sm:$0xff]  ;;  %v6759_v19 = vld [vmem:[#allocation4 + $0xa8] sm:$0xff] }
 0xbbd   :  { %v3567_v0 = vrot.slane %v3563_v1, 1 }
 0xbbe   :  { %v3582_v25 = vadd.f32 %v3578_v34, %v3572_v42 }
 0xbbf   :  { %v3571_v32 = vadd.f32 %v3567_v0, %v3561_v23  ;;  %v6741_v23 = vld [vmem:[#allocation4 + $0xf0] sm:$0xff]  ;;  %v6742_v0 = vld [vmem:[#allocation4 + $0x78] sm:$0xff] }
 0xbc0   :  { %v3586_v29 = vrot.slane %v3582_v25, 6  ;;  %v3607_v18 = vpop.permute.xlu1 %3606  ;;  %v6743_v25 = vld [vmem:[#allocation4 + $0xe8] sm:$0xff] }
 0xbc1   :  { %v3581_v51 = vadd.f32 %v3577_v39, %v3571_v32  ;;  %v3615_v58 = vmul.f32 %v3607_v18, %v3549_v24  ;;  %v3613_v11 = vmul.f32 %v3607_v18, %v7849_v8  ;;  %v6744_v39 = vld [vmem:[#allocation4 + $0x70] sm:$0xff]  ;;  %v6745_v32 = vld [vmem:[#allocation4 + $0xe0] sm:$0xff] }
 0xbc2   :  { %v3590_v53 = vsub.f32 %v7834_v4, %v3586_v29  ;;  %v6746_v29 = vld [vmem:[#allocation4 + $0x68] sm:$0xff] }
 0xbc3   :  { %v3585_v55 = vrot.slane %v3581_v51, 6  ;;  %v3619_v3 = vrot.slane %v3615_v58, 1  ;;  %v6748_v51 = vld [vmem:[#allocation4 + $0x60] sm:$0xff]  ;;  %v6755_v58 = vld [vmem:[#allocation4 + $0xb8] sm:$0xff] }
 0xbc4   :  { %v3592_v56 = vadd.f32 1e-16, %v3590_v53  ;;  %v3647_v50 = vpop.permute.xlu1 %3646  ;;  %v6750_v53 = vld [vmem:[#allocation4 + $0x58] sm:$0xff] }
 0xbc5   :  { %v3589_v57 = vsub.f32 %v7836_v54, %v3585_v55  ;;  %v3623_v12 = vadd.f32 %v3619_v3, %v3613_v11  ;;  %v6752_v55 = vld [vmem:[#allocation4 + $0x50] sm:$0xff]  ;;  %v6762_v3 = vld [vmem:[#allocation4 + $0x28] sm:$0xff] }
 0xbc6   :  { %v3602_v61 = vmul.f32 %v3599_v41, %v3592_v56  ;;  %v6753_v56 = vld [vmem:[#allocation4 + $0xc0] sm:$0xff]  ;;  %v6765_v11 = vld [vmem:[#allocation4 + $0x90] sm:$0xff] }
 0xbc7   :  { %v3591_v47 = vadd.f32 1e-16, %v3589_v57  ;;  %v6754_v57 = vld [vmem:[#allocation4 + $0x48] sm:$0xff] }
 0xbc8   :  { %v3626_v20 = vmul.f32 %v3611_v48, %v3602_v61  ;;  %3604 = vst.msk [vmem:[#allocation2 + $0x4] sm:$0x4] %vm643_vm5, %v3602_v61  ;;  %v3651_v41 = vpop.permute.xlu1 %3650  ;;  %v6747_v48 = vld [vmem:[#allocation4 + $0xd8] sm:$0xff]  ;;  %v6757_v61 = vld [vmem:[#allocation4 + $0xb0] sm:$0xff] }
 0xbc9   :  { %v3601_v7 = vmul.f32 %v3595_v10, %v3591_v47  ;;  %v6758_v47 = vld [vmem:[#allocation4 + $0x38] sm:$0xff] }
 0xbca   :  { %v3630_v15 = vrot.slane %v3626_v20, 2  ;;  %v6760_v20 = vld [vmem:[#allocation4 + $0x30] sm:$0xff] }
 0xbcb   :  { %3603 = vst.msk [vmem:[#allocation2] sm:$0x4] %vm643_vm5, %v3601_v7  ;;  %v3625_v13 = vmul.f32 %v3607_v18, %v3601_v7  ;;  %v6751_v18 = vld [vmem:[#allocation4 + $0xc8] sm:$0xff]  ;;  %v6761_v7 = vld [vmem:[#allocation4 + $0xa0] sm:$0xff] }
 0xbcc   :  { %v3634_v43 = vadd.f32 %v3630_v15, %v3624_v44  ;;  %v6763_v44 = vld [vmem:[#allocation4 + $0x98] sm:$0xff]  ;;  %v6764_v15 = vld [vmem:[#allocation4 + $0x20] sm:$0xff] }
 0xbcd   :  { %v3629_v46 = vrot.slane %v3625_v13, 2  ;;  %v6766_v13 = vld [vmem:[#allocation4 + $0x18] sm:$0xff] }
 0xbce   :  { %v3638_v24 = vrot.slane %v3634_v43, 5  ;;  %v6767_v43 = vld [vmem:[#allocation4 + $0x88] sm:$0xff] }
 0xbcf   :  { %v3633_v40 = vadd.f32 %v3629_v46, %v3623_v12  ;;  %v6768_v12 = vld [vmem:[#allocation4 + $0x10] sm:$0xff]  ;;  %v6769_v46 = vld [vmem:[#allocation4 + $0x80] sm:$0xff] }
 0xbd0   :  { %v3642_v21 = vsub.f32 %v7834_v4, %v3638_v24  ;;  %v6771_v24 = vld [vmem:[#allocation4] sm:$0xff] }
 0xbd1   :  { %v3637_v33 = vrot.slane %v3633_v40, 5 }
 0xbd2   :  { %v3644_v37 = vadd.f32 1e-16, %v3642_v21 }
 0xbd3   :  { %v3641_v1 = vsub.f32 %v7836_v54, %v3637_v33  ;;  %v6740_v54 = vld [vmem:[#allocation4 + $0xf8] sm:$0xff] }
 0xbd4   :  { %v3654_v42 = vmul.f32 %v3651_v41, %v3644_v37 }
 0xbd5   :  { %v3643_v34 = vadd.f32 1e-16, %v3641_v1 }
 0xbd6   :  { %3656 = vst.msk [vmem:[#allocation2 + $0x4] sm:$0x8] %vm696_vm6, %v3654_v42 }
 0xbd7   :  { %v3653_v10 = vmul.f32 %v3647_v50, %v3643_v34  ;;  %v6770_v50 = vld [vmem:[#allocation4 + $0x8] sm:$0xff] }
 0xbd9   :  { %3655 = vst.msk [vmem:[#allocation2] sm:$0x8] %vm696_vm6, %v3653_v10 }
 0xbdd   :  { %v3658_v8 = vld [vmem:[#allocation2 + $0x4] sm:$0xf] }
 0xbde   :  { %6376 = vmatmul.mubr.msk.f32.vlgmr.msra.gmra.mxu1 %vm100_vm1, %v3658_v8 }
 0xbdf   :  { %6384 = vmatpush3.xpose.msk.msra.mxu1 %vm100_vm1, %v3658_v8  ;;  %6385 = vmatprep.mubr.msk.f32.mxu1 %vm6864_vm0, %v8130_v6 }
 0xbe0   :  { %v3657_v4 = vld [vmem:[#allocation2] sm:$0xf]  ;;  %6423 = vmatprep.subr.mxu1 %v8130_v6 }
 0xbe1   :  { %6357 = vmatmul.mubr.msk.f32.vlgmr.msra.gmra.mxu0 %vm100_vm1, %v3657_v4 }
 0xbe2   :  { %6379 = vmatpush3.xpose.msk.msra.mxu0 %vm100_vm1, %v3657_v4  ;;  %6386 = vmatmul.mubr.msk.f32.vlgmr.msra.gmra.mxu1 %vm100_vm1, %v3658_v8 }
 0xbe3   :  { %6424 = vmatpush3.msra.mxu1 %v6740_v54  ;;  %6380 = vmatprep.mubr.msk.f32.mxu0 %vm6864_vm0, %v8130_v6 }
 0xbe4   :  { %6425 = vmatprep.subr.mxu1 %v8130_v6  ;;  %6388 = vmatprep.subr.mxu0 %v8130_v6 }
 0xbe5   :  { %6426 = vmatpush3.msra.mxu1 %v6741_v23  ;;  %6381 = vmatmul.mubr.msk.f32.vlgmr.msra.gmra.mxu0 %vm100_vm1, %v3657_v4  ;;  %v3946_v23 = vld [vmem:[#allocation3 + $0x4] sm:$0xf] }
 0xbe6   :  { %6389 = vmatpush3.msra.mxu0 %v6742_v0  ;;  %6427 = vmatprep.subr.mxu1 %v8130_v6 }
 0xbe7   :  { %6390 = vmatprep.subr.mxu0 %v8130_v6  ;;  %6428 = vmatpush3.msra.mxu1 %v6743_v25 }
 0xbe8   :  { %6391 = vmatpush3.msra.mxu0 %v6744_v39  ;;  %6429 = vmatprep.subr.mxu1 %v8130_v6 }
 0xbe9   :  { %6392 = vmatprep.subr.mxu0 %v8130_v6  ;;  %6430 = vmatpush3.msra.mxu1 %v6745_v32  ;;  %v3945_v32 = vld [vmem:[#allocation3] sm:$0xf] }
 0xbea   :  { %6393 = vmatpush3.msra.mxu0 %v6746_v29  ;;  %6431 = vmatprep.subr.mxu1 %v8130_v6 }
 0xbeb   :  { %6394 = vmatprep.subr.mxu0 %v8130_v6  ;;  %6432 = vmatpush3.msra.mxu1 %v6747_v48 }
 0xbec   :  { %6395 = vmatpush3.msra.mxu0 %v6748_v51  ;;  %6433 = vmatprep.subr.mxu1 %v8130_v6 }
 0xbed   :  { %6396 = vmatprep.subr.mxu0 %v8130_v6  ;;  %6434 = vmatpush3.msra.mxu1 %v6749_v35 }
 0xbee   :  { %6397 = vmatpush3.msra.mxu0 %v6750_v53  ;;  %6435 = vmatprep.subr.mxu1 %v8130_v6 }
 0xbef   :  { %6398 = vmatprep.subr.mxu0 %v8130_v6  ;;  %6436 = vmatpush3.msra.mxu1 %v6751_v18 }
 0xbf0   :  { %6399 = vmatpush3.msra.mxu0 %v6752_v55  ;;  %6437 = vmatprep.subr.mxu1 %v8130_v6 }
 0xbf1   :  { %6400 = vmatprep.subr.mxu0 %v8130_v6  ;;  %6438 = vmatpush3.msra.mxu1 %v6753_v56 }
 0xbf2   :  { %6401 = vmatpush3.msra.mxu0 %v6754_v57  ;;  %6439 = vmatprep.subr.mxu1 %v8130_v6 }
 0xbf3   :  { %6402 = vmatprep.subr.mxu0 %v8130_v6  ;;  %6440 = vmatpush3.msra.mxu1 %v6755_v58 }
 0xbf4   :  { %6403 = vmatpush3.msra.mxu0 %v6756_v59  ;;  %6441 = vmatprep.subr.mxu1 %v8130_v6 }
 0xbf5   :  { %6404 = vmatprep.subr.mxu0 %v8130_v6  ;;  %6442 = vmatpush3.msra.mxu1 %v6757_v61 }
 0xbf6   :  { %6405 = vmatpush3.msra.mxu0 %v6758_v47  ;;  %6443 = vmatprep.subr.mxu1 %v8130_v6 }
 0xbf7   :  { %6406 = vmatprep.subr.mxu0 %v8130_v6  ;;  %6444 = vmatpush3.msra.mxu1 %v6759_v19 }
 0xbf8   :  { %6407 = vmatpush3.msra.mxu0 %v6760_v20  ;;  %6445 = vmatprep.subr.mxu1 %v8130_v6 }
 0xbf9   :  { %6408 = vmatprep.subr.mxu0 %v8130_v6  ;;  %6446 = vmatpush3.msra.mxu1 %v6761_v7 }
 0xbfa   :  { %6409 = vmatpush3.msra.mxu0 %v6762_v3  ;;  %6447 = vmatprep.subr.mxu1 %v8130_v6 }
 0xbfb   :  { %6410 = vmatprep.subr.mxu0 %v8130_v6  ;;  %6448 = vmatpush3.msra.mxu1 %v6763_v44 }
 0xbfc   :  { %6411 = vmatpush3.msra.mxu0 %v6764_v15  ;;  %6449 = vmatprep.subr.mxu1 %v8130_v6 }
 0xbfd   :  { %6412 = vmatprep.subr.mxu0 %v8130_v6  ;;  %6450 = vmatpush3.msra.mxu1 %v6765_v11 }
 0xbfe   :  { %6413 = vmatpush3.msra.mxu0 %v6766_v13  ;;  %6451 = vmatprep.subr.mxu1 %v8130_v6 }
 0xbff   :  { %6414 = vmatprep.subr.mxu0 %v8130_v6  ;;  %6452 = vmatpush3.msra.mxu1 %v6767_v43 }
 0xc00   :  { %6415 = vmatpush3.msra.mxu0 %v6768_v12  ;;  %6453 = vmatprep.subr.mxu1 %v8130_v6 }
 0xc01   :  { %6416 = vmatprep.subr.mxu0 %v8130_v6  ;;  %6454 = vmatpush3.msra.mxu1 %v6769_v46 }
 0xc02   :  { %6417 = vmatpush3.msra.mxu0 %v6770_v50  ;;  %6455 = vmatprep.mubr.msk.f32.mxu1 %vm6864_vm0, %v8130_v6 }
 0xc03   :  { %6418 = vmatprep.subr.mxu0 %v8130_v6  ;;  %6463 = vmatprep.subr.mxu1 %v8130_v6 }
 0xc04   :  { %6419 = vmatpush3.msra.mxu0 %v6771_v24  ;;  %6420 = vmatprep.mubr.msk.f32.mxu0 %vm6864_vm0, %v8130_v6 }
 0xc05   :  { %6458 = vmatprep.subr.mxu0 %v8130_v6 }
 0xc9e   :  { %v7916_v40 = vpop.f32.mrf.mxu1 }
 0xca0   :  { %v6377_v21 = vpop.f32.mrf.mxu1 }
 0xca1   :  { %v7918_v33 = vpop.f32.mrf.mxu0 }
 0xca2   :  { %v3941_v37 = vpop.f32.mrf.mxu1 }
 0xca3   :  { %v3984_v1 = vadd.f32 1e-16, %v3941_v37  ;;  %3954 = vperm.xlu1 %6613, %v3941_v37   ;;  %v6358_v41 = vpop.f32.mrf.mxu0 }
 0xca4   :  { %v6387_v42 = vpop.f32.mrf.mxu1 }
 0xca5   :  { %6664 = vrcp.f32 %v3984_v1  ;;  %v3871_v34 = vpop.f32.mrf.mxu0 }
 0xca6   :  { %v3983_v10 = vadd.f32 1e-16, %v3871_v34  ;;  %3949 = vperm.xlu0 %6612, %v3871_v34  }
 0xca7   :  { %v6382_v8 = vpop.f32.mrf.mxu0 }
 0xca8   :  { %6666 = vrcp.f32 %v3983_v10 }
 0xcb2   :  { %v6665_v4 = vpop.eup %6664 }
 0xcb3   :  { %3994 = vperm.xlu0 %6612, %v6665_v4  }
 0xcb5   :  { %v6667_v54 = vpop.eup %6666 }
 0xcb6   :  { %3989 = vperm.xlu1 %6613, %v6667_v54  }
 0xcb7   :  { %6615 = vset.pattern.permute.xlu0 %v8129_v16 }
 0xcb8   :  { %4006 = vperm.xlu0 %6615, %v3941_v37  }
 0xcba   :  { %6614 = vset.pattern.permute.xlu1 %v8129_v16 }
 0xcbb   :  { %4002 = vperm.xlu1 %6614, %v3871_v34  }
 0xcbc   :  { %6616 = vset.pattern.permute.xlu0 %v8107_v62 }
 0xcbd   :  { %4050 = vperm.xlu0 %6616, %v3871_v34  }
 0xcbf   :  { %4038 = vperm.xlu1 %6614, %v6667_v54  }
 0xcc1   :  { %4094 = vperm.xlu0 %6616, %v6665_v4  }
 0xcc3   :  { %4042 = vperm.xlu1 %6614, %v6665_v4  }
 0xcc5   :  { %6619 = vset.pattern.permute.xlu0 %v8108_v63 }
 0xcc6   :  { %4106 = vperm.xlu0 %6619, %v3941_v37  }
 0xcc7   :  { %6617 = vset.pattern.permute.xlu1 %v8107_v62 }
 0xcc8   :  { %4054 = vperm.xlu1 %6617, %v3941_v37  }
 0xcca   :  { %6620 = vset.pattern.permute.xlu0 %v8109_v17 }
 0xccc   :  { %4090 = vperm.xlu1 %6617, %v6667_v54  }
 0xcd0   :  { %6618 = vset.pattern.permute.xlu1 %v8108_v63 }
 0xcd1   :  { %4102 = vperm.xlu1 %6618, %v3871_v34  }
 0xcd5   :  { %4142 = vperm.xlu1 %6618, %v6667_v54  }
 0xcd9   :  { %4146 = vperm.xlu1 %6618, %v6665_v4  }
 0xcdd   :  { %6621 = vset.pattern.permute.xlu1 %v8109_v17 }
 0xd1e   :  { %v3955_v0 = vpop.permute.xlu1 %3954 }
 0xd1f   :  { %v3958_v25 = vmul.f32 %v3955_v0, %v3946_v23 }
 0xd21   :  { %v3962_v39 = vrot.slane %v3958_v25, 1  ;;  %v3950_v29 = vpop.permute.xlu0 %3949  ;;  %v3968_v35 = vrot.slane %v3958_v25, 2 }
 0xd22   :  { %v3957_v48 = vmul.f32 %v3950_v29, %v3945_v32 }
 0xd23   :  { %v3966_v51 = vadd.f32 %v3962_v39, %v3958_v25 }
 0xd24   :  { %v3961_v53 = vrot.slane %v3957_v48, 1  ;;  %v3967_v56 = vrot.slane %v3957_v48, 2 }
 0xd25   :  { %v3972_v18 = vadd.f32 %v3968_v35, %v3966_v51 }
 0xd26   :  { %v3965_v55 = vadd.f32 %v3961_v53, %v3957_v48 }
 0xd27   :  { %v3976_v57 = vrot.slane %v3972_v18, 1 }
 0xd28   :  { %v3971_v58 = vadd.f32 %v3967_v56, %v3965_v55 }
 0xd29   :  { %v3980_v59 = vsub.f32 %v7916_v40, %v3976_v57 }
 0xd2a   :  { %v3975_v61 = vrot.slane %v3971_v58, 1 }
 0xd2b   :  { %v3982_v19 = vadd.f32 1e-16, %v3980_v59 }
 0xd2c   :  { %v3979_v47 = vsub.f32 %v7918_v33, %v3975_v61 }
 0xd2e   :  { %v3995_v20 = vpop.permute.xlu0 %3994  ;;  %v3981_v3 = vadd.f32 1e-16, %v3979_v47 }
 0xd2f   :  { %v3998_v7 = vmul.f32 %v3995_v20, %v3982_v19 }
 0xd31   :  { %4000 = vst [vmem:[#allocation3 + $0x4] sm:$0x1] %v3998_v7  ;;  %v3990_v44 = vpop.permute.xlu1 %3989 }
 0xd32   :  { %v7930_v15 = vmul.f32 %v3990_v44, %v3981_v3 }
 0xd33   :  { %v4007_v11 = vpop.permute.xlu0 %4006 }
 0xd34   :  { %3999 = vst [vmem:[#allocation3] sm:$0x1] %v7930_v15  ;;  %v4012_v13 = vmul.f32 %v4007_v11, %v3946_v23  ;;  %v4010_v43 = vmul.f32 %v4007_v11, %v3998_v7 }
 0xd36   :  { %v4016_v12 = vrot.slane %v4012_v13, 2  ;;  %v4003_v46 = vpop.permute.xlu1 %4002  ;;  %v4022_v21 = vrot.slane %v4012_v13, 3 }
 0xd37   :  { %v4011_v50 = vmul.f32 %v4003_v46, %v3945_v32  ;;  %v4009_v37 = vmul.f32 %v4003_v46, %v7930_v15 }
 0xd38   :  { %v4020_v24 = vadd.f32 %v4016_v12, %v4010_v43  ;;  %v4051_v29 = vpop.permute.xlu0 %4050 }
 0xd39   :  { %v4015_v1 = vrot.slane %v4011_v50, 2  ;;  %v4021_v10 = vrot.slane %v4011_v50, 3  ;;  %v4069_v59 = vmul.f32 %v4051_v29, %v3945_v32  ;;  %v4057_v44 = vmul.f32 %v4051_v29, %v7930_v15 }
 0xd3a   :  { %v4039_v41 = vpop.permute.xlu1 %4038  ;;  %v4026_v42 = vadd.f32 %v4022_v21, %v4020_v24 }
 0xd3b   :  { %v4019_v34 = vadd.f32 %v4015_v1, %v4009_v37  ;;  %v4073_v43 = vrot.slane %v4069_v59, 3 }
 0xd3c   :  { %v4030_v8 = vrot.slane %v4026_v42, 7  ;;  %v4095_v47 = vpop.permute.xlu0 %4094 }
 0xd3d   :  { %v4025_v4 = vadd.f32 %v4021_v10, %v4019_v34 }
 0xd3e   :  { %v4034_v54 = vsub.f32 %v7916_v40, %v4030_v8  ;;  %v4043_v0 = vpop.permute.xlu1 %4042 }
 0xd3f   :  { %v4029_v25 = vrot.slane %v4025_v4, 7 }
 0xd40   :  { %v4036_v39 = vadd.f32 1e-16, %v4034_v54 }
 0xd41   :  { %v4033_v48 = vsub.f32 %v7918_v33, %v4029_v25  ;;  %v4107_v50 = vpop.permute.xlu0 %4106 }
 0xd42   :  { %v4046_v51 = vmul.f32 %v4043_v0, %v4036_v39  ;;  %v4110_v4 = vmul.f32 %v4107_v50, %v3998_v7 }
 0xd43   :  { %v4035_v35 = vadd.f32 1e-16, %v4033_v48  ;;  %v4055_v53 = vpop.permute.xlu1 %4054 }
 0xd44   :  { %4048 = vst [vmem:[#allocation3 + $0x4] sm:$0x2] %v4046_v51  ;;  %v4060_v18 = vmul.f32 %v4055_v53, %v4046_v51  ;;  %v4070_v55 = vmul.f32 %v4055_v53, %v3946_v23  ;;  %v4058_v57 = vmul.f32 %v4055_v53, %v3998_v7  ;;  %v4112_v23 = vmul.f32 %v4107_v50, %v4046_v51 }
 0xd45   :  { %v4045_v56 = vmul.f32 %v4039_v41, %v4035_v35 }
 0xd46   :  { %v4064_v58 = vrot.slane %v4060_v18, 1  ;;  %v4074_v20 = vrot.slane %v4070_v55, 3  ;;  %v4116_v34 = vrot.slane %v4112_v23, 1 }
 0xd47   :  { %v4059_v61 = vmul.f32 %v4051_v29, %v4045_v56  ;;  %4047 = vst [vmem:[#allocation3] sm:$0x2] %v4045_v56  ;;  %v4091_v3 = vpop.permute.xlu1 %4090 }
 0xd48   :  { %v4068_v19 = vadd.f32 %v4064_v58, %v4058_v57  ;;  %v4120_v39 = vadd.f32 %v4116_v34, %v4110_v4 }
 0xd49   :  { %v4063_v11 = vrot.slane %v4059_v61, 1 }
 0xd4a   :  { %v4078_v13 = vadd.f32 %v4074_v20, %v4068_v19 }
 0xd4b   :  { %v4067_v12 = vadd.f32 %v4063_v11, %v4057_v44 }
 0xd4c   :  { %v4082_v46 = vrot.slane %v4078_v13, 6  ;;  %v4103_v37 = vpop.permute.xlu1 %4102 }
 0xd4d   :  { %v4077_v24 = vadd.f32 %v4073_v43, %v4067_v12  ;;  %v4111_v42 = vmul.f32 %v4103_v37, %v4045_v56  ;;  %v4109_v48 = vmul.f32 %v4103_v37, %v7930_v15 }
 0xd4e   :  { %v4086_v21 = vsub.f32 %v7916_v40, %v4082_v46 }
 0xd4f   :  { %v4081_v32 = vrot.slane %v4077_v24, 6  ;;  %v4115_v25 = vrot.slane %v4111_v42, 1 }
 0xd50   :  { %v4088_v1 = vadd.f32 1e-16, %v4086_v21  ;;  %v4143_v55 = vpop.permute.xlu1 %4142 }
 0xd51   :  { %v4085_v41 = vsub.f32 %v7918_v33, %v4081_v32  ;;  %v4119_v53 = vadd.f32 %v4115_v25, %v4109_v48 }
 0xd52   :  { %v4098_v10 = vmul.f32 %v4095_v47, %v4088_v1 }
 0xd53   :  { %v4087_v8 = vadd.f32 1e-16, %v4085_v41 }
 0xd54   :  { %v4122_v54 = vmul.f32 %v4107_v50, %v4098_v10  ;;  %4100 = vst [vmem:[#allocation3 + $0x4] sm:$0x4] %v4098_v10  ;;  %v4147_v47 = vpop.permute.xlu1 %4146 }
 0xd55   :  { %v4097_v0 = vmul.f32 %v4091_v3, %v4087_v8 }
 0xd56   :  { %v4126_v29 = vrot.slane %v4122_v54, 2 }
 0xd57   :  { %4099 = vst [vmem:[#allocation3] sm:$0x4] %v4097_v0  ;;  %v4121_v51 = vmul.f32 %v4103_v37, %v4097_v0 }
 0xd58   :  { %v4130_v35 = vadd.f32 %v4126_v29, %v4120_v39 }
 0xd59   :  { %v4125_v18 = vrot.slane %v4121_v51, 2 }
 0xd5a   :  { %v4134_v57 = vrot.slane %v4130_v35, 5 }
 0xd5b   :  { %v4129_v56 = vadd.f32 %v4125_v18, %v4119_v53 }
 0xd5c   :  { %v4138_v58 = vsub.f32 %v7916_v40, %v4134_v57  ;;  %v4435_v40 = vld [vmem:[#allocation2] sm:$0xf] }
 0xd5d   :  { %v4133_v59 = vrot.slane %v4129_v56, 5 }
 0xd5e   :  { %v4140_v7 = vadd.f32 1e-16, %v4138_v58 }
 0xd5f   :  { %v4137_v61 = vsub.f32 %v7918_v33, %v4133_v59 }
 0xd60   :  { %v4150_v19 = vmul.f32 %v4147_v47, %v4140_v7 }
 0xd61   :  { %v4139_v20 = vadd.f32 1e-16, %v4137_v61 }
 0xd62   :  { %4152 = vst [vmem:[#allocation3 + $0x4] sm:$0x8] %v4150_v19 }
 0xd63   :  { %v4149_v3 = vmul.f32 %v4143_v55, %v4139_v20 }
 0xd65   :  { %4151 = vst [vmem:[#allocation3] sm:$0x8] %v4149_v3 }
 0xd69   :  { %v4154_v15 = vld [vmem:[#allocation3 + $0x4] sm:$0xf] }
 0xd6a   :  { %6456 = vmatmul.mubr.f32.vlgmr.msra.gmra.mxu1 %v4154_v15 }
 0xd6b   :  { %6464 = vmatpush3.xpose.msra.mxu1 %v4154_v15  ;;  %6465 = vmatprep.mubr.msk.f32.mxu1 %vm6864_vm0, %v8130_v6 }
 0xd6c   :  { %v4153_v44 = vld [vmem:[#allocation3] sm:$0xf]  ;;  %6487 = vmatprep.subr.mxu1 %v8130_v6 }
 0xd6d   :  { %6421 = vmatmul.mubr.f32.vlgmr.msra.gmra.mxu0 %v4153_v44 }
 0xd6e   :  { %6459 = vmatpush3.xpose.msra.mxu0 %v4153_v44  ;;  %6466 = vmatmul.mubr.f32.vlgmr.msra.gmra.mxu1 %v4154_v15 }
 0xd6f   :  { %6460 = vmatprep.mubr.msk.f32.mxu0 %vm6864_vm0, %v8130_v6  ;;  %6488 = vmatpush3.msra.mxu1 %v7765_v30 }
 0xd70   :  { %6489 = vmatprep.subr.mxu1 %v8130_v6  ;;  %6468 = vmatprep.subr.mxu0 %v8130_v6 }
 0xd71   :  { %6461 = vmatmul.mubr.f32.vlgmr.msra.gmra.mxu0 %v4153_v44  ;;  %6490 = vmatpush3.msra.mxu1 %v7770_v9 }
 0xd72   :  { %6469 = vmatpush3.msra.mxu0 %v7773_v31  ;;  %6491 = vmatprep.subr.mxu1 %v8130_v6 }
 0xd73   :  { %6470 = vmatprep.subr.mxu0 %v8130_v6  ;;  %6492 = vmatpush3.msra.mxu1 %v7778_v27 }
 0xd74   :  { %6471 = vmatpush3.msra.mxu0 %v7781_v22  ;;  %6493 = vmatprep.subr.mxu1 %v8130_v6 }
 0xd75   :  { %6472 = vmatprep.subr.mxu0 %v8130_v6  ;;  %6494 = vmatpush3.msra.mxu1 %v7786_v49 }
 0xd76   :  { %6473 = vmatpush3.msra.mxu0 %v7789_v14  ;;  %6495 = vmatprep.subr.mxu1 %v8130_v6 }
 0xd77   :  { %6474 = vmatprep.subr.mxu0 %v8130_v6  ;;  %6496 = vmatpush3.msra.mxu1 %v7794_v60 }
 0xd78   :  { %6475 = vmatpush3.msra.mxu0 %v7797_v28  ;;  %6497 = vmatprep.subr.mxu1 %v8130_v6 }
 0xd79   :  { %6476 = vmatprep.subr.mxu0 %v8130_v6  ;;  %6498 = vmatpush3.msra.mxu1 %v7802_v26 }
 0xd7a   :  { %6477 = vmatpush3.msra.mxu0 %v7805_v2  ;;  %6499 = vmatprep.subr.mxu1 %v8130_v6 }
 0xd7b   :  { %6478 = vmatprep.subr.mxu0 %v8130_v6  ;;  %6500 = vmatpush3.msra.mxu1 %v7810_v38 }
 0xd7c   :  { %6479 = vmatpush3.msra.mxu0 %v7813_v36  ;;  %6501 = vmatprep.subr.mxu1 %v8130_v6  ;;  %v4436_v36 = vld [vmem:[#allocation2 + $0x4] sm:$0xf] }
 0xd7d   :  { %6480 = vmatprep.subr.mxu0 %v8130_v6  ;;  %6502 = vmatpush3.msra.mxu1 %v7818_v45 }
 0xd7e   :  { %6481 = vmatpush3.msra.mxu0 %v7821_v5  ;;  %6503 = vmatprep.mubr.msk.f32.mxu1 %vm6864_vm0, %v8130_v6 }
 0xd7f   :  { %6511 = vmatprep.subr.mxu1 %v8130_v6  ;;  %6482 = vmatprep.subr.mxu0 %v8130_v6 }
 0xd80   :  { %6483 = vmatpush3.msra.mxu0 %v7828_v52  ;;  %6484 = vmatprep.mubr.msk.f32.mxu0 %vm6864_vm0, %v8130_v6 }
 0xd81   :  { %6506 = vmatprep.subr.mxu0 %v8130_v6 }
 0xe2a   :  { %v7984_v30 = vpop.f32.mrf.mxu1 }
 0xe2c   :  { %v6457_v9 = vpop.f32.mrf.mxu1 }
 0xe2d   :  { %v7986_v31 = vpop.f32.mrf.mxu0 }
 0xe2e   :  { %v4431_v27 = vpop.f32.mrf.mxu1 }
 0xe2f   :  { %v4474_v22 = vadd.f32 1e-16, %v4431_v27  ;;  %4444 = vperm.xlu1 %6621, %v4431_v27   ;;  %v6422_v49 = vpop.f32.mrf.mxu0 }
 0xe30   :  { %v6467_v14 = vpop.f32.mrf.mxu1 }
 0xe31   :  { %6668 = vrcp.f32 %v4474_v22  ;;  %v4361_v60 = vpop.f32.mrf.mxu0 }
 0xe32   :  { %v4473_v28 = vadd.f32 1e-16, %v4361_v60  ;;  %4439 = vperm.xlu0 %6620, %v4361_v60  }
 0xe33   :  { %v6462_v26 = vpop.f32.mrf.mxu0 }
 0xe34   :  { %6670 = vrcp.f32 %v4473_v28 }
 0xe3e   :  { %v6669_v2 = vpop.eup %6668 }
 0xe3f   :  { %4484 = vperm.xlu0 %6620, %v6669_v2  }
 0xe41   :  { %v6671_v38 = vpop.eup %6670 }
 0xe42   :  { %4479 = vperm.xlu1 %6621, %v6671_v38  }
 0xe43   :  { %6623 = vset.pattern.permute.xlu0 %v8129_v16 }
 0xe44   :  { %4496 = vperm.xlu0 %6623, %v4431_v27  }
 0xe46   :  { %6622 = vset.pattern.permute.xlu1 %v8129_v16 }
 0xe47   :  { %4492 = vperm.xlu1 %6622, %v4361_v60  }
 0xe48   :  { %6624 = vset.pattern.permute.xlu0 %v8107_v62 }
 0xe49   :  { %4540 = vperm.xlu0 %6624, %v4361_v60  }
 0xe4b   :  { %4528 = vperm.xlu1 %6622, %v6671_v38  }
 0xe4d   :  { %4584 = vperm.xlu0 %6624, %v6669_v2  }
 0xe4f   :  { %4532 = vperm.xlu1 %6622, %v6669_v2  }
 0xe51   :  { %6627 = vset.pattern.permute.xlu0 %v8108_v63 }
 0xe52   :  { %4596 = vperm.xlu0 %6627, %v4431_v27  }
 0xe53   :  { %6625 = vset.pattern.permute.xlu1 %v8107_v62 }
 0xe54   :  { %4544 = vperm.xlu1 %6625, %v4431_v27  }
 0xe56   :  { %6628 = vset.pattern.permute.xlu0 %v8109_v17 }
 0xe58   :  { %4580 = vperm.xlu1 %6625, %v6671_v38  }
 0xe5c   :  { %6626 = vset.pattern.permute.xlu1 %v8108_v63 }
 0xe5d   :  { %4592 = vperm.xlu1 %6626, %v4361_v60  }
 0xe61   :  { %4632 = vperm.xlu1 %6626, %v6671_v38  }
 0xe65   :  { %4636 = vperm.xlu1 %6626, %v6669_v2  }
 0xe69   :  { %6629 = vset.pattern.permute.xlu1 %v8109_v17 }
 0xeaa   :  { %v4445_v45 = vpop.permute.xlu1 %4444 }
 0xeab   :  { %v4448_v5 = vmul.f32 %v4445_v45, %v4436_v36 }
 0xead   :  { %v4452_v52 = vrot.slane %v4448_v5, 1  ;;  %v4440_v33 = vpop.permute.xlu0 %4439  ;;  %v4458_v43 = vrot.slane %v4448_v5, 2 }
 0xeae   :  { %v4447_v11 = vmul.f32 %v4440_v33, %v4435_v40 }
 0xeaf   :  { %v4456_v13 = vadd.f32 %v4452_v52, %v4448_v5 }
 0xeb0   :  { %v4451_v12 = vrot.slane %v4447_v11, 1  ;;  %v4457_v24 = vrot.slane %v4447_v11, 2 }
 0xeb1   :  { %v4462_v46 = vadd.f32 %v4458_v43, %v4456_v13 }
 0xeb2   :  { %v4455_v50 = vadd.f32 %v4451_v12, %v4447_v11 }
 0xeb3   :  { %v4466_v23 = vrot.slane %v4462_v46, 1 }
 0xeb4   :  { %v4461_v21 = vadd.f32 %v4457_v24, %v4455_v50 }
 0xeb5   :  { %v4470_v37 = vsub.f32 %v7984_v30, %v4466_v23 }
 0xeb6   :  { %v4465_v32 = vrot.slane %v4461_v21, 1 }
 0xeb7   :  { %v4472_v1 = vadd.f32 1e-16, %v4470_v37 }
 0xeb8   :  { %v4469_v17 = vsub.f32 %v7986_v31, %v4465_v32 }
 0xeba   :  { %v4485_v41 = vpop.permute.xlu0 %4484  ;;  %v4471_v34 = vadd.f32 1e-16, %v4469_v17 }
 0xebb   :  { %v4488_v42 = vmul.f32 %v4485_v41, %v4472_v1 }
 0xebd   :  { %4490 = vst.msk [vmem:[#allocation2 + $0x4] sm:$0x1] %vm541_vm3, %v4488_v42  ;;  %v4480_v10 = vpop.permute.xlu1 %4479 }
 0xebe   :  { %v7999_v8 = vmul.f32 %v4480_v10, %v4471_v34 }
 0xebf   :  { %v4497_v4 = vpop.permute.xlu0 %4496 }
 0xec0   :  { %4489 = vst.msk [vmem:[#allocation2] sm:$0x1] %vm541_vm3, %v7999_v8  ;;  %v4502_v54 = vmul.f32 %v4497_v4, %v4436_v36  ;;  %v4500_v0 = vmul.f32 %v4497_v4, %v4488_v42 }
 0xec2   :  { %v4506_v25 = vrot.slane %v4502_v54, 2  ;;  %v4493_v39 = vpop.permute.xlu1 %4492  ;;  %v4512_v51 = vrot.slane %v4502_v54, 3 }
 0xec3   :  { %v4501_v29 = vmul.f32 %v4493_v39, %v4435_v40  ;;  %v4499_v35 = vmul.f32 %v4493_v39, %v7999_v8 }
 0xec4   :  { %v4510_v48 = vadd.f32 %v4506_v25, %v4500_v0  ;;  %v4541_v20 = vpop.permute.xlu0 %4540 }
 0xec5   :  { %v4505_v53 = vrot.slane %v4501_v29, 2  ;;  %v4511_v56 = vrot.slane %v4501_v29, 3  ;;  %v4559_v28 = vmul.f32 %v4541_v20, %v4435_v40  ;;  %v4547_v52 = vmul.f32 %v4541_v20, %v7999_v8 }
 0xec6   :  { %v4529_v18 = vpop.permute.xlu1 %4528  ;;  %v4516_v55 = vadd.f32 %v4512_v51, %v4510_v48 }
 0xec7   :  { %v4509_v57 = vadd.f32 %v4505_v53, %v4499_v35  ;;  %v4563_v13 = vrot.slane %v4559_v28, 3  ;;  %v4932_v28 = vld [vmem:[#allocation3 + $0x4] sm:$0xf] }
 0xec8   :  { %v4520_v58 = vrot.slane %v4516_v55, 7  ;;  %v4585_v2 = vpop.permute.xlu0 %4584 }
 0xec9   :  { %v4515_v59 = vadd.f32 %v4511_v56, %v4509_v57 }
 0xeca   :  { %v4524_v7 = vsub.f32 %v7984_v30, %v4520_v58  ;;  %v4533_v61 = vpop.permute.xlu1 %4532 }
 0xecb   :  { %v4519_v47 = vrot.slane %v4515_v59, 7 }
 0xecc   :  { %v4526_v19 = vadd.f32 1e-16, %v4524_v7 }
 0xecd   :  { %v4523_v3 = vsub.f32 %v7986_v31, %v4519_v47  ;;  %v4597_v46 = vpop.permute.xlu0 %4596 }
 0xece   :  { %v4536_v15 = vmul.f32 %v4533_v61, %v4526_v19  ;;  %v4600_v34 = vmul.f32 %v4597_v46, %v4488_v42 }
 0xecf   :  { %v4525_v44 = vadd.f32 1e-16, %v4523_v3  ;;  %v4545_v9 = vpop.permute.xlu1 %4544 }
 0xed0   :  { %4538 = vst.msk [vmem:[#allocation2 + $0x4] sm:$0x2] %vm590_vm4, %v4536_v15  ;;  %v4550_v27 = vmul.f32 %v4545_v9, %v4536_v15  ;;  %v4560_v22 = vmul.f32 %v4545_v9, %v4436_v36  ;;  %v4548_v14 = vmul.f32 %v4545_v9, %v4488_v42  ;;  %v4602_v50 = vmul.f32 %v4597_v46, %v4536_v15 }
 0xed1   :  { %v4535_v49 = vmul.f32 %v4529_v18, %v4525_v44 }
 0xed2   :  { %v4554_v60 = vrot.slane %v4550_v27, 1  ;;  %v4564_v45 = vrot.slane %v4560_v22, 3  ;;  %v4606_v17 = vrot.slane %v4602_v50, 1 }
 0xed3   :  { %v4549_v26 = vmul.f32 %v4541_v20, %v4535_v49  ;;  %4537 = vst.msk [vmem:[#allocation2] sm:$0x2] %vm590_vm4, %v4535_v49  ;;  %v4581_v5 = vpop.permute.xlu1 %4580 }
 0xed4   :  { %v4558_v38 = vadd.f32 %v4554_v60, %v4548_v14  ;;  %v4610_v0 = vadd.f32 %v4606_v17, %v4600_v34 }
 0xed5   :  { %v4553_v33 = vrot.slane %v4549_v26, 1 }
 0xed6   :  { %v4568_v11 = vadd.f32 %v4564_v45, %v4558_v38  ;;  %v4931_v45 = vld [vmem:[#allocation3] sm:$0xf] }
 0xed7   :  { %v4557_v43 = vadd.f32 %v4553_v33, %v4547_v52 }
 0xed8   :  { %v4572_v12 = vrot.slane %v4568_v11, 6  ;;  %v4593_v40 = vpop.permute.xlu1 %4592 }
 0xed9   :  { %v4567_v36 = vadd.f32 %v4563_v13, %v4557_v43  ;;  %v4601_v32 = vmul.f32 %v4593_v40, %v4535_v49  ;;  %v4599_v39 = vmul.f32 %v4593_v40, %v7999_v8 }
 0xeda   :  { %v4576_v24 = vsub.f32 %v7984_v30, %v4572_v12 }
 0xedb   :  { %v4571_v23 = vrot.slane %v4567_v36, 6  ;;  %v4605_v54 = vrot.slane %v4601_v32, 1 }
 0xedc   :  { %v4578_v21 = vadd.f32 1e-16, %v4576_v24  ;;  %v4633_v53 = vpop.permute.xlu1 %4632 }
 0xedd   :  { %v4575_v37 = vsub.f32 %v7986_v31, %v4571_v23  ;;  %v4609_v51 = vadd.f32 %v4605_v54, %v4599_v39 }
 0xede   :  { %v4588_v1 = vmul.f32 %v4585_v2, %v4578_v21 }
 0xedf   :  { %v4577_v41 = vadd.f32 1e-16, %v4575_v37 }
 0xee0   :  { %v4612_v10 = vmul.f32 %v4597_v46, %v4588_v1  ;;  %4590 = vst.msk [vmem:[#allocation2 + $0x4] sm:$0x4] %vm643_vm5, %v4588_v1  ;;  %v4637_v59 = vpop.permute.xlu1 %4636 }
 0xee1   :  { %v4587_v4 = vmul.f32 %v4581_v5, %v4577_v41 }
 0xee2   :  { %v4616_v25 = vrot.slane %v4612_v10, 2 }
 0xee3   :  { %4589 = vst.msk [vmem:[#allocation2] sm:$0x4] %vm643_vm5, %v4587_v4  ;;  %v4611_v29 = vmul.f32 %v4593_v40, %v4587_v4 }
 0xee4   :  { %v4620_v48 = vadd.f32 %v4616_v25, %v4610_v0 }
 0xee5   :  { %v4615_v35 = vrot.slane %v4611_v29, 2 }
 0xee6   :  { %v4624_v18 = vrot.slane %v4620_v48, 5 }
 0xee7   :  { %v4619_v55 = vadd.f32 %v4615_v35, %v4609_v51 }
 0xee8   :  { %v4628_v42 = vsub.f32 %v7984_v30, %v4624_v18 }
 0xee9   :  { %v4623_v57 = vrot.slane %v4619_v55, 5 }
 0xeea   :  { %v4630_v56 = vadd.f32 1e-16, %v4628_v42 }
 0xeeb   :  { %v4627_v58 = vsub.f32 %v7986_v31, %v4623_v57 }
 0xeec   :  { %v4640_v7 = vmul.f32 %v4637_v59, %v4630_v56 }
 0xeed   :  { %v4629_v61 = vadd.f32 1e-16, %v4627_v58 }
 0xeee   :  { %4642 = vst.msk [vmem:[#allocation2 + $0x4] sm:$0x8] %vm696_vm6, %v4640_v7 }
 0xeef   :  { %v4639_v47 = vmul.f32 %v4633_v53, %v4629_v61 }
 0xef1   :  { %4641 = vst.msk [vmem:[#allocation2] sm:$0x8] %vm696_vm6, %v4639_v47 }
 0xef5   :  { %v4644_v8 = vld [vmem:[#allocation2 + $0x4] sm:$0xf] }
 0xef6   :  { %6504 = vmatmul.mubr.msk.f32.vlgmr.msra.gmra.mxu1 %vm100_vm1, %v4644_v8  ;;  %v5316_v60 = vld [vmem:[#allocation2 + $0x4] sm:$0xf] }
 0xef7   :  { %6512 = vmatpush3.xpose.msk.msra.mxu1 %vm100_vm1, %v4644_v8  ;;  %6513 = vmatprep.mubr.msk.f32.mxu1 %vm6864_vm0, %v8130_v6 }
 0xef8   :  { %v4643_v30 = vld [vmem:[#allocation2] sm:$0xf] }
 0xef9   :  { %6485 = vmatmul.mubr.msk.f32.vlgmr.msra.gmra.mxu0 %vm100_vm1, %v4643_v30 }
 0xefa   :  { %6507 = vmatpush3.xpose.msk.msra.mxu0 %vm100_vm1, %v4643_v30  ;;  %6514 = vmatmul.mubr.msk.f32.vlgmr.msra.gmra.mxu1 %vm100_vm1, %v4644_v8 }
 0xefb   :  { %6508 = vmatprep.mubr.msk.f32.mxu0 %vm6864_vm0, %v8130_v6 }
 0xefd   :  { %6509 = vmatmul.mubr.msk.f32.vlgmr.msra.gmra.mxu0 %vm100_vm1, %v4643_v30 }
 0xfb6   :  { %v8028_v31 = vpop.f32.mrf.mxu1 }
 0xfb8   :  { %v6505_v19 = vpop.f32.mrf.mxu1 }
 0xfb9   :  { %v8030_v20 = vpop.f32.mrf.mxu0 }
 0xfba   :  { %v4927_v3 = vpop.f32.mrf.mxu1 }
 0xfbb   :  { %v4970_v15 = vadd.f32 1e-16, %v4927_v3  ;;  %4940 = vperm.xlu1 %6629, %v4927_v3   ;;  %v6486_v44 = vpop.f32.mrf.mxu0 }
 0xfbc   :  { %v6515_v9 = vpop.f32.mrf.mxu1 }
 0xfbd   :  { %6672 = vrcp.f32 %v4970_v15  ;;  %v4857_v27 = vpop.f32.mrf.mxu0 }
 0xfbe   :  { %v4969_v22 = vadd.f32 1e-16, %v4857_v27  ;;  %4935 = vperm.xlu0 %6628, %v4857_v27  }
 0xfbf   :  { %v6510_v49 = vpop.f32.mrf.mxu0 }
 0xfc0   :  { %6674 = vrcp.f32 %v4969_v22 }
 0xfca   :  { %v6673_v14 = vpop.eup %6672 }
 0xfcb   :  { %4980 = vperm.xlu0 %6628, %v6673_v14  }
 0xfcd   :  { %v6675_v6 = vpop.eup %6674 }
 0xfce   :  { %4975 = vperm.xlu1 %6629, %v6675_v6  }
 0xfcf   :  { %6631 = vset.pattern.permute.xlu0 %v8129_v16 }
 0xfd0   :  { %4992 = vperm.xlu0 %6631, %v4927_v3  }
 0xfd2   :  { %6630 = vset.pattern.permute.xlu1 %v8129_v16  ;;  %v5139_v16 = vld [vmem:[#allocation2] sm:$0xf] }
 0xfd3   :  { %4988 = vperm.xlu1 %6630, %v4857_v27  }
 0xfd4   :  { %6632 = vset.pattern.permute.xlu0 %v8107_v62 }
 0xfd5   :  { %5036 = vperm.xlu0 %6632, %v4857_v27  }
 0xfd7   :  { %5024 = vperm.xlu1 %6630, %v6675_v6  }
 0xfd9   :  { %5080 = vperm.xlu0 %6632, %v6673_v14  }
 0xfdb   :  { %5028 = vperm.xlu1 %6630, %v6673_v14  }
 0xfdd   :  { %6635 = vset.pattern.permute.xlu0 %v8108_v63 }
 0xfde   :  { %5092 = vperm.xlu0 %6635, %v4927_v3  }
 0xfdf   :  { %6633 = vset.pattern.permute.xlu1 %v8107_v62 }
 0xfe0   :  { %5040 = vperm.xlu1 %6633, %v4927_v3  }
 0xfe4   :  { %5076 = vperm.xlu1 %6633, %v6675_v6  }
 0xfe8   :  { %6634 = vset.pattern.permute.xlu1 %v8108_v63 }
 0xfe9   :  { %5088 = vperm.xlu1 %6634, %v4857_v27  }
 0xfed   :  { %5128 = vperm.xlu1 %6634, %v6675_v6  }
 0xff1   :  { %5132 = vperm.xlu1 %6634, %v6673_v14  }
 0xffc   :  { %5140 = vxpose.xlu0.b32.start.end [1/1] (short) (narrow) %v5139_v16, 64 }
0x101a   :  { %5317 = vxpose.xlu1.b32.start.end [1/1] (short) (narrow) %v5316_v60, 64 }
0x1036   :  { %v4941_v26 = vpop.permute.xlu1 %4940 }
0x1037   :  { %v4944_v2 = vmul.f32 %v4941_v26, %v4932_v28 }
0x1039   :  { %v4948_v38 = vrot.slane %v4944_v2, 1  ;;  %v4936_v5 = vpop.permute.xlu0 %4935  ;;  %v4954_v62 = vrot.slane %v4944_v2, 2 }
0x103a   :  { %v4943_v52 = vmul.f32 %v4936_v5, %v4931_v45 }
0x103b   :  { %v4952_v33 = vadd.f32 %v4948_v38, %v4944_v2 }
0x103c   :  { %v4947_v11 = vrot.slane %v4943_v52, 1  ;;  %v4953_v63 = vrot.slane %v4943_v52, 2 }
0x103d   :  { %v4958_v13 = vadd.f32 %v4954_v62, %v4952_v33 }
0x103e   :  { %v4951_v43 = vadd.f32 %v4947_v11, %v4943_v52 }
0x103f   :  { %v4962_v12 = vrot.slane %v4958_v13, 1 }
0x1040   :  { %v4957_v46 = vadd.f32 %v4953_v63, %v4951_v43 }
0x1041   :  { %v4966_v36 = vsub.f32 %v8028_v31, %v4962_v12 }
0x1042   :  { %v4961_v50 = vrot.slane %v4957_v46, 1 }
0x1043   :  { %v4968_v40 = vadd.f32 1e-16, %v4966_v36 }
0x1044   :  { %v4965_v24 = vsub.f32 %v8030_v20, %v4961_v50 }
0x1046   :  { %v4981_v23 = vpop.permute.xlu0 %4980  ;;  %v4967_v37 = vadd.f32 1e-16, %v4965_v24 }
0x1047   :  { %v4984_v21 = vmul.f32 %v4981_v23, %v4968_v40 }
0x1049   :  { %4986 = vst [vmem:[#allocation3 + $0x4] sm:$0x1] %v4984_v21  ;;  %v4976_v32 = vpop.permute.xlu1 %4975 }
0x104a   :  { %v8040_v17 = vmul.f32 %v4976_v32, %v4967_v37 }
0x104b   :  { %v4993_v1 = vpop.permute.xlu0 %4992 }
0x104c   :  { %4985 = vst [vmem:[#allocation3] sm:$0x1] %v8040_v17  ;;  %v4998_v41 = vmul.f32 %v4993_v1, %v4932_v28  ;;  %v4996_v34 = vmul.f32 %v4993_v1, %v4984_v21 }
0x104e   :  { %v5002_v10 = vrot.slane %v4998_v41, 2  ;;  %v4989_v4 = vpop.permute.xlu1 %4988  ;;  %v5008_v25 = vrot.slane %v4998_v41, 3 }
0x104f   :  { %v4997_v54 = vmul.f32 %v4989_v4, %v4931_v45  ;;  %v4995_v39 = vmul.f32 %v4989_v4, %v8040_v17 }
0x1050   :  { %v5006_v0 = vadd.f32 %v5002_v10, %v4996_v34  ;;  %v5037_v59 = vpop.permute.xlu0 %5036 }
0x1051   :  { %v5001_v29 = vrot.slane %v4997_v54, 2  ;;  %v5007_v53 = vrot.slane %v4997_v54, 3  ;;  %v5055_v9 = vmul.f32 %v5037_v59, %v4931_v45  ;;  %v5043_v16 = vmul.f32 %v5037_v59, %v8040_v17 }
0x1052   :  { %v5025_v48 = vpop.permute.xlu1 %5024  ;;  %v5012_v51 = vadd.f32 %v5008_v25, %v5006_v0 }
0x1053   :  { %v5005_v35 = vadd.f32 %v5001_v29, %v4995_v39  ;;  %v5059_v2 = vrot.slane %v5055_v9, 3 }
0x1054   :  { %v5016_v18 = vrot.slane %v5012_v51, 7  ;;  %v5081_v22 = vpop.permute.xlu0 %5080 }
0x1055   :  { %v5011_v55 = vadd.f32 %v5007_v53, %v5005_v35 }
0x1056   :  { %v5020_v42 = vsub.f32 %v8028_v31, %v5016_v18  ;;  %v5029_v57 = vpop.permute.xlu1 %5028 }
0x1057   :  { %v5015_v56 = vrot.slane %v5011_v55, 7 }
0x1058   :  { %v5022_v58 = vadd.f32 1e-16, %v5020_v42 }
0x1059   :  { %v5019_v7 = vsub.f32 %v8030_v20, %v5015_v56  ;;  %v5093_v52 = vpop.permute.xlu0 %5092 }
0x105a   :  { %v5032_v61 = vmul.f32 %v5029_v57, %v5022_v58  ;;  %v5096_v50 = vmul.f32 %v5093_v52, %v4984_v21 }
0x105b   :  { %v5021_v47 = vadd.f32 1e-16, %v5019_v7  ;;  %v5041_v8 = vpop.permute.xlu1 %5040 }
0x105c   :  { %5034 = vst [vmem:[#allocation3 + $0x4] sm:$0x2] %v5032_v61  ;;  %v5046_v30 = vmul.f32 %v5041_v8, %v5032_v61  ;;  %v5056_v19 = vmul.f32 %v5041_v8, %v4932_v28  ;;  %v5044_v15 = vmul.f32 %v5041_v8, %v4984_v21  ;;  %v5098_v28 = vmul.f32 %v5093_v52, %v5032_v61 }
0x105d   :  { %v5031_v3 = vmul.f32 %v5025_v48, %v5021_v47 }
0x105e   :  { %v5050_v44 = vrot.slane %v5046_v30, 1  ;;  %v5060_v14 = vrot.slane %v5056_v19, 3  ;;  %v5102_v12 = vrot.slane %v5098_v28, 1 }
0x105f   :  { %v5045_v27 = vmul.f32 %v5037_v59, %v5031_v3  ;;  %5033 = vst [vmem:[#allocation3] sm:$0x2] %v5031_v3  ;;  %v5077_v6 = vpop.permute.xlu1 %5076 }
0x1060   :  { %v5054_v49 = vadd.f32 %v5050_v44, %v5044_v15  ;;  %v5106_v37 = vadd.f32 %v5102_v12, %v5096_v50 }
0x1061   :  { %v5049_v60 = vrot.slane %v5045_v27, 1 }
0x1062   :  { %v5064_v26 = vadd.f32 %v5060_v14, %v5054_v49 }
0x1063   :  { %v5053_v38 = vadd.f32 %v5049_v60, %v5043_v16 }
0x1064   :  { %v5068_v5 = vrot.slane %v5064_v26, 6  ;;  %v5089_v11 = vpop.permute.xlu1 %5088 }
0x1065   :  { %v5063_v33 = vadd.f32 %v5059_v2, %v5053_v38  ;;  %v5097_v63 = vmul.f32 %v5089_v11, %v5031_v3  ;;  %v5095_v1 = vmul.f32 %v5089_v11, %v8040_v17 }
0x1066   :  { %v5072_v62 = vsub.f32 %v8028_v31, %v5068_v5 }
0x1067   :  { %v5067_v45 = vrot.slane %v5063_v33, 6  ;;  %v5101_v23 = vrot.slane %v5097_v63, 1 }
0x1068   :  { %v5074_v13 = vadd.f32 1e-16, %v5072_v62  ;;  %v5129_v54 = vpop.permute.xlu1 %5128 }
0x1069   :  { %v5071_v43 = vsub.f32 %v8030_v20, %v5067_v45  ;;  %v5105_v10 = vadd.f32 %v5101_v23, %v5095_v1 }
0x106a   :  { %v5084_v46 = vmul.f32 %v5081_v22, %v5074_v13 }
0x106b   :  { %v5073_v36 = vadd.f32 1e-16, %v5071_v43 }
0x106c   :  { %v5108_v24 = vmul.f32 %v5093_v52, %v5084_v46  ;;  %5086 = vst [vmem:[#allocation3 + $0x4] sm:$0x4] %v5084_v46  ;;  %v5133_v51 = vpop.permute.xlu1 %5132 }
0x106d   :  { %v5083_v40 = vmul.f32 %v5077_v6, %v5073_v36 }
0x106e   :  { %v5112_v32 = vrot.slane %v5108_v24, 2 }
0x106f   :  { %5085 = vst [vmem:[#allocation3] sm:$0x4] %v5083_v40  ;;  %v5107_v41 = vmul.f32 %v5089_v11, %v5083_v40 }
0x1070   :  { %v5116_v34 = vadd.f32 %v5112_v32, %v5106_v37 }
0x1071   :  { %v5111_v4 = vrot.slane %v5107_v41, 2 }
0x1072   :  { %v5120_v0 = vrot.slane %v5116_v34, 5 }
0x1073   :  { %v5115_v25 = vadd.f32 %v5111_v4, %v5105_v10 }
0x1074   :  { %v5124_v39 = vsub.f32 %v8028_v31, %v5120_v0 }
0x1075   :  { %v5119_v29 = vrot.slane %v5115_v25, 5 }
0x1076   :  { %v5126_v21 = vadd.f32 1e-16, %v5124_v39 }
0x1077   :  { %v5123_v48 = vsub.f32 %v8030_v20, %v5119_v29 }
0x1078   :  { %v5136_v35 = vmul.f32 %v5133_v51, %v5126_v21  ;;  %v5156_v53 = vpop.trf.xlu0 }
0x1079   :  { %v5125_v18 = vadd.f32 1e-16, %v5123_v48  ;;  %6518 = vmatprep.mubr.msk.f32.mxu0 %vm5173_vm7, %v5156_v53 }
0x107a   :  { %5138 = vst [vmem:[#allocation3 + $0x4] sm:$0x8] %v5136_v35 }
0x107b   :  { %v5135_v17 = vmul.f32 %v5129_v54, %v5125_v18 }
0x107c   :  { %v5157_v55 = vpop.trf.xlu0 }
0x107d   :  { %5137 = vst [vmem:[#allocation3] sm:$0x8] %v5135_v17 }
0x1080   :  { %v5158_v42 = vpop.trf.xlu0 }
0x1081   :  { %v5350_v57 = vld [vmem:[#allocation3 + $0x4] sm:$0xf] }
0x1082   :  { %6530 = vmatprep.subr.msk.mxu1 %vm5198_vm8, %v5350_v57 }
0x1083   :  { %6531 = vmatpush3.msk.msra.mxu1 %vm5198_vm8, %v5350_v57 }
0x1084   :  { %v5172_v31 = vld [vmem:[#allocation3] sm:$0xf]  ;;  %v5159_v56 = vpop.trf.xlu0 }
0x1085   :  { %6516 = vmatprep.subr.msk.mxu0 %vm5198_vm8, %v5172_v31 }
0x1086   :  { %6517 = vmatpush3.msk.msra.mxu0 %vm5198_vm8, %v5172_v31 }
0x1087   :  { %6519 = vmatmul.mubr.msk.f32.vlgmr.msra.gmra.mxu0 %vm5173_vm7, %v5157_v55 }
0x1088   :  { %6521 = vmatprep.mubr.msk.f32.mxu0 %vm5173_vm7, %v5158_v42  ;;  %v5160_v20 = vpop.trf.xlu0 }
0x108b   :  { %6522 = vmatmul.mubr.msk.f32.gmra.mxu0 %vm5173_vm7, %v5159_v56 }
0x108c   :  { %6524 = vmatprep.mubr.msk.f32.mxu0 %vm5173_vm7, %v5160_v20  ;;  %v5161_v58 = vpop.trf.xlu0 }
0x108f   :  { %6525 = vmatmul.mubr.msk.f32.gmra.mxu0 %vm5173_vm7, %v5161_v58 }
0x1090   :  { %v5162_v59 = vpop.trf.xlu0 }
0x1091   :  { %6527 = vmatprep.mubr.msk.f32.mxu0 %vm5173_vm7, %v5162_v59 }
0x1094   :  { %v5163_v7 = vpop.trf.xlu0 }
0x1095   :  { %6528 = vmatmul.mubr.msk.f32.gmra.mxu0 %vm5173_vm7, %v5163_v7 }
0x1096   :  { %v5333_v61 = vpop.trf.xlu1 }
0x1097   :  { %6532 = vmatprep.mubr.msk.f32.mxu1 %vm5173_vm7, %v5333_v61 }
0x109a   :  { %v5334_v47 = vpop.trf.xlu1 }
0x109b   :  { %6533 = vmatmul.mubr.msk.f32.vlgmr.msra.gmra.mxu1 %vm5173_vm7, %v5334_v47 }
0x109e   :  { %v5335_v8 = vpop.trf.xlu1 }
0x109f   :  { %6535 = vmatprep.mubr.msk.f32.mxu1 %vm5173_vm7, %v5335_v8 }
0x10a2   :  { %v5336_v30 = vpop.trf.xlu1 }
0x10a3   :  { %6536 = vmatmul.mubr.msk.f32.gmra.mxu1 %vm5173_vm7, %v5336_v30 }
0x10a6   :  { %v5337_v19 = vpop.trf.xlu1 }
0x10a7   :  { %6538 = vmatprep.mubr.msk.f32.mxu1 %vm5173_vm7, %v5337_v19 }
0x10aa   :  { %v5338_v3 = vpop.trf.xlu1 }
0x10ab   :  { %6539 = vmatmul.mubr.msk.f32.gmra.mxu1 %vm5173_vm7, %v5338_v3 }
0x10ae   :  { %v5339_v15 = vpop.trf.xlu1 }
0x10af   :  { %6541 = vmatprep.mubr.msk.f32.mxu1 %vm5173_vm7, %v5339_v15 }
0x10b2   :  { %v5340_v44 = vpop.trf.xlu1 }
0x10b3   :  { %6542 = vmatmul.mubr.msk.f32.gmra.mxu1 %vm5173_vm7, %v5340_v44 }
0x1147   :  { %v6520_v9 = vpop.f32.mrf.mxu0 }
0x1148   :  { %5308 = vst [vmem:[#allocation11 + $0x8] sm:$0xff] %v6520_v9 }
0x1149   :  { %v5268_v27 = vpop.f32.mrf.mxu0 }
0x114a   :  { %5307 = vst [vmem:[#allocation11] sm:$0xff] %v5268_v27 }
0x114b   :  { %v6523_v22 = vpop.f32.mrf.mxu0 }
0x114c   :  { %5310 = vst [vmem:[#allocation11 + $0x18] sm:$0xff] %v6523_v22 }
0x114d   :  { %v5278_v49 = vpop.f32.mrf.mxu0 }
0x114e   :  { %5309 = vst [vmem:[#allocation11 + $0x10] sm:$0xff] %v5278_v49 }
0x114f   :  { %v6526_v14 = vpop.f32.mrf.mxu0 }
0x1150   :  { %5312 = vst [vmem:[#allocation11 + $0x28] sm:$0xff] %v6526_v14 }
0x1151   :  { %v5288_v6 = vpop.f32.mrf.mxu0 }
0x1152   :  { %5311 = vst [vmem:[#allocation11 + $0x20] sm:$0xff] %v5288_v6 }
0x1155   :  { %v6529_v16 = vpop.f32.mrf.mxu0 }
0x1156   :  { %5314 = vst [vmem:[#allocation11 + $0x38] sm:$0xff] %v6529_v16 }
0x1157   :  { %v5298_v60 = vpop.f32.mrf.mxu0 }
0x1158   :  { %5313 = vst [vmem:[#allocation11 + $0x30] sm:$0xff] %v5298_v60 }
0x115b   :  { %v6534_v26 = vpop.f32.mrf.mxu1 }
0x115c   :  { %5485 = vst [vmem:[#allocation11 + $0x48] sm:$0xff] %v6534_v26 }
0x115d   :  { %v5444_v2 = vpop.f32.mrf.mxu1 }
0x115e   :  { %5484 = vst [vmem:[#allocation11 + $0x40] sm:$0xff] %v5444_v2 }
0x1163   :  { %v6537_v38 = vpop.f32.mrf.mxu1 }
0x1164   :  { %5487 = vst [vmem:[#allocation11 + $0x58] sm:$0xff] %v6537_v38 }
0x1165   :  { %v5454_v5 = vpop.f32.mrf.mxu1 }
0x1166   :  { %5486 = vst [vmem:[#allocation11 + $0x50] sm:$0xff] %v5454_v5 }
0x116b   :  { %v6540_v52 = vpop.f32.mrf.mxu1 }
0x116c   :  { %5489 = vst [vmem:[#allocation11 + $0x68] sm:$0xff] %v6540_v52 }
0x116d   :  { %v5464_v33 = vpop.f32.mrf.mxu1 }
0x116e   :  { %5488 = vst [vmem:[#allocation11 + $0x60] sm:$0xff] %v5464_v33 }
0x1173   :  { %v6543_v28 = vpop.f32.mrf.mxu1 }
0x1174   :  { %5491 = vst [vmem:[#allocation11 + $0x78] sm:$0xff] %v6543_v28 }
0x1175   :  { %v5474_v62 = vpop.f32.mrf.mxu1 }
0x1176   :  { %5490 = vst [vmem:[#allocation11 + $0x70] sm:$0xff] %v5474_v62 }
0x1177   :  { %6843 = shalt.err (!%p6840_p5)
}
0x1178   :  { %5503 = dma.vmem_to_hbm [thread:$0]  %s5498_s2, 2048, %s8077_s3, [#allocation7], %s6860_s20, %s6860_s20, %s6861_s21  }
0x1179   :  { %6856 = dma.done.wait [#allocation7], 2048  }
0x117a   :  { %6857 = vsyncadd [#allocation7], 4294965248 }
0x117b   :  { %5507 = vsyncpa [#allocation6], 1 }
0x117c   :  { %5508 = vsyncpa [#allocation9], 1 }
0x117d   :  { %5509 = vsyncpa [#allocation7], 1 }

</bundles_post_ra>
